<compile_context>
chip_gen: v7x
topology: tpu7x:2x2x1
jax: 0.10.0
libtpu: 0.0.40
codegen_flags: <defaults>
</compile_context>

<pallas_src>
import functools

import jax
import jax.numpy as jnp
from jax import lax
from jax.experimental import pallas as pl
from jax.experimental.pallas import tpu as pltpu

LANES = 128


def _round_up(x, m):
    return ((x + m - 1) // m) * m


def _conv_out(s, k, st):
    return (s - k) // st + 1


# ---------------------------------------------------------------------------
# Fused kernel: one batch block per grid step, everything resident in VMEM.
#
#   x1p_ref : (2, P1h, TB, K1) bf16   conv1 im2col patches, split by the
#                                     W-parity ("phase") that conv2's stride-2
#                                     window will need; K1 = 8*8*Cin.
#   w1_ref  : (K1, 128) bf16          conv1 weights, Cout padded 32 -> 128.
#   w2_ref  : (8, 256, 128) bf16      conv2, dot d = (kernel_row i)*2 + off;
#                                     rows [ph*128+cin] = tap (i, j=2*off+ph).
#   w3_ref  : (9, 128, 128) bf16      conv3 per-tap (Cin/Cout padded to 128).
#   wl1_ref : (P3*128, 512) bf16      FC1, rows = spatial-pos*128 + channel.
#   wl2_ref : (512, 128) bf16         FC2, output lanes padded to 128.
#   biases  : (1, 128/512) f32 (zero-padded).
#   o_ref   : (TB, 128) f32           lane-dense Q output block.
#   scratch : y1 (P1h*TB, 256) bf16, y2 (OH2*OW2*TB, 128) bf16,
#             y3 (TB, P3*128) bf16.
# ---------------------------------------------------------------------------
def _dqn_kernel(x1p_ref, w1_ref, b1_ref, w2_ref, b2_ref, w3_ref, b3_ref,
                wl1_ref, bl1_ref, wl2_ref, bl2_ref, o_ref,
                y1_ref, y2_ref, y3_ref, *,
                tb, wh1, oh2, ow2, oh3, ow3):
    f32 = jnp.float32
    p1h = x1p_ref.shape[1]
    k1 = x1p_ref.shape[3]

    # ---- conv1: taps fully merged into K (one GEMM per W-phase) -----------
    for ph in range(2):
        xph = x1p_ref[ph].reshape(p1h * tb, k1)       # free (tb % 8 == 0)
        a1 = jnp.dot(xph, w1_ref[...], preferred_element_type=f32) + b1_ref[...]
        y1_ref[:, ph * LANES:(ph + 1) * LANES] = (
            jnp.maximum(a1, 0.0).astype(y1_ref.dtype))

    # ---- conv2 (k4 s2): 8 dots / output row, K = 2 taps * 128 = 256 -------
    # y1 row index = (input_row * Wh1 + k) * TB + tb; lanes = [phase0 | phase1]
    for r2 in range(oh2):
        acc = jnp.zeros((ow2 * tb, LANES), f32)
        for i in range(4):
            for off in range(2):
                base = ((2 * r2 + i) * wh1 + off) * tb
                xt = y1_ref[pl.ds(base, ow2 * tb), :]          # (OW2*TB, 256)
                acc = acc + jnp.dot(xt, w2_ref[i * 2 + off],
                                    preferred_element_type=f32)
        y2_ref[pl.ds(r2 * ow2 * tb, ow2 * tb), :] = (
            jnp.maximum(acc + b2_ref[...], 0.0).astype(y2_ref.dtype))

    # ---- conv3 (k3 s1) + ReLU, flattened into lane-major (TB, P3*128) -----
    for r3 in range(oh3):
        acc = jnp.zeros((ow3 * tb, LANES), f32)
        for t in range(9):
            i, j = divmod(t, 3)
            base = ((r3 + i) * ow2 + j) * tb
            xt = y2_ref[pl.ds(base, ow3 * tb), :]              # (OW3*TB, 128)
            acc = acc + jnp.dot(xt, w3_ref[t], preferred_element_type=f32)
        yrow = jnp.maximum(acc + b3_ref[...], 0.0).astype(y3_ref.dtype)
        for c in range(ow3):                 # (TB, 128) lane-aligned stores
            p = r3 * ow3 + c
            y3_ref[:, p * LANES:(p + 1) * LANES] = yrow[c * tb:(c + 1) * tb, :]

    # ---- FC1 as ONE GEMM (K = P3*128) + ReLU, then FC2 (lane-padded) ------
    h = jnp.dot(y3_ref[...], wl1_ref[...], preferred_element_type=f32)
    h = jnp.maximum(h + bl1_ref[...], 0.0).astype(jnp.bfloat16)
    q = jnp.dot(h, wl2_ref[...], preferred_element_type=f32) + bl2_ref[...]
    o_ref[...] = q


def _dqn_pallas(x1p, p, *, tb, dims):
    oh1, ow1, wh1, oh2, ow2, oh3, ow3 = dims
    _, p1h, bp, k1 = x1p.shape
    nb = bp // tb
    p3 = oh3 * ow3

    kern = functools.partial(_dqn_kernel, tb=tb, wh1=wh1,
                             oh2=oh2, ow2=ow2, oh3=oh3, ow3=ow3)

    flops = 2 * bp * (oh1 * ow1 * k1 * 32
                      + oh2 * ow2 * 16 * 32 * 64
                      + oh3 * ow3 * 9 * 64 * 64
                      + p3 * 64 * 512
                      + 512 * LANES)
    param_bytes = sum(int(v.size) * v.dtype.itemsize for v in p.values())
    bytes_accessed = int(x1p.size) * 2 + param_bytes + bp * LANES * 4

    return pl.pallas_call(
        kern,
        grid=(nb,),
        in_specs=[
            pl.BlockSpec((2, p1h, tb, k1), lambda i: (0, 0, i, 0)),
            pl.BlockSpec(p["w1"].shape, lambda i: (0, 0)),
            pl.BlockSpec(p["b1"].shape, lambda i: (0, 0)),
            pl.BlockSpec(p["w2"].shape, lambda i: (0, 0, 0)),
            pl.BlockSpec(p["b2"].shape, lambda i: (0, 0)),
            pl.BlockSpec(p["w3"].shape, lambda i: (0, 0, 0)),
            pl.BlockSpec(p["b3"].shape, lambda i: (0, 0)),
            pl.BlockSpec(p["wl1"].shape, lambda i: (0, 0)),
            pl.BlockSpec(p["bl1"].shape, lambda i: (0, 0)),
            pl.BlockSpec(p["wl2"].shape, lambda i: (0, 0)),
            pl.BlockSpec(p["bl2"].shape, lambda i: (0, 0)),
        ],
        out_specs=pl.BlockSpec((tb, LANES), lambda i: (i, 0)),
        out_shape=jax.ShapeDtypeStruct((bp, LANES), jnp.float32),
        scratch_shapes=[
            pltpu.VMEM((p1h * tb, 2 * LANES), jnp.bfloat16),     # conv1 out
            pltpu.VMEM((oh2 * ow2 * tb, LANES), jnp.bfloat16),   # conv2 out
            pltpu.VMEM((tb, p3 * LANES), jnp.bfloat16),          # conv3 out (flat)
        ],
        compiler_params=pltpu.CompilerParams(
            dimension_semantics=("parallel",),
            vmem_limit_bytes=48 * 1024 * 1024,
        ),
        cost_estimate=pl.CostEstimate(
            flops=int(flops), transcendentals=0,
            bytes_accessed=int(bytes_accessed)),
    )(x1p, p["w1"], p["b1"], p["w2"], p["b2"], p["w3"], p["b3"],
      p["wl1"], p["bl1"], p["wl2"], p["bl2"])


# ---------------------------------------------------------------------------
# JAX-side prep: conv1 im2col with positions ordered (row, phase, k) so the
# kernel's conv2 reads are contiguous slabs.  ~3.6x the raw input, endorsed
# by the review for the channel-minor (C=4) first layer; it replaces the old
# per-forward phase-split pass entirely.
# ---------------------------------------------------------------------------
def _conv1_patches(x, kh, kw, stride):
    # x: (Bp, H, W, C) bf16 -> (2, OH1*Wh1, Bp, kh*kw*C)
    b, h, w, c = x.shape
    oh = _conv_out(h, kh, stride)
    ow = _conv_out(w, kw, stride)
    wh = (ow + 1) // 2
    taps = []
    for i in range(kh):
        for j in range(kw):
            taps.append(lax.slice(
                x, (0, i, j, 0),
                (b, i + stride * (oh - 1) + 1, j + stride * (ow - 1) + 1, c),
                (1, stride, stride, 1)))                       # (B, OH, OW, C)
    pat = jnp.stack(taps, axis=3).reshape(b, oh, ow, kh * kw * c)
    if ow % 2:                                                 # pad odd W-phase
        pat = jnp.pad(pat, ((0, 0), (0, 0), (0, 1), (0, 0)))
    pat = pat.reshape(b, oh, wh, 2, kh * kw * c)               # col = 2*k + ph
    pat = jnp.transpose(pat, (3, 1, 2, 0, 4))                  # (2, OH, Wh, B, K1)
    return pat.reshape(2, oh * wh, b, kh * kw * c)


# ---------------------------------------------------------------------------
# Parameter init (PyTorch layouts) and one-time kernel-ready packing.
# ---------------------------------------------------------------------------
def init_params(key, c, h, w, n_actions):
    oh = _conv_out(_conv_out(_conv_out(h, 8, 4), 4, 2), 3, 1)
    ow = _conv_out(_conv_out(_conv_out(w, 8, 4), 4, 2), 3, 1)
    flat = 64 * oh * ow
    keys = jax.random.split(key, 8)

    def rn(k, shape, scale=0.05):
        return (scale * jax.random.normal(k, shape)).astype(jnp.float32)

    # TODO(synk): exact orthogonal layer_init is not replicated; deterministic
    # scaled normals preserve forward-pass semantics/shapes.
    return {
        "w1": rn(keys[0], (32, c, 8, 8)), "b1": jnp.zeros((32,), jnp.float32),
        "w2": rn(keys[1], (64, 32, 4, 4)), "b2": jnp.zeros((64,), jnp.float32),
        "w3": rn(keys[2], (64, 64, 3, 3)), "b3": jnp.zeros((64,), jnp.float32),
        "wl1": rn(keys[3], (512, flat)), "bl1": rn(keys[4], (512,)),
        "wl2": rn(keys[5], (n_actions, 512)), "bl2": rn(keys[6], (n_actions,)),
    }


def prepare_params(params, h, w):
    """One-time conversion of PyTorch-layout weights into kernel-ready layout."""
    oh1, ow1 = _conv_out(h, 8, 4), _conv_out(w, 8, 4)
    oh2, ow2 = _conv_out(oh1, 4, 2), _conv_out(ow1, 4, 2)
    oh3, ow3 = _conv_out(oh2, 3, 1), _conv_out(ow2, 3, 1)

    def pad_bias(b):
        n = b.shape[0]
        out = jnp.zeros((1, max(LANES, n)), jnp.float32)
        return out.at[0, :n].set(b.astype(jnp.float32))

    # conv1: (32, C, 8, 8) -> (64*C, 128); K rows ordered (tap i*8+j, cin).
    w1 = params["w1"]
    co1, c, kh1, kw1 = w1.shape
    w1p = jnp.transpose(w1, (2, 3, 1, 0)).reshape(kh1 * kw1 * c, co1)
    w1p = jnp.pad(w1p, ((0, 0), (0, LANES - co1))).astype(jnp.bfloat16)

    # conv2: (64, 32, 4, 4) -> (8, 256, 128); dot d = i*2 + off,
    # rows [ph*128 + cin] = tap (i, j = 2*off + ph), cols = cout (padded).
    w2 = params["w2"]
    co2, ci2, kh2, _ = w2.shape
    w2p = jnp.zeros((kh2 * 2, 2 * LANES, LANES), jnp.float32)
    for i in range(kh2):
        for off in range(2):
            for ph in range(2):
                j = 2 * off + ph
                blk = jnp.transpose(w2[:, :, i, j])            # (cin, cout)
                w2p = w2p.at[i * 2 + off,
                             ph * LANES:ph * LANES + ci2, :co2].set(blk)
    w2p = w2p.astype(jnp.bfloat16)

    # conv3: (64, 64, 3, 3) -> (9, 128, 128) per-tap, Cin/Cout padded.
    w3 = params["w3"]
    co3, ci3, kh3, kw3 = w3.shape
    w3p = jnp.zeros((kh3 * kw3, LANES, LANES), jnp.float32)
    for t in range(kh3 * kw3):
        i, j = divmod(t, kw3)
        w3p = w3p.at[t, :ci3, :co3].set(jnp.transpose(w3[:, :, i, j]))
    w3p = w3p.astype(jnp.bfloat16)

    # FC1: (512, 64*OH3*OW3) NCHW-flatten -> (OH3*OW3*128, 512),
    # rows = spatial-position*128 + channel (channels zero-padded 64 -> 128).
    hidden, _ = params["wl1"].shape
    wl1 = params["wl1"].reshape(hidden, co3, oh3, ow3)
    wl1 = jnp.transpose(wl1, (2, 3, 1, 0))                     # (OH3,OW3,C3,512)
    wl1 = jnp.pad(wl1, ((0, 0), (0, 0), (0, LANES - co3), (0, 0)))
    wl1p = wl1.reshape(oh3 * ow3 * LANES, hidden).astype(jnp.bfloat16)

    # FC2: (n_actions, 512) -> (512, 128) lane-padded for lane-dense stores.
    n_actions = params["wl2"].shape[0]
    wl2p = jnp.zeros((hidden, LANES), jnp.float32).at[:, :n_actions].set(
        params["wl2"].T).astype(jnp.bfloat16)
    bl2p = jnp.zeros((1, LANES), jnp.float32).at[0, :n_actions].set(params["bl2"])

    return {
        "w1": w1p, "b1": pad_bias(params["b1"]),
        "w2": w2p, "b2": pad_bias(params["b2"]),
        "w3": w3p, "b3": pad_bias(params["b3"]),
        "wl1": wl1p, "bl1": params["bl1"].reshape(1, -1).astype(jnp.float32),
        "wl2": wl2p, "bl2": bl2p,
    }


# ---------------------------------------------------------------------------
# Full DQN forward: obs (NCHW) -> Q(s, *).
# ---------------------------------------------------------------------------
def dqn_forward(obs_nchw, prepared, *, n_actions):
    x = obs_nchw.astype(jnp.float32)          # torch.as_tensor(..., float32)
    B, C, H, W = x.shape
    oh1, ow1 = _conv_out(H, 8, 4), _conv_out(W, 8, 4)
    oh2, ow2 = _conv_out(oh1, 4, 2), _conv_out(ow1, 4, 2)
    oh3, ow3 = _conv_out(oh2, 3, 1), _conv_out(ow2, 3, 1)
    wh1 = (ow1 + 1) // 2

    # >=2 parallel grid blocks when B >= 16 (v7x has 2 TCs), TB capped at 32
    # to bound the double-buffered VMEM footprint, multiple of 8 sublanes.
    tb = max(8, min(32, _round_up(-(-B // 2), 8)))
    bp = _round_up(B, tb)

    x = jnp.transpose(x, (0, 2, 3, 1)).astype(jnp.bfloat16)    # NCHW -> NHWC
    if bp != B:
        x = jnp.pad(x, ((0, bp - B), (0, 0), (0, 0), (0, 0)))
    x1p = _conv1_patches(x, kh=8, kw=8, stride=4)              # (2, P1h, Bp, K1)

    q = _dqn_pallas(x1p, prepared, tb=tb,
                    dims=(oh1, ow1, wh1, oh2, ow2, oh3, ow3))
    return q[:B, :n_actions]


# ---------------------------------------------------------------------------
# Pure-JAX reference (float32) for a numerical sanity check.
# ---------------------------------------------------------------------------
def dqn_reference(obs, params):
    x = obs.astype(jnp.float32)

    def conv(x, w, b, stride):
        y = lax.conv_general_dilated(
            x, w, (stride, stride), "VALID",
            dimension_numbers=("NCHW", "OIHW", "NCHW"))
        return jax.nn.relu(y + b[None, :, None, None])

    x = conv(x, params["w1"], params["b1"], 4)
    x = conv(x, params["w2"], params["b2"], 2)
    x = conv(x, params["w3"], params["b3"], 1)
    x = x.reshape(x.shape[0], -1)                              # NCHW flatten
    x = jax.nn.relu(x @ params["wl1"].T + params["bl1"])
    return x @ params["wl2"].T + params["bl2"]


if __name__ == "__main__":
    key = jax.random.PRNGKey(0)
    B, C, H, W = 2, 4, 36, 36          # 36x36 -> 8x8 -> 3x3 -> 1x1 feature map
    n_actions = 6

    k_param, k_obs = jax.random.split(key)
    params = init_params(k_param, C, H, W, n_actions)
    prepared = prepare_params(params, H, W)      # one-time weight packing
    obs = jax.random.uniform(k_obs, (B, C, H, W), dtype=jnp.float32)

    fwd = jax.jit(functools.partial(dqn_forward, n_actions=n_actions))
    q = fwd(obs, prepared)
    jax.block_until_ready(q)
    assert q.shape == (B, n_actions), q.shape
    assert q.dtype == jnp.float32

    q_ref = dqn_reference(obs, params)
    err = float(jnp.max(jnp.abs(q - q_ref)))
    assert err < 5e-2, f"max abs error vs reference: {err}"
    print("KERNEL_OK")
</pallas_src>

<mosaic_0001>
module attributes {stable_mosaic.version = 11 : i64} {
  func.func @_dqn_kernel(%arg0: i32, %arg1: memref<2x32x8x256xbf16, #tpu.memory_space<vmem>>, %arg2: memref<256x128xbf16, #tpu.memory_space<vmem>>, %arg3: memref<1x128xf32, #tpu.memory_space<vmem>>, %arg4: memref<8x256x128xbf16, #tpu.memory_space<vmem>>, %arg5: memref<1x128xf32, #tpu.memory_space<vmem>>, %arg6: memref<9x128x128xbf16, #tpu.memory_space<vmem>>, %arg7: memref<1x128xf32, #tpu.memory_space<vmem>>, %arg8: memref<128x512xbf16, #tpu.memory_space<vmem>>, %arg9: memref<1x512xf32, #tpu.memory_space<vmem>>, %arg10: memref<512x128xbf16, #tpu.memory_space<vmem>>, %arg11: memref<1x128xf32, #tpu.memory_space<vmem>>, %arg12: memref<8x128xf32, #tpu.memory_space<vmem>>, %arg13: memref<256x256xbf16, #tpu.memory_space<vmem>>, %arg14: memref<72x128xbf16, #tpu.memory_space<vmem>>, %arg15: memref<8x128xbf16, #tpu.memory_space<vmem>>) attributes {dimension_semantics = [#tpu.dimension_semantics<parallel>], iteration_bounds = array<i64: 1>, scalar_prefetch = 0 : i64, scratch_operands = 3 : i64, tpu.core_type = #tpu.core_type<tc>, window_params = [{transform_indices = @transform_0, window_bounds = array<i64: 2, 32, 8, 256>}, {pipeline_mode = #tpu.pipeline_mode<synchronous>, transform_indices = @transform_1, window_bounds = array<i64: 256, 128>}, {pipeline_mode = #tpu.pipeline_mode<synchronous>, transform_indices = @transform_2, window_bounds = array<i64: 1, 128>}, {pipeline_mode = #tpu.pipeline_mode<synchronous>, transform_indices = @transform_3, window_bounds = array<i64: 8, 256, 128>}, {pipeline_mode = #tpu.pipeline_mode<synchronous>, transform_indices = @transform_4, window_bounds = array<i64: 1, 128>}, {pipeline_mode = #tpu.pipeline_mode<synchronous>, transform_indices = @transform_5, window_bounds = array<i64: 9, 128, 128>}, {pipeline_mode = #tpu.pipeline_mode<synchronous>, transform_indices = @transform_6, window_bounds = array<i64: 1, 128>}, {pipeline_mode = #tpu.pipeline_mode<synchronous>, transform_indices = @transform_7, window_bounds = array<i64: 128, 512>}, {pipeline_mode = #tpu.pipeline_mode<synchronous>, transform_indices = @transform_8, window_bounds = array<i64: 1, 512>}, {pipeline_mode = #tpu.pipeline_mode<synchronous>, transform_indices = @transform_9, window_bounds = array<i64: 512, 128>}, {pipeline_mode = #tpu.pipeline_mode<synchronous>, transform_indices = @transform_10, window_bounds = array<i64: 1, 128>}, {transform_indices = @transform_11, window_bounds = array<i64: 8, 128>}]} {
    %c0 = arith.constant 0 : index
    %c0_0 = arith.constant 0 : index
    %c0_1 = arith.constant 0 : index
    %c0_2 = arith.constant 0 : index
    %0 = vector.load %arg1[%c0, %c0_0, %c0_1, %c0_2] : memref<2x32x8x256xbf16, #tpu.memory_space<vmem>>, vector<1x32x8x256xbf16>
    %1 = vector.shape_cast %0 : vector<1x32x8x256xbf16> to vector<32x8x256xbf16>
    %2 = vector.shape_cast %1 : vector<32x8x256xbf16> to vector<256x256xbf16>
    %c0_3 = arith.constant 0 : index
    %c0_4 = arith.constant 0 : index
    %3 = vector.load %arg2[%c0_3, %c0_4] : memref<256x128xbf16, #tpu.memory_space<vmem>>, vector<256x128xbf16>
    %cst = arith.constant dense<0.000000e+00> : vector<256x128xf32>
    %4 = tpu.matmul %2, %3, %cst {dimension_numbers = #tpu.dot_dimension_numbers<[1], [0], [0], [1], [0, 0, 1, 1], [], []>} : vector<256x256xbf16>, vector<256x128xbf16>, vector<256x128xf32> -> vector<256x128xf32>
    %c0_5 = arith.constant 0 : index
    %c0_6 = arith.constant 0 : index
    %5 = vector.load %arg3[%c0_5, %c0_6] : memref<1x128xf32, #tpu.memory_space<vmem>>, vector<1x128xf32>
    %6 = vector.broadcast %5 : vector<1x128xf32> to vector<256x128xf32>
    %7 = arith.addf %4, %6 : vector<256x128xf32>
    %cst_7 = arith.constant 0.000000e+00 : f32
    %8 = vector.broadcast %cst_7 : f32 to vector<256x128xf32>
    %9 = arith.maximumf %7, %8 : vector<256x128xf32>
    %10 = arith.truncf %9 : vector<256x128xf32> to vector<256x128xbf16>
    %c0_8 = arith.constant 0 : index
    %c0_9 = arith.constant 0 : index
    %11 = vector.load %arg13[%c0_8, %c0_9] : memref<256x256xbf16, #tpu.memory_space<vmem>>, vector<256x128xbf16>
    tpu.vector_store %arg13[%c0_8, %c0_9], %10 {strides = array<i32>} : memref<256x256xbf16, #tpu.memory_space<vmem>>, vector<256x128xbf16>,
    %c1 = arith.constant 1 : index
    %c0_10 = arith.constant 0 : index
    %c0_11 = arith.constant 0 : index
    %c0_12 = arith.constant 0 : index
    %12 = vector.load %arg1[%c1, %c0_10, %c0_11, %c0_12] : memref<2x32x8x256xbf16, #tpu.memory_space<vmem>>, vector<1x32x8x256xbf16>
    %13 = vector.shape_cast %12 : vector<1x32x8x256xbf16> to vector<32x8x256xbf16>
    %14 = vector.shape_cast %13 : vector<32x8x256xbf16> to vector<256x256xbf16>
    %c0_13 = arith.constant 0 : index
    %c0_14 = arith.constant 0 : index
    %15 = vector.load %arg2[%c0_13, %c0_14] : memref<256x128xbf16, #tpu.memory_space<vmem>>, vector<256x128xbf16>
    %cst_15 = arith.constant dense<0.000000e+00> : vector<256x128xf32>
    %16 = tpu.matmul %14, %15, %cst_15 {dimension_numbers = #tpu.dot_dimension_numbers<[1], [0], [0], [1], [0, 0, 1, 1], [], []>} : vector<256x256xbf16>, vector<256x128xbf16>, vector<256x128xf32> -> vector<256x128xf32>
    %c0_16 = arith.constant 0 : index
    %c0_17 = arith.constant 0 : index
    %17 = vector.load %arg3[%c0_16, %c0_17] : memref<1x128xf32, #tpu.memory_space<vmem>>, vector<1x128xf32>
    %18 = vector.broadcast %17 : vector<1x128xf32> to vector<256x128xf32>
    %19 = arith.addf %16, %18 : vector<256x128xf32>
    %cst_18 = arith.constant 0.000000e+00 : f32
    %20 = vector.broadcast %cst_18 : f32 to vector<256x128xf32>
    %21 = arith.maximumf %19, %20 : vector<256x128xf32>
    %22 = arith.truncf %21 : vector<256x128xf32> to vector<256x128xbf16>
    %c0_19 = arith.constant 0 : index
    %c128 = arith.constant 128 : index
    %23 = vector.load %arg13[%c0_19, %c128] : memref<256x256xbf16, #tpu.memory_space<vmem>>, vector<256x128xbf16>
    tpu.vector_store %arg13[%c0_19, %c128], %22 {strides = array<i32>} : memref<256x256xbf16, #tpu.memory_space<vmem>>, vector<256x128xbf16>,
    %cst_20 = arith.constant 0.000000e+00 : f32
    %24 = vector.broadcast %cst_20 : f32 to vector<24x128xf32>
    %c0_21 = arith.constant 0 : index
    %c0_22 = arith.constant 0 : index
    %25 = vector.load %arg13[%c0_21, %c0_22] : memref<256x256xbf16, #tpu.memory_space<vmem>>, vector<24x256xbf16>
    %c0_23 = arith.constant 0 : index
    %c0_24 = arith.constant 0 : index
    %c0_25 = arith.constant 0 : index
    %26 = vector.load %arg4[%c0_23, %c0_24, %c0_25] : memref<8x256x128xbf16, #tpu.memory_space<vmem>>, vector<1x256x128xbf16>
    %27 = vector.shape_cast %26 : vector<1x256x128xbf16> to vector<256x128xbf16>
    %cst_26 = arith.constant dense<0.000000e+00> : vector<24x128xf32>
    %28 = tpu.matmul %25, %27, %cst_26 {dimension_numbers = #tpu.dot_dimension_numbers<[1], [0], [0], [1], [0, 0, 1, 1], [], []>} : vector<24x256xbf16>, vector<256x128xbf16>, vector<24x128xf32> -> vector<24x128xf32>
    %29 = arith.addf %24, %28 : vector<24x128xf32>
    %c8 = arith.constant 8 : index
    %c0_27 = arith.constant 0 : index
    %30 = vector.load %arg13[%c8, %c0_27] : memref<256x256xbf16, #tpu.memory_space<vmem>>, vector<24x256xbf16>
    %c1_28 = arith.constant 1 : index
    %c0_29 = arith.constant 0 : index
    %c0_30 = arith.constant 0 : index
    %31 = vector.load %arg4[%c1_28, %c0_29, %c0_30] : memref<8x256x128xbf16, #tpu.memory_space<vmem>>, vector<1x256x128xbf16>
    %32 = vector.shape_cast %31 : vector<1x256x128xbf16> to vector<256x128xbf16>
    %cst_31 = arith.constant dense<0.000000e+00> : vector<24x128xf32>
    %33 = tpu.matmul %30, %32, %cst_31 {dimension_numbers = #tpu.dot_dimension_numbers<[1], [0], [0], [1], [0, 0, 1, 1], [], []>} : vector<24x256xbf16>, vector<256x128xbf16>, vector<24x128xf32> -> vector<24x128xf32>
    %34 = arith.addf %29, %33 : vector<24x128xf32>
    %c32 = arith.constant 32 : index
    %c0_32 = arith.constant 0 : index
    %35 = vector.load %arg13[%c32, %c0_32] : memref<256x256xbf16, #tpu.memory_space<vmem>>, vector<24x256xbf16>
    %c2 = arith.constant 2 : index
    %c0_33 = arith.constant 0 : index
    %c0_34 = arith.constant 0 : index
    %36 = vector.load %arg4[%c2, %c0_33, %c0_34] : memref<8x256x128xbf16, #tpu.memory_space<vmem>>, vector<1x256x128xbf16>
    %37 = vector.shape_cast %36 : vector<1x256x128xbf16> to vector<256x128xbf16>
    %cst_35 = arith.constant dense<0.000000e+00> : vector<24x128xf32>
    %38 = tpu.matmul %35, %37, %cst_35 {dimension_numbers = #tpu.dot_dimension_numbers<[1], [0], [0], [1], [0, 0, 1, 1], [], []>} : vector<24x256xbf16>, vector<256x128xbf16>, vector<24x128xf32> -> vector<24x128xf32>
    %39 = arith.addf %34, %38 : vector<24x128xf32>
    %c40 = arith.constant 40 : index
    %c0_36 = arith.constant 0 : index
    %40 = vector.load %arg13[%c40, %c0_36] : memref<256x256xbf16, #tpu.memory_space<vmem>>, vector<24x256xbf16>
    %c3 = arith.constant 3 : index
    %c0_37 = arith.constant 0 : index
    %c0_38 = arith.constant 0 : index
    %41 = vector.load %arg4[%c3, %c0_37, %c0_38] : memref<8x256x128xbf16, #tpu.memory_space<vmem>>, vector<1x256x128xbf16>
    %42 = vector.shape_cast %41 : vector<1x256x128xbf16> to vector<256x128xbf16>
    %cst_39 = arith.constant dense<0.000000e+00> : vector<24x128xf32>
    %43 = tpu.matmul %40, %42, %cst_39 {dimension_numbers = #tpu.dot_dimension_numbers<[1], [0], [0], [1], [0, 0, 1, 1], [], []>} : vector<24x256xbf16>, vector<256x128xbf16>, vector<24x128xf32> -> vector<24x128xf32>
    %44 = arith.addf %39, %43 : vector<24x128xf32>
    %c64 = arith.constant 64 : index
    %c0_40 = arith.constant 0 : index
    %45 = vector.load %arg13[%c64, %c0_40] : memref<256x256xbf16, #tpu.memory_space<vmem>>, vector<24x256xbf16>
    %c4 = arith.constant 4 : index
    %c0_41 = arith.constant 0 : index
    %c0_42 = arith.constant 0 : index
    %46 = vector.load %arg4[%c4, %c0_41, %c0_42] : memref<8x256x128xbf16, #tpu.memory_space<vmem>>, vector<1x256x128xbf16>
    %47 = vector.shape_cast %46 : vector<1x256x128xbf16> to vector<256x128xbf16>
    %cst_43 = arith.constant dense<0.000000e+00> : vector<24x128xf32>
    %48 = tpu.matmul %45, %47, %cst_43 {dimension_numbers = #tpu.dot_dimension_numbers<[1], [0], [0], [1], [0, 0, 1, 1], [], []>} : vector<24x256xbf16>, vector<256x128xbf16>, vector<24x128xf32> -> vector<24x128xf32>
    %49 = arith.addf %44, %48 : vector<24x128xf32>
    %c72 = arith.constant 72 : index
    %c0_44 = arith.constant 0 : index
    %50 = vector.load %arg13[%c72, %c0_44] : memref<256x256xbf16, #tpu.memory_space<vmem>>, vector<24x256xbf16>
    %c5 = arith.constant 5 : index
    %c0_45 = arith.constant 0 : index
    %c0_46 = arith.constant 0 : index
    %51 = vector.load %arg4[%c5, %c0_45, %c0_46] : memref<8x256x128xbf16, #tpu.memory_space<vmem>>, vector<1x256x128xbf16>
    %52 = vector.shape_cast %51 : vector<1x256x128xbf16> to vector<256x128xbf16>
    %cst_47 = arith.constant dense<0.000000e+00> : vector<24x128xf32>
    %53 = tpu.matmul %50, %52, %cst_47 {dimension_numbers = #tpu.dot_dimension_numbers<[1], [0], [0], [1], [0, 0, 1, 1], [], []>} : vector<24x256xbf16>, vector<256x128xbf16>, vector<24x128xf32> -> vector<24x128xf32>
    %54 = arith.addf %49, %53 : vector<24x128xf32>
    %c96 = arith.constant 96 : index
    %c0_48 = arith.constant 0 : index
    %55 = vector.load %arg13[%c96, %c0_48] : memref<256x256xbf16, #tpu.memory_space<vmem>>, vector<24x256xbf16>
    %c6 = arith.constant 6 : index
    %c0_49 = arith.constant 0 : index
    %c0_50 = arith.constant 0 : index
    %56 = vector.load %arg4[%c6, %c0_49, %c0_50] : memref<8x256x128xbf16, #tpu.memory_space<vmem>>, vector<1x256x128xbf16>
    %57 = vector.shape_cast %56 : vector<1x256x128xbf16> to vector<256x128xbf16>
    %cst_51 = arith.constant dense<0.000000e+00> : vector<24x128xf32>
    %58 = tpu.matmul %55, %57, %cst_51 {dimension_numbers = #tpu.dot_dimension_numbers<[1], [0], [0], [1], [0, 0, 1, 1], [], []>} : vector<24x256xbf16>, vector<256x128xbf16>, vector<24x128xf32> -> vector<24x128xf32>
    %59 = arith.addf %54, %58 : vector<24x128xf32>
    %c104 = arith.constant 104 : index
    %c0_52 = arith.constant 0 : index
    %60 = vector.load %arg13[%c104, %c0_52] : memref<256x256xbf16, #tpu.memory_space<vmem>>, vector<24x256xbf16>
    %c7 = arith.constant 7 : index
    %c0_53 = arith.constant 0 : index
    %c0_54 = arith.constant 0 : index
    %61 = vector.load %arg4[%c7, %c0_53, %c0_54] : memref<8x256x128xbf16, #tpu.memory_space<vmem>>, vector<1x256x128xbf16>
    %62 = vector.shape_cast %61 : vector<1x256x128xbf16> to vector<256x128xbf16>
    %cst_55 = arith.constant dense<0.000000e+00> : vector<24x128xf32>
    %63 = tpu.matmul %60, %62, %cst_55 {dimension_numbers = #tpu.dot_dimension_numbers<[1], [0], [0], [1], [0, 0, 1, 1], [], []>} : vector<24x256xbf16>, vector<256x128xbf16>, vector<24x128xf32> -> vector<24x128xf32>
    %64 = arith.addf %59, %63 : vector<24x128xf32>
    %c0_56 = arith.constant 0 : index
    %c0_57 = arith.constant 0 : index
    %65 = vector.load %arg5[%c0_56, %c0_57] : memref<1x128xf32, #tpu.memory_space<vmem>>, vector<1x128xf32>
    %66 = vector.broadcast %65 : vector<1x128xf32> to vector<24x128xf32>
    %67 = arith.addf %64, %66 : vector<24x128xf32>
    %cst_58 = arith.constant 0.000000e+00 : f32
    %68 = vector.broadcast %cst_58 : f32 to vector<24x128xf32>
    %69 = arith.maximumf %67, %68 : vector<24x128xf32>
    %70 = arith.truncf %69 : vector<24x128xf32> to vector<24x128xbf16>
    %c0_59 = arith.constant 0 : index
    %c0_60 = arith.constant 0 : index
    %71 = vector.load %arg14[%c0_59, %c0_60] : memref<72x128xbf16, #tpu.memory_space<vmem>>, vector<24x128xbf16>
    tpu.vector_store %arg14[%c0_59, %c0_60], %70 {strides = array<i32>} : memref<72x128xbf16, #tpu.memory_space<vmem>>, vector<24x128xbf16>,
    %cst_61 = arith.constant 0.000000e+00 : f32
    %72 = vector.broadcast %cst_61 : f32 to vector<24x128xf32>
    %c64_62 = arith.constant 64 : index
    %c0_63 = arith.constant 0 : index
    %73 = vector.load %arg13[%c64_62, %c0_63] : memref<256x256xbf16, #tpu.memory_space<vmem>>, vector<24x256xbf16>
    %c0_64 = arith.constant 0 : index
    %c0_65 = arith.constant 0 : index
    %c0_66 = arith.constant 0 : index
    %74 = vector.load %arg4[%c0_64, %c0_65, %c0_66] : memref<8x256x128xbf16, #tpu.memory_space<vmem>>, vector<1x256x128xbf16>
    %75 = vector.shape_cast %74 : vector<1x256x128xbf16> to vector<256x128xbf16>
    %cst_67 = arith.constant dense<0.000000e+00> : vector<24x128xf32>
    %76 = tpu.matmul %73, %75, %cst_67 {dimension_numbers = #tpu.dot_dimension_numbers<[1], [0], [0], [1], [0, 0, 1, 1], [], []>} : vector<24x256xbf16>, vector<256x128xbf16>, vector<24x128xf32> -> vector<24x128xf32>
    %77 = arith.addf %72, %76 : vector<24x128xf32>
    %c72_68 = arith.constant 72 : index
    %c0_69 = arith.constant 0 : index
    %78 = vector.load %arg13[%c72_68, %c0_69] : memref<256x256xbf16, #tpu.memory_space<vmem>>, vector<24x256xbf16>
    %c1_70 = arith.constant 1 : index
    %c0_71 = arith.constant 0 : index
    %c0_72 = arith.constant 0 : index
    %79 = vector.load %arg4[%c1_70, %c0_71, %c0_72] : memref<8x256x128xbf16, #tpu.memory_space<vmem>>, vector<1x256x128xbf16>
    %80 = vector.shape_cast %79 : vector<1x256x128xbf16> to vector<256x128xbf16>
    %cst_73 = arith.constant dense<0.000000e+00> : vector<24x128xf32>
    %81 = tpu.matmul %78, %80, %cst_73 {dimension_numbers = #tpu.dot_dimension_numbers<[1], [0], [0], [1], [0, 0, 1, 1], [], []>} : vector<24x256xbf16>, vector<256x128xbf16>, vector<24x128xf32> -> vector<24x128xf32>
    %82 = arith.addf %77, %81 : vector<24x128xf32>
    %c96_74 = arith.constant 96 : index
    %c0_75 = arith.constant 0 : index
    %83 = vector.load %arg13[%c96_74, %c0_75] : memref<256x256xbf16, #tpu.memory_space<vmem>>, vector<24x256xbf16>
    %c2_76 = arith.constant 2 : index
    %c0_77 = arith.constant 0 : index
    %c0_78 = arith.constant 0 : index
    %84 = vector.load %arg4[%c2_76, %c0_77, %c0_78] : memref<8x256x128xbf16, #tpu.memory_space<vmem>>, vector<1x256x128xbf16>
    %85 = vector.shape_cast %84 : vector<1x256x128xbf16> to vector<256x128xbf16>
    %cst_79 = arith.constant dense<0.000000e+00> : vector<24x128xf32>
    %86 = tpu.matmul %83, %85, %cst_79 {dimension_numbers = #tpu.dot_dimension_numbers<[1], [0], [0], [1], [0, 0, 1, 1], [], []>} : vector<24x256xbf16>, vector<256x128xbf16>, vector<24x128xf32> -> vector<24x128xf32>
    %87 = arith.addf %82, %86 : vector<24x128xf32>
    %c104_80 = arith.constant 104 : index
    %c0_81 = arith.constant 0 : index
    %88 = vector.load %arg13[%c104_80, %c0_81] : memref<256x256xbf16, #tpu.memory_space<vmem>>, vector<24x256xbf16>
    %c3_82 = arith.constant 3 : index
    %c0_83 = arith.constant 0 : index
    %c0_84 = arith.constant 0 : index
    %89 = vector.load %arg4[%c3_82, %c0_83, %c0_84] : memref<8x256x128xbf16, #tpu.memory_space<vmem>>, vector<1x256x128xbf16>
    %90 = vector.shape_cast %89 : vector<1x256x128xbf16> to vector<256x128xbf16>
    %cst_85 = arith.constant dense<0.000000e+00> : vector<24x128xf32>
    %91 = tpu.matmul %88, %90, %cst_85 {dimension_numbers = #tpu.dot_dimension_numbers<[1], [0], [0], [1], [0, 0, 1, 1], [], []>} : vector<24x256xbf16>, vector<256x128xbf16>, vector<24x128xf32> -> vector<24x128xf32>
    %92 = arith.addf %87, %91 : vector<24x128xf32>
    %c128_86 = arith.constant 128 : index
    %c0_87 = arith.constant 0 : index
    %93 = vector.load %arg13[%c128_86, %c0_87] : memref<256x256xbf16, #tpu.memory_space<vmem>>, vector<24x256xbf16>
    %c4_88 = arith.constant 4 : index
    %c0_89 = arith.constant 0 : index
    %c0_90 = arith.constant 0 : index
    %94 = vector.load %arg4[%c4_88, %c0_89, %c0_90] : memref<8x256x128xbf16, #tpu.memory_space<vmem>>, vector<1x256x128xbf16>
    %95 = vector.shape_cast %94 : vector<1x256x128xbf16> to vector<256x128xbf16>
    %cst_91 = arith.constant dense<0.000000e+00> : vector<24x128xf32>
    %96 = tpu.matmul %93, %95, %cst_91 {dimension_numbers = #tpu.dot_dimension_numbers<[1], [0], [0], [1], [0, 0, 1, 1], [], []>} : vector<24x256xbf16>, vector<256x128xbf16>, vector<24x128xf32> -> vector<24x128xf32>
    %97 = arith.addf %92, %96 : vector<24x128xf32>
    %c136 = arith.constant 136 : index
    %c0_92 = arith.constant 0 : index
    %98 = vector.load %arg13[%c136, %c0_92] : memref<256x256xbf16, #tpu.memory_space<vmem>>, vector<24x256xbf16>
    %c5_93 = arith.constant 5 : index
    %c0_94 = arith.constant 0 : index
    %c0_95 = arith.constant 0 : index
    %99 = vector.load %arg4[%c5_93, %c0_94, %c0_95] : memref<8x256x128xbf16, #tpu.memory_space<vmem>>, vector<1x256x128xbf16>
    %100 = vector.shape_cast %99 : vector<1x256x128xbf16> to vector<256x128xbf16>
    %cst_96 = arith.constant dense<0.000000e+00> : vector<24x128xf32>
    %101 = tpu.matmul %98, %100, %cst_96 {dimension_numbers = #tpu.dot_dimension_numbers<[1], [0], [0], [1], [0, 0, 1, 1], [], []>} : vector<24x256xbf16>, vector<256x128xbf16>, vector<24x128xf32> -> vector<24x128xf32>
    %102 = arith.addf %97, %101 : vector<24x128xf32>
    %c160 = arith.constant 160 : index
    %c0_97 = arith.constant 0 : index
    %103 = vector.load %arg13[%c160, %c0_97] : memref<256x256xbf16, #tpu.memory_space<vmem>>, vector<24x256xbf16>
    %c6_98 = arith.constant 6 : index
    %c0_99 = arith.constant 0 : index
    %c0_100 = arith.constant 0 : index
    %104 = vector.load %arg4[%c6_98, %c0_99, %c0_100] : memref<8x256x128xbf16, #tpu.memory_space<vmem>>, vector<1x256x128xbf16>
    %105 = vector.shape_cast %104 : vector<1x256x128xbf16> to vector<256x128xbf16>
    %cst_101 = arith.constant dense<0.000000e+00> : vector<24x128xf32>
    %106 = tpu.matmul %103, %105, %cst_101 {dimension_numbers = #tpu.dot_dimension_numbers<[1], [0], [0], [1], [0, 0, 1, 1], [], []>} : vector<24x256xbf16>, vector<256x128xbf16>, vector<24x128xf32> -> vector<24x128xf32>
    %107 = arith.addf %102, %106 : vector<24x128xf32>
    %c168 = arith.constant 168 : index
    %c0_102 = arith.constant 0 : index
    %108 = vector.load %arg13[%c168, %c0_102] : memref<256x256xbf16, #tpu.memory_space<vmem>>, vector<24x256xbf16>
    %c7_103 = arith.constant 7 : index
    %c0_104 = arith.constant 0 : index
    %c0_105 = arith.constant 0 : index
    %109 = vector.load %arg4[%c7_103, %c0_104, %c0_105] : memref<8x256x128xbf16, #tpu.memory_space<vmem>>, vector<1x256x128xbf16>
    %110 = vector.shape_cast %109 : vector<1x256x128xbf16> to vector<256x128xbf16>
    %cst_106 = arith.constant dense<0.000000e+00> : vector<24x128xf32>
    %111 = tpu.matmul %108, %110, %cst_106 {dimension_numbers = #tpu.dot_dimension_numbers<[1], [0], [0], [1], [0, 0, 1, 1], [], []>} : vector<24x256xbf16>, vector<256x128xbf16>, vector<24x128xf32> -> vector<24x128xf32>
    %112 = arith.addf %107, %111 : vector<24x128xf32>
    %c0_107 = arith.constant 0 : index
    %c0_108 = arith.constant 0 : index
    %113 = vector.load %arg5[%c0_107, %c0_108] : memref<1x128xf32, #tpu.memory_space<vmem>>, vector<1x128xf32>
    %114 = vector.broadcast %113 : vector<1x128xf32> to vector<24x128xf32>
    %115 = arith.addf %112, %114 : vector<24x128xf32>
    %cst_109 = arith.constant 0.000000e+00 : f32
    %116 = vector.broadcast %cst_109 : f32 to vector<24x128xf32>
    %117 = arith.maximumf %115, %116 : vector<24x128xf32>
    %118 = arith.truncf %117 : vector<24x128xf32> to vector<24x128xbf16>
    %c24 = arith.constant 24 : index
    %c0_110 = arith.constant 0 : index
    %119 = vector.load %arg14[%c24, %c0_110] : memref<72x128xbf16, #tpu.memory_space<vmem>>, vector<24x128xbf16>
    tpu.vector_store %arg14[%c24, %c0_110], %118 {strides = array<i32>} : memref<72x128xbf16, #tpu.memory_space<vmem>>, vector<24x128xbf16>,
    %cst_111 = arith.constant 0.000000e+00 : f32
    %120 = vector.broadcast %cst_111 : f32 to vector<24x128xf32>
    %c128_112 = arith.constant 128 : index
    %c0_113 = arith.constant 0 : index
    %121 = vector.load %arg13[%c128_112, %c0_113] : memref<256x256xbf16, #tpu.memory_space<vmem>>, vector<24x256xbf16>
    %c0_114 = arith.constant 0 : index
    %c0_115 = arith.constant 0 : index
    %c0_116 = arith.constant 0 : index
    %122 = vector.load %arg4[%c0_114, %c0_115, %c0_116] : memref<8x256x128xbf16, #tpu.memory_space<vmem>>, vector<1x256x128xbf16>
    %123 = vector.shape_cast %122 : vector<1x256x128xbf16> to vector<256x128xbf16>
    %cst_117 = arith.constant dense<0.000000e+00> : vector<24x128xf32>
    %124 = tpu.matmul %121, %123, %cst_117 {dimension_numbers = #tpu.dot_dimension_numbers<[1], [0], [0], [1], [0, 0, 1, 1], [], []>} : vector<24x256xbf16>, vector<256x128xbf16>, vector<24x128xf32> -> vector<24x128xf32>
    %125 = arith.addf %120, %124 : vector<24x128xf32>
    %c136_118 = arith.constant 136 : index
    %c0_119 = arith.constant 0 : index
    %126 = vector.load %arg13[%c136_118, %c0_119] : memref<256x256xbf16, #tpu.memory_space<vmem>>, vector<24x256xbf16>
    %c1_120 = arith.constant 1 : index
    %c0_121 = arith.constant 0 : index
    %c0_122 = arith.constant 0 : index
    %127 = vector.load %arg4[%c1_120, %c0_121, %c0_122] : memref<8x256x128xbf16, #tpu.memory_space<vmem>>, vector<1x256x128xbf16>
    %128 = vector.shape_cast %127 : vector<1x256x128xbf16> to vector<256x128xbf16>
    %cst_123 = arith.constant dense<0.000000e+00> : vector<24x128xf32>
    %129 = tpu.matmul %126, %128, %cst_123 {dimension_numbers = #tpu.dot_dimension_numbers<[1], [0], [0], [1], [0, 0, 1, 1], [], []>} : vector<24x256xbf16>, vector<256x128xbf16>, vector<24x128xf32> -> vector<24x128xf32>
    %130 = arith.addf %125, %129 : vector<24x128xf32>
    %c160_124 = arith.constant 160 : index
    %c0_125 = arith.constant 0 : index
    %131 = vector.load %arg13[%c160_124, %c0_125] : memref<256x256xbf16, #tpu.memory_space<vmem>>, vector<24x256xbf16>
    %c2_126 = arith.constant 2 : index
    %c0_127 = arith.constant 0 : index
    %c0_128 = arith.constant 0 : index
    %132 = vector.load %arg4[%c2_126, %c0_127, %c0_128] : memref<8x256x128xbf16, #tpu.memory_space<vmem>>, vector<1x256x128xbf16>
    %133 = vector.shape_cast %132 : vector<1x256x128xbf16> to vector<256x128xbf16>
    %cst_129 = arith.constant dense<0.000000e+00> : vector<24x128xf32>
    %134 = tpu.matmul %131, %133, %cst_129 {dimension_numbers = #tpu.dot_dimension_numbers<[1], [0], [0], [1], [0, 0, 1, 1], [], []>} : vector<24x256xbf16>, vector<256x128xbf16>, vector<24x128xf32> -> vector<24x128xf32>
    %135 = arith.addf %130, %134 : vector<24x128xf32>
    %c168_130 = arith.constant 168 : index
    %c0_131 = arith.constant 0 : index
    %136 = vector.load %arg13[%c168_130, %c0_131] : memref<256x256xbf16, #tpu.memory_space<vmem>>, vector<24x256xbf16>
    %c3_132 = arith.constant 3 : index
    %c0_133 = arith.constant 0 : index
    %c0_134 = arith.constant 0 : index
    %137 = vector.load %arg4[%c3_132, %c0_133, %c0_134] : memref<8x256x128xbf16, #tpu.memory_space<vmem>>, vector<1x256x128xbf16>
    %138 = vector.shape_cast %137 : vector<1x256x128xbf16> to vector<256x128xbf16>
    %cst_135 = arith.constant dense<0.000000e+00> : vector<24x128xf32>
    %139 = tpu.matmul %136, %138, %cst_135 {dimension_numbers = #tpu.dot_dimension_numbers<[1], [0], [0], [1], [0, 0, 1, 1], [], []>} : vector<24x256xbf16>, vector<256x128xbf16>, vector<24x128xf32> -> vector<24x128xf32>
    %140 = arith.addf %135, %139 : vector<24x128xf32>
    %c192 = arith.constant 192 : index
    %c0_136 = arith.constant 0 : index
    %141 = vector.load %arg13[%c192, %c0_136] : memref<256x256xbf16, #tpu.memory_space<vmem>>, vector<24x256xbf16>
    %c4_137 = arith.constant 4 : index
    %c0_138 = arith.constant 0 : index
    %c0_139 = arith.constant 0 : index
    %142 = vector.load %arg4[%c4_137, %c0_138, %c0_139] : memref<8x256x128xbf16, #tpu.memory_space<vmem>>, vector<1x256x128xbf16>
    %143 = vector.shape_cast %142 : vector<1x256x128xbf16> to vector<256x128xbf16>
    %cst_140 = arith.constant dense<0.000000e+00> : vector<24x128xf32>
    %144 = tpu.matmul %141, %143, %cst_140 {dimension_numbers = #tpu.dot_dimension_numbers<[1], [0], [0], [1], [0, 0, 1, 1], [], []>} : vector<24x256xbf16>, vector<256x128xbf16>, vector<24x128xf32> -> vector<24x128xf32>
    %145 = arith.addf %140, %144 : vector<24x128xf32>
    %c200 = arith.constant 200 : index
    %c0_141 = arith.constant 0 : index
    %146 = vector.load %arg13[%c200, %c0_141] : memref<256x256xbf16, #tpu.memory_space<vmem>>, vector<24x256xbf16>
    %c5_142 = arith.constant 5 : index
    %c0_143 = arith.constant 0 : index
    %c0_144 = arith.constant 0 : index
    %147 = vector.load %arg4[%c5_142, %c0_143, %c0_144] : memref<8x256x128xbf16, #tpu.memory_space<vmem>>, vector<1x256x128xbf16>
    %148 = vector.shape_cast %147 : vector<1x256x128xbf16> to vector<256x128xbf16>
    %cst_145 = arith.constant dense<0.000000e+00> : vector<24x128xf32>
    %149 = tpu.matmul %146, %148, %cst_145 {dimension_numbers = #tpu.dot_dimension_numbers<[1], [0], [0], [1], [0, 0, 1, 1], [], []>} : vector<24x256xbf16>, vector<256x128xbf16>, vector<24x128xf32> -> vector<24x128xf32>
    %150 = arith.addf %145, %149 : vector<24x128xf32>
    %c224 = arith.constant 224 : index
    %c0_146 = arith.constant 0 : index
    %151 = vector.load %arg13[%c224, %c0_146] : memref<256x256xbf16, #tpu.memory_space<vmem>>, vector<24x256xbf16>
    %c6_147 = arith.constant 6 : index
    %c0_148 = arith.constant 0 : index
    %c0_149 = arith.constant 0 : index
    %152 = vector.load %arg4[%c6_147, %c0_148, %c0_149] : memref<8x256x128xbf16, #tpu.memory_space<vmem>>, vector<1x256x128xbf16>
    %153 = vector.shape_cast %152 : vector<1x256x128xbf16> to vector<256x128xbf16>
    %cst_150 = arith.constant dense<0.000000e+00> : vector<24x128xf32>
    %154 = tpu.matmul %151, %153, %cst_150 {dimension_numbers = #tpu.dot_dimension_numbers<[1], [0], [0], [1], [0, 0, 1, 1], [], []>} : vector<24x256xbf16>, vector<256x128xbf16>, vector<24x128xf32> -> vector<24x128xf32>
    %155 = arith.addf %150, %154 : vector<24x128xf32>
    %c232 = arith.constant 232 : index
    %c0_151 = arith.constant 0 : index
    %156 = vector.load %arg13[%c232, %c0_151] : memref<256x256xbf16, #tpu.memory_space<vmem>>, vector<24x256xbf16>
    %c7_152 = arith.constant 7 : index
    %c0_153 = arith.constant 0 : index
    %c0_154 = arith.constant 0 : index
    %157 = vector.load %arg4[%c7_152, %c0_153, %c0_154] : memref<8x256x128xbf16, #tpu.memory_space<vmem>>, vector<1x256x128xbf16>
    %158 = vector.shape_cast %157 : vector<1x256x128xbf16> to vector<256x128xbf16>
    %cst_155 = arith.constant dense<0.000000e+00> : vector<24x128xf32>
    %159 = tpu.matmul %156, %158, %cst_155 {dimension_numbers = #tpu.dot_dimension_numbers<[1], [0], [0], [1], [0, 0, 1, 1], [], []>} : vector<24x256xbf16>, vector<256x128xbf16>, vector<24x128xf32> -> vector<24x128xf32>
    %160 = arith.addf %155, %159 : vector<24x128xf32>
    %c0_156 = arith.constant 0 : index
    %c0_157 = arith.constant 0 : index
    %161 = vector.load %arg5[%c0_156, %c0_157] : memref<1x128xf32, #tpu.memory_space<vmem>>, vector<1x128xf32>
    %162 = vector.broadcast %161 : vector<1x128xf32> to vector<24x128xf32>
    %163 = arith.addf %160, %162 : vector<24x128xf32>
    %cst_158 = arith.constant 0.000000e+00 : f32
    %164 = vector.broadcast %cst_158 : f32 to vector<24x128xf32>
    %165 = arith.maximumf %163, %164 : vector<24x128xf32>
    %166 = arith.truncf %165 : vector<24x128xf32> to vector<24x128xbf16>
    %c48 = arith.constant 48 : index
    %c0_159 = arith.constant 0 : index
    %167 = vector.load %arg14[%c48, %c0_159] : memref<72x128xbf16, #tpu.memory_space<vmem>>, vector<24x128xbf16>
    tpu.vector_store %arg14[%c48, %c0_159], %166 {strides = array<i32>} : memref<72x128xbf16, #tpu.memory_space<vmem>>, vector<24x128xbf16>,
    %cst_160 = arith.constant 0.000000e+00 : f32
    %168 = vector.broadcast %cst_160 : f32 to vector<8x128xf32>
    %c0_161 = arith.constant 0 : index
    %c0_162 = arith.constant 0 : index
    %169 = vector.load %arg14[%c0_161, %c0_162] : memref<72x128xbf16, #tpu.memory_space<vmem>>, vector<8x128xbf16>
    %c0_163 = arith.constant 0 : index
    %c0_164 = arith.constant 0 : index
    %c0_165 = arith.constant 0 : index
    %170 = vector.load %arg6[%c0_163, %c0_164, %c0_165] : memref<9x128x128xbf16, #tpu.memory_space<vmem>>, vector<1x128x128xbf16>
    %171 = vector.shape_cast %170 : vector<1x128x128xbf16> to vector<128x128xbf16>
    %cst_166 = arith.constant dense<0.000000e+00> : vector<8x128xf32>
    %172 = tpu.matmul %169, %171, %cst_166 {dimension_numbers = #tpu.dot_dimension_numbers<[1], [0], [0], [1], [0, 0, 1, 1], [], []>} : vector<8x128xbf16>, vector<128x128xbf16>, vector<8x128xf32> -> vector<8x128xf32>
    %173 = arith.addf %168, %172 : vector<8x128xf32>
    %c8_167 = arith.constant 8 : index
    %c0_168 = arith.constant 0 : index
    %174 = vector.load %arg14[%c8_167, %c0_168] : memref<72x128xbf16, #tpu.memory_space<vmem>>, vector<8x128xbf16>
    %c1_169 = arith.constant 1 : index
    %c0_170 = arith.constant 0 : index
    %c0_171 = arith.constant 0 : index
    %175 = vector.load %arg6[%c1_169, %c0_170, %c0_171] : memref<9x128x128xbf16, #tpu.memory_space<vmem>>, vector<1x128x128xbf16>
    %176 = vector.shape_cast %175 : vector<1x128x128xbf16> to vector<128x128xbf16>
    %cst_172 = arith.constant dense<0.000000e+00> : vector<8x128xf32>
    %177 = tpu.matmul %174, %176, %cst_172 {dimension_numbers = #tpu.dot_dimension_numbers<[1], [0], [0], [1], [0, 0, 1, 1], [], []>} : vector<8x128xbf16>, vector<128x128xbf16>, vector<8x128xf32> -> vector<8x128xf32>
    %178 = arith.addf %173, %177 : vector<8x128xf32>
    %c16 = arith.constant 16 : index
    %c0_173 = arith.constant 0 : index
    %179 = vector.load %arg14[%c16, %c0_173] : memref<72x128xbf16, #tpu.memory_space<vmem>>, vector<8x128xbf16>
    %c2_174 = arith.constant 2 : index
    %c0_175 = arith.constant 0 : index
    %c0_176 = arith.constant 0 : index
    %180 = vector.load %arg6[%c2_174, %c0_175, %c0_176] : memref<9x128x128xbf16, #tpu.memory_space<vmem>>, vector<1x128x128xbf16>
    %181 = vector.shape_cast %180 : vector<1x128x128xbf16> to vector<128x128xbf16>
    %cst_177 = arith.constant dense<0.000000e+00> : vector<8x128xf32>
    %182 = tpu.matmul %179, %181, %cst_177 {dimension_numbers = #tpu.dot_dimension_numbers<[1], [0], [0], [1], [0, 0, 1, 1], [], []>} : vector<8x128xbf16>, vector<128x128xbf16>, vector<8x128xf32> -> vector<8x128xf32>
    %183 = arith.addf %178, %182 : vector<8x128xf32>
    %c24_178 = arith.constant 24 : index
    %c0_179 = arith.constant 0 : index
    %184 = vector.load %arg14[%c24_178, %c0_179] : memref<72x128xbf16, #tpu.memory_space<vmem>>, vector<8x128xbf16>
    %c3_180 = arith.constant 3 : index
    %c0_181 = arith.constant 0 : index
    %c0_182 = arith.constant 0 : index
    %185 = vector.load %arg6[%c3_180, %c0_181, %c0_182] : memref<9x128x128xbf16, #tpu.memory_space<vmem>>, vector<1x128x128xbf16>
    %186 = vector.shape_cast %185 : vector<1x128x128xbf16> to vector<128x128xbf16>
    %cst_183 = arith.constant dense<0.000000e+00> : vector<8x128xf32>
    %187 = tpu.matmul %184, %186, %cst_183 {dimension_numbers = #tpu.dot_dimension_numbers<[1], [0], [0], [1], [0, 0, 1, 1], [], []>} : vector<8x128xbf16>, vector<128x128xbf16>, vector<8x128xf32> -> vector<8x128xf32>
    %188 = arith.addf %183, %187 : vector<8x128xf32>
    %c32_184 = arith.constant 32 : index
    %c0_185 = arith.constant 0 : index
    %189 = vector.load %arg14[%c32_184, %c0_185] : memref<72x128xbf16, #tpu.memory_space<vmem>>, vector<8x128xbf16>
    %c4_186 = arith.constant 4 : index
    %c0_187 = arith.constant 0 : index
    %c0_188 = arith.constant 0 : index
    %190 = vector.load %arg6[%c4_186, %c0_187, %c0_188] : memref<9x128x128xbf16, #tpu.memory_space<vmem>>, vector<1x128x128xbf16>
    %191 = vector.shape_cast %190 : vector<1x128x128xbf16> to vector<128x128xbf16>
    %cst_189 = arith.constant dense<0.000000e+00> : vector<8x128xf32>
    %192 = tpu.matmul %189, %191, %cst_189 {dimension_numbers = #tpu.dot_dimension_numbers<[1], [0], [0], [1], [0, 0, 1, 1], [], []>} : vector<8x128xbf16>, vector<128x128xbf16>, vector<8x128xf32> -> vector<8x128xf32>
    %193 = arith.addf %188, %192 : vector<8x128xf32>
    %c40_190 = arith.constant 40 : index
    %c0_191 = arith.constant 0 : index
    %194 = vector.load %arg14[%c40_190, %c0_191] : memref<72x128xbf16, #tpu.memory_space<vmem>>, vector<8x128xbf16>
    %c5_192 = arith.constant 5 : index
    %c0_193 = arith.constant 0 : index
    %c0_194 = arith.constant 0 : index
    %195 = vector.load %arg6[%c5_192, %c0_193, %c0_194] : memref<9x128x128xbf16, #tpu.memory_space<vmem>>, vector<1x128x128xbf16>
    %196 = vector.shape_cast %195 : vector<1x128x128xbf16> to vector<128x128xbf16>
    %cst_195 = arith.constant dense<0.000000e+00> : vector<8x128xf32>
    %197 = tpu.matmul %194, %196, %cst_195 {dimension_numbers = #tpu.dot_dimension_numbers<[1], [0], [0], [1], [0, 0, 1, 1], [], []>} : vector<8x128xbf16>, vector<128x128xbf16>, vector<8x128xf32> -> vector<8x128xf32>
    %198 = arith.addf %193, %197 : vector<8x128xf32>
    %c48_196 = arith.constant 48 : index
    %c0_197 = arith.constant 0 : index
    %199 = vector.load %arg14[%c48_196, %c0_197] : memref<72x128xbf16, #tpu.memory_space<vmem>>, vector<8x128xbf16>
    %c6_198 = arith.constant 6 : index
    %c0_199 = arith.constant 0 : index
    %c0_200 = arith.constant 0 : index
    %200 = vector.load %arg6[%c6_198, %c0_199, %c0_200] : memref<9x128x128xbf16, #tpu.memory_space<vmem>>, vector<1x128x128xbf16>
    %201 = vector.shape_cast %200 : vector<1x128x128xbf16> to vector<128x128xbf16>
    %cst_201 = arith.constant dense<0.000000e+00> : vector<8x128xf32>
    %202 = tpu.matmul %199, %201, %cst_201 {dimension_numbers = #tpu.dot_dimension_numbers<[1], [0], [0], [1], [0, 0, 1, 1], [], []>} : vector<8x128xbf16>, vector<128x128xbf16>, vector<8x128xf32> -> vector<8x128xf32>
    %203 = arith.addf %198, %202 : vector<8x128xf32>
    %c56 = arith.constant 56 : index
    %c0_202 = arith.constant 0 : index
    %204 = vector.load %arg14[%c56, %c0_202] : memref<72x128xbf16, #tpu.memory_space<vmem>>, vector<8x128xbf16>
    %c7_203 = arith.constant 7 : index
    %c0_204 = arith.constant 0 : index
    %c0_205 = arith.constant 0 : index
    %205 = vector.load %arg6[%c7_203, %c0_204, %c0_205] : memref<9x128x128xbf16, #tpu.memory_space<vmem>>, vector<1x128x128xbf16>
    %206 = vector.shape_cast %205 : vector<1x128x128xbf16> to vector<128x128xbf16>
    %cst_206 = arith.constant dense<0.000000e+00> : vector<8x128xf32>
    %207 = tpu.matmul %204, %206, %cst_206 {dimension_numbers = #tpu.dot_dimension_numbers<[1], [0], [0], [1], [0, 0, 1, 1], [], []>} : vector<8x128xbf16>, vector<128x128xbf16>, vector<8x128xf32> -> vector<8x128xf32>
    %208 = arith.addf %203, %207 : vector<8x128xf32>
    %c64_207 = arith.constant 64 : index
    %c0_208 = arith.constant 0 : index
    %209 = vector.load %arg14[%c64_207, %c0_208] : memref<72x128xbf16, #tpu.memory_space<vmem>>, vector<8x128xbf16>
    %c8_209 = arith.constant 8 : index
    %c0_210 = arith.constant 0 : index
    %c0_211 = arith.constant 0 : index
    %210 = vector.load %arg6[%c8_209, %c0_210, %c0_211] : memref<9x128x128xbf16, #tpu.memory_space<vmem>>, vector<1x128x128xbf16>
    %211 = vector.shape_cast %210 : vector<1x128x128xbf16> to vector<128x128xbf16>
    %cst_212 = arith.constant dense<0.000000e+00> : vector<8x128xf32>
    %212 = tpu.matmul %209, %211, %cst_212 {dimension_numbers = #tpu.dot_dimension_numbers<[1], [0], [0], [1], [0, 0, 1, 1], [], []>} : vector<8x128xbf16>, vector<128x128xbf16>, vector<8x128xf32> -> vector<8x128xf32>
    %213 = arith.addf %208, %212 : vector<8x128xf32>
    %c0_213 = arith.constant 0 : index
    %c0_214 = arith.constant 0 : index
    %214 = vector.load %arg7[%c0_213, %c0_214] : memref<1x128xf32, #tpu.memory_space<vmem>>, vector<1x128xf32>
    %215 = vector.broadcast %214 : vector<1x128xf32> to vector<8x128xf32>
    %216 = arith.addf %213, %215 : vector<8x128xf32>
    %cst_215 = arith.constant 0.000000e+00 : f32
    %217 = vector.broadcast %cst_215 : f32 to vector<8x128xf32>
    %218 = arith.maximumf %216, %217 : vector<8x128xf32>
    %219 = arith.truncf %218 : vector<8x128xf32> to vector<8x128xbf16>
    %c0_216 = arith.constant 0 : index
    %c0_217 = arith.constant 0 : index
    %220 = vector.load %arg15[%c0_216, %c0_217] : memref<8x128xbf16, #tpu.memory_space<vmem>>, vector<8x128xbf16>
    tpu.vector_store %arg15[%c0_216, %c0_217], %219 {strides = array<i32>} : memref<8x128xbf16, #tpu.memory_space<vmem>>, vector<8x128xbf16>,
    %c0_218 = arith.constant 0 : index
    %c0_219 = arith.constant 0 : index
    %221 = vector.load %arg15[%c0_218, %c0_219] : memref<8x128xbf16, #tpu.memory_space<vmem>>, vector<8x128xbf16>
    %c0_220 = arith.constant 0 : index
    %c0_221 = arith.constant 0 : index
    %222 = vector.load %arg8[%c0_220, %c0_221] : memref<128x512xbf16, #tpu.memory_space<vmem>>, vector<128x512xbf16>
    %cst_222 = arith.constant dense<0.000000e+00> : vector<8x512xf32>
    %223 = tpu.matmul %221, %222, %cst_222 {dimension_numbers = #tpu.dot_dimension_numbers<[1], [0], [0], [1], [0, 0, 1, 1], [], []>} : vector<8x128xbf16>, vector<128x512xbf16>, vector<8x512xf32> -> vector<8x512xf32>
    %c0_223 = arith.constant 0 : index
    %c0_224 = arith.constant 0 : index
    %224 = vector.load %arg9[%c0_223, %c0_224] : memref<1x512xf32, #tpu.memory_space<vmem>>, vector<1x512xf32>
    %225 = vector.broadcast %224 : vector<1x512xf32> to vector<8x512xf32>
    %226 = arith.addf %223, %225 : vector<8x512xf32>
    %cst_225 = arith.constant 0.000000e+00 : f32
    %227 = vector.broadcast %cst_225 : f32 to vector<8x512xf32>
    %228 = arith.maximumf %226, %227 : vector<8x512xf32>
    %229 = arith.truncf %228 : vector<8x512xf32> to vector<8x512xbf16>
    %c0_226 = arith.constant 0 : index
    %c0_227 = arith.constant 0 : index
    %230 = vector.load %arg10[%c0_226, %c0_227] : memref<512x128xbf16, #tpu.memory_space<vmem>>, vector<512x128xbf16>
    %cst_228 = arith.constant dense<0.000000e+00> : vector<8x128xf32>
    %231 = tpu.matmul %229, %230, %cst_228 {dimension_numbers = #tpu.dot_dimension_numbers<[1], [0], [0], [1], [0, 0, 1, 1], [], []>} : vector<8x512xbf16>, vector<512x128xbf16>, vector<8x128xf32> -> vector<8x128xf32>
    %c0_229 = arith.constant 0 : index
    %c0_230 = arith.constant 0 : index
    %232 = vector.load %arg11[%c0_229, %c0_230] : memref<1x128xf32, #tpu.memory_space<vmem>>, vector<1x128xf32>
    %233 = vector.broadcast %232 : vector<1x128xf32> to vector<8x128xf32>
    %234 = arith.addf %231, %233 : vector<8x128xf32>
    %c0_231 = arith.constant 0 : index
    %c0_232 = arith.constant 0 : index
    %235 = vector.load %arg12[%c0_231, %c0_232] : memref<8x128xf32, #tpu.memory_space<vmem>>, vector<8x128xf32>
    tpu.vector_store %arg12[%c0_231, %c0_232], %234 {strides = array<i32>} : memref<8x128xf32, #tpu.memory_space<vmem>>, vector<8x128xf32>,
    return
  }
  func.func @transform_0(%arg0: i32) -> (i32, i32, i32, i32) {
    %c0_i32 = arith.constant 0 : i32
    %c0_i32_0 = arith.constant 0 : i32
    %c0_i32_1 = arith.constant 0 : i32
    %c0_i32_2 = arith.constant 0 : i32
    return %c0_i32, %c0_i32_0, %arg0, %c0_i32_1 : i32, i32, i32, i32
  }
  func.func @transform_1(%arg0: i32) -> (i32, i32) {
    %c0_i32 = arith.constant 0 : i32
    %c0_i32_0 = arith.constant 0 : i32
    %c0_i32_1 = arith.constant 0 : i32
    return %c0_i32, %c0_i32_0 : i32, i32
  }
  func.func @transform_2(%arg0: i32) -> (i32, i32) {
    %c0_i32 = arith.constant 0 : i32
    %c0_i32_0 = arith.constant 0 : i32
    %c0_i32_1 = arith.constant 0 : i32
    return %c0_i32, %c0_i32_0 : i32, i32
  }
  func.func @transform_3(%arg0: i32) -> (i32, i32, i32) {
    %c0_i32 = arith.constant 0 : i32
    %c0_i32_0 = arith.constant 0 : i32
    %c0_i32_1 = arith.constant 0 : i32
    %c0_i32_2 = arith.constant 0 : i32
    return %c0_i32, %c0_i32_0, %c0_i32_1 : i32, i32, i32
  }
  func.func @transform_4(%arg0: i32) -> (i32, i32) {
    %c0_i32 = arith.constant 0 : i32
    %c0_i32_0 = arith.constant 0 : i32
    %c0_i32_1 = arith.constant 0 : i32
    return %c0_i32, %c0_i32_0 : i32, i32
  }
  func.func @transform_5(%arg0: i32) -> (i32, i32, i32) {
    %c0_i32 = arith.constant 0 : i32
    %c0_i32_0 = arith.constant 0 : i32
    %c0_i32_1 = arith.constant 0 : i32
    %c0_i32_2 = arith.constant 0 : i32
    return %c0_i32, %c0_i32_0, %c0_i32_1 : i32, i32, i32
  }
  func.func @transform_6(%arg0: i32) -> (i32, i32) {
    %c0_i32 = arith.constant 0 : i32
    %c0_i32_0 = arith.constant 0 : i32
    %c0_i32_1 = arith.constant 0 : i32
    return %c0_i32, %c0_i32_0 : i32, i32
  }
  func.func @transform_7(%arg0: i32) -> (i32, i32) {
    %c0_i32 = arith.constant 0 : i32
    %c0_i32_0 = arith.constant 0 : i32
    %c0_i32_1 = arith.constant 0 : i32
    return %c0_i32, %c0_i32_0 : i32, i32
  }
  func.func @transform_8(%arg0: i32) -> (i32, i32) {
    %c0_i32 = arith.constant 0 : i32
    %c0_i32_0 = arith.constant 0 : i32
    %c0_i32_1 = arith.constant 0 : i32
    return %c0_i32, %c0_i32_0 : i32, i32
  }
  func.func @transform_9(%arg0: i32) -> (i32, i32) {
    %c0_i32 = arith.constant 0 : i32
    %c0_i32_0 = arith.constant 0 : i32
    %c0_i32_1 = arith.constant 0 : i32
    return %c0_i32, %c0_i32_0 : i32, i32
  }
  func.func @transform_10(%arg0: i32) -> (i32, i32) {
    %c0_i32 = arith.constant 0 : i32
    %c0_i32_0 = arith.constant 0 : i32
    %c0_i32_1 = arith.constant 0 : i32
    return %c0_i32, %c0_i32_0 : i32, i32
  }
  func.func @transform_11(%arg0: i32) -> (i32, i32) {
    %c0_i32 = arith.constant 0 : i32
    %c0_i32_0 = arith.constant 0 : i32
    return %arg0, %c0_i32 : i32, i32
  }
}

</mosaic_0001>

<bundles_post_ra>
// kernel: dqn_forward.1
= control target key start
LH: loop header
LB: loop body
LE: loop exit
PB: predicated region body
PF: predicated region fallthrough
CT: control target
= control target key end

     0   :  { %vm1221_vm0 = vcmask 1043456   ;;  %vm10775_vm1 = vmmov 0   ;;  %s13087_s1 = inlined_call_operand.vmem [shape: bf16[256,128], index: 1, kind: input, shape index: {}]   ;;  %s13088_s0 = inlined_call_operand.vmem [shape: bf16[2,32,8,256], index: 0, kind: input, shape index: {}]   ;;  %s13089_s3 = inlined_call_operand.vmem [shape: bf16[8,256,128], index: 3, kind: input, shape index: {}]   ;;  %s13090_s2 = inlined_call_operand.vmem [shape: f32[1,128], index: 2, kind: input, shape index: {}]   ;;  %s13091_s5 = inlined_call_operand.vmem [shape: bf16[9,128,128], index: 5, kind: input, shape index: {}]   ;;  %s13092_s4 = inlined_call_operand.vmem [shape: f32[1,128], index: 4, kind: input, shape index: {}]   ;;  %s13093_s7 = inlined_call_operand.vmem [shape: bf16[128,512], index: 7, kind: input, shape index: {}]   ;;  %s13094_s9 = inlined_call_operand.vmem [shape: bf16[512,128], index: 9, kind: input, shape index: {}]   ;;  %s13095_s6 = inlined_call_operand.vmem [shape: f32[1,128], index: 6, kind: input, shape index: {}]   ;;  %s13096_s8 = inlined_call_operand.vmem [shape: f32[1,512], index: 8, kind: input, shape index: {}]   ;;  %s13097_s10 = inlined_call_operand.vmem [shape: f32[1,128], index: 10, kind: input, shape index: {}]   ;;  %s13098_s11 = inlined_call_operand.vmem [shape: f32[8,128], index: 11, kind: output, shape index: {}]  }
   0x1   :  { %v10099_v0 = vld [vmem:[%s13087_s1 + $0x40] sm:$0xff]   ;;  %v10103_v4 = vld [vmem:[%s13087_s1 + $0x48] sm:$0xff]   ;;  %v10107_v8 = vld [vmem:[%s13087_s1 + $0x50] sm:$0xff]  }
   0x2   :  { %v10100_v1 = vld [vmem:[%s13087_s1 + $0x40] sm:$0xff]   ;;  %8895 = vmatprep.subr.bf16.mxu0 %v10099_v0  ;;  %v10104_v5 = vld [vmem:[%s13087_s1 + $0x48] sm:$0xff]   ;;  %v10108_v9 = vld [vmem:[%s13087_s1 + $0x50] sm:$0xff]  }
   0x3   :  { %v10101_v2 = vld [vmem:[%s13087_s1] sm:$0xff]   ;;  %9007 = vmatprep.subr.bf16.mxu1 %v10100_v1  ;;  %v10105_v6 = vld [vmem:[%s13087_s1 + $0x8] sm:$0xff]   ;;  %v10109_v10 = vld [vmem:[%s13087_s1 + $0x10] sm:$0xff]  }
   0x4   :  { %v10102_v3 = vld [vmem:[%s13087_s1] sm:$0xff]   ;;  %8896 = vmatpush3.bf16.msra.mxu0 %v10101_v2  ;;  %v10106_v7 = vld [vmem:[%s13087_s1 + $0x8] sm:$0xff]   ;;  %v10110_v11 = vld [vmem:[%s13087_s1 + $0x10] sm:$0xff]  }
   0x5   :  { %9008 = vmatpush3.bf16.msra.mxu1 %v10102_v3  ;;  %8897 = vmatprep.subr.bf16.mxu0 %v10103_v4  ;;  %v10111_v12 = vld [vmem:[%s13087_s1 + $0x58] sm:$0xff]   ;;  %v10115_v16 = vld [vmem:[%s13087_s1 + $0x60] sm:$0xff]   ;;  %v10119_v20 = vld [vmem:[%s13087_s1 + $0x68] sm:$0xff]  }
   0x6   :  { %9009 = vmatprep.subr.bf16.mxu1 %v10104_v5  ;;  %v10112_v13 = vld [vmem:[%s13087_s1 + $0x58] sm:$0xff]   ;;  %v10116_v17 = vld [vmem:[%s13087_s1 + $0x60] sm:$0xff]   ;;  %v10120_v21 = vld [vmem:[%s13087_s1 + $0x68] sm:$0xff]  }
   0x7   :  { %v10113_v14 = vld [vmem:[%s13087_s1 + $0x18] sm:$0xff]   ;;  %v10117_v18 = vld [vmem:[%s13087_s1 + $0x20] sm:$0xff]   ;;  %v10121_v22 = vld [vmem:[%s13087_s1 + $0x28] sm:$0xff]  }
   0x8   :  { %8898 = vmatpush3.bf16.msra.mxu0 %v10105_v6  ;;  %v10114_v15 = vld [vmem:[%s13087_s1 + $0x18] sm:$0xff]   ;;  %v10118_v19 = vld [vmem:[%s13087_s1 + $0x20] sm:$0xff]   ;;  %v10122_v23 = vld [vmem:[%s13087_s1 + $0x28] sm:$0xff]  }
   0x9   :  { %9010 = vmatpush3.bf16.msra.mxu1 %v10106_v7  ;;  %8899 = vmatprep.subr.bf16.mxu0 %v10107_v8  ;;  %v10123_v24 = vld [vmem:[%s13087_s1 + $0x70] sm:$0xff]   ;;  %v10127_v28 = vld [vmem:[%s13087_s1 + $0x78] sm:$0xff]   ;;  %v10131_v32 = vld [vmem:[%s13088_s0] ss:$8 sps:$4 sm:$0xff]  }
   0xa   :  { %9011 = vmatprep.subr.bf16.mxu1 %v10108_v9  ;;  %v10124_v25 = vld [vmem:[%s13087_s1 + $0x70] sm:$0xff]   ;;  %v10128_v29 = vld [vmem:[%s13087_s1 + $0x78] sm:$0xff]   ;;  %v10133_v33 = vld [vmem:[%s13088_s0 + $0x4] ss:$8 sps:$4 sm:$0xff]  }
   0xb   :  { %v10125_v26 = vld [vmem:[%s13087_s1 + $0x30] sm:$0xff]   ;;  %v10129_v30 = vld [vmem:[%s13087_s1 + $0x38] sm:$0xff]   ;;  %v10134_v34 = vld [vmem:[%s13088_s0 + $0x100] ss:$8 sps:$4 sm:$0xff]   ;;  %398 = vmatprep.mubr.bf16.mxu0 %v10133_v33 }
   0xc   :  { %8900 = vmatpush3.bf16.msra.mxu0 %v10109_v10  ;;  %v10126_v27 = vld [vmem:[%s13087_s1 + $0x30] sm:$0xff]   ;;  %v10130_v31 = vld [vmem:[%s13087_s1 + $0x38] sm:$0xff]   ;;  %v10136_v35 = vld [vmem:[%s13088_s0 + $0x104] ss:$8 sps:$4 sm:$0xff]  }
   0xd   :  { %9012 = vmatpush3.bf16.msra.mxu1 %v10110_v11  ;;  %8901 = vmatprep.subr.bf16.mxu0 %v10111_v12  ;;  %v10137_v36 = vld [vmem:[%s13088_s0 + $0x14] ss:$8 sps:$4 sm:$0xff]   ;;  %v10141_v38 = vld [vmem:[%s13088_s0 + $0x10] ss:$8 sps:$4 sm:$0xff]   ;;  %v10145_v40 = vld [vmem:[%s13088_s0 + $0x24] ss:$8 sps:$4 sm:$0xff]  }
   0xe   :  { %9013 = vmatprep.subr.bf16.mxu1 %v10112_v13  ;;  %951 = vmatprep.mubr.bf16.mxu1 %v10136_v35  ;;  %v10139_v37 = vld [vmem:[%s13088_s0 + $0x114] ss:$8 sps:$4 sm:$0xff]   ;;  %v10142_v39 = vld [vmem:[%s13088_s0 + $0x110] ss:$8 sps:$4 sm:$0xff]   ;;  %v10143_v41 = vld [vmem:[%s13088_s0 + $0x124] ss:$8 sps:$4 sm:$0xff]  }
   0xf   :  { %v10147_v42 = vld [vmem:[%s13088_s0 + $0x120] ss:$8 sps:$4 sm:$0xff]   ;;  %v10151_v44 = vld [vmem:[%s13088_s0 + $0x34] ss:$8 sps:$4 sm:$0xff]   ;;  %v10154_v46 = vld [vmem:[%s13088_s0 + $0x30] ss:$8 sps:$4 sm:$0xff]  }
  0x10   :  { %8902 = vmatpush3.bf16.msra.mxu0 %v10113_v14  ;;  %v10148_v43 = vld [vmem:[%s13088_s0 + $0x20] ss:$8 sps:$4 sm:$0xff]   ;;  %v10149_v45 = vld [vmem:[%s13088_s0 + $0x134] ss:$8 sps:$4 sm:$0xff]   ;;  %v10153_v48 = vld [vmem:[%s13088_s0 + $0x130] ss:$8 sps:$4 sm:$0xff]  }
  0x11   :  { %9014 = vmatpush3.bf16.msra.mxu1 %v10114_v15  ;;  %8903 = vmatprep.subr.bf16.mxu0 %v10115_v16  ;;  %v10179_v47 = vld [vmem:[%s13089_s3 + $0xc0] sm:$0xff]   ;;  %v10183_v54 = vld [vmem:[%s13089_s3 + $0xc8] sm:$0xff]   ;;  %v10187_v59 = vld [vmem:[%s13089_s3 + $0xd0] sm:$0xff]  }
  0x12   :  { %9015 = vmatprep.subr.bf16.mxu1 %v10116_v17  ;;  %v10157_v49 = vld [vmem:[%s13088_s0 + $0x44] ss:$8 sps:$4 sm:$0xff]   ;;  %v10160_v58 = vld [vmem:[%s13088_s0 + $0x40] ss:$8 sps:$4 sm:$0xff]   ;;  %v10163_v61 = vld [vmem:[%s13088_s0 + $0x54] ss:$8 sps:$4 sm:$0xff]  }
  0x13   :  { %v10180_v50 = vld [vmem:[%s13089_s3 + $0x80] sm:$0xff]   ;;  %v10184_v55 = vld [vmem:[%s13089_s3 + $0x88] sm:$0xff]   ;;  %v10188_v62 = vld [vmem:[%s13089_s3 + $0x90] sm:$0xff]  }
  0x14   :  { %8904 = vmatpush3.bf16.msra.mxu0 %v10117_v18  ;;  %v10155_v51 = vld [vmem:[%s13088_s0 + $0x144] ss:$8 sps:$4 sm:$0xff]   ;;  %v10159_v60 = vld [vmem:[%s13088_s0 + $0x140] ss:$8 sps:$4 sm:$0xff]   ;;  %v10161_v63 = vld [vmem:[%s13088_s0 + $0x154] ss:$8 sps:$4 sm:$0xff]  }
  0x15   :  { %9016 = vmatpush3.bf16.msra.mxu1 %v10118_v19  ;;  %8905 = vmatprep.subr.bf16.mxu0 %v10119_v20  ;;  %v10181_v52 = vld [vmem:[%s13089_s3 + $0x40] sm:$0xff]   ;;  %v10185_v56 = vld [vmem:[%s13089_s3 + $0x48] sm:$0xff]   ;;  %v10189_v0 = vld [vmem:[%s13089_s3 + $0x50] sm:$0xff]  }
  0x16   :  { %9017 = vmatprep.subr.bf16.mxu1 %v10120_v21  ;;  %v10182_v53 = vld [vmem:[%s13089_s3] sm:$0xff]   ;;  %v10186_v57 = vld [vmem:[%s13089_s3 + $0x8] sm:$0xff]   ;;  %v10190_v1 = vld [vmem:[%s13089_s3 + $0x10] sm:$0xff]  }
  0x17   :  { %v10191_v2 = vld [vmem:[%s13089_s3 + $0xd8] sm:$0xff]   ;;  %v10169_v8 = vld [vmem:[%s13088_s0 + $0x64] ss:$8 sps:$4 sm:$0xff]   ;;  %v10171_v14 = vld [vmem:[%s13088_s0 + $0x160] ss:$8 sps:$4 sm:$0xff]  }
  0x18   :  { %8906 = vmatpush3.bf16.msra.mxu0 %v10121_v22  ;;  %v10192_v3 = vld [vmem:[%s13089_s3 + $0x98] sm:$0xff]   ;;  %v10167_v9 = vld [vmem:[%s13088_s0 + $0x164] ss:$8 sps:$4 sm:$0xff]   ;;  %v10172_v15 = vld [vmem:[%s13088_s0 + $0x60] ss:$8 sps:$4 sm:$0xff]  }
  0x19   :  { %9018 = vmatpush3.bf16.msra.mxu1 %v10122_v23  ;;  %8907 = vmatprep.subr.bf16.mxu0 %v10123_v24  ;;  %v10193_v4 = vld [vmem:[%s13089_s3 + $0x58] sm:$0xff]   ;;  %v10207_v10 = vld [vmem:[%s13089_s3 + $0xe0] sm:$0xff]   ;;  %v10223_v18 = vld [vmem:[%s13089_s3 + $0xe8] sm:$0xff]  }
  0x1a   :  { %9019 = vmatprep.subr.bf16.mxu1 %v10124_v25  ;;  %v10194_v5 = vld [vmem:[%s13089_s3 + $0x18] sm:$0xff]   ;;  %v10208_v11 = vld [vmem:[%s13089_s3 + $0xa0] sm:$0xff]   ;;  %v10224_v19 = vld [vmem:[%s13089_s3 + $0xa8] sm:$0xff]  }
  0x1b   :  { %v10165_v6 = vld [vmem:[%s13088_s0 + $0x150] ss:$8 sps:$4 sm:$0xff]   ;;  %v10209_v12 = vld [vmem:[%s13089_s3 + $0x60] sm:$0xff]   ;;  %v10175_v16 = vld [vmem:[%s13088_s0 + $0x74] ss:$8 sps:$4 sm:$0xff]  }
  0x1c   :  { %8908 = vmatpush3.bf16.msra.mxu0 %v10125_v26  ;;  %v10166_v7 = vld [vmem:[%s13088_s0 + $0x50] ss:$8 sps:$4 sm:$0xff]   ;;  %v10210_v13 = vld [vmem:[%s13089_s3 + $0x20] sm:$0xff]   ;;  %v10173_v17 = vld [vmem:[%s13088_s0 + $0x174] ss:$8 sps:$4 sm:$0xff]  }
  0x1d   :  { %9020 = vmatpush3.bf16.msra.mxu1 %v10126_v27  ;;  %8909 = vmatprep.subr.bf16.mxu0 %v10127_v28  ;;  %v10225_v20 = vld [vmem:[%s13089_s3 + $0x68] sm:$0xff]   ;;  %v10177_v21 = vld [vmem:[%s13088_s0 + $0x170] ss:$8 sps:$4 sm:$0xff]  }
  0x1e   :  { %9021 = vmatprep.subr.bf16.mxu1 %v10128_v29  ;;  %v10226_v22 = vld [vmem:[%s13089_s3 + $0x28] sm:$0xff]   ;;  %v10178_v23 = vld [vmem:[%s13088_s0 + $0x70] ss:$8 sps:$4 sm:$0xff]   ;;  %v10201_v29 = vld [vmem:[%s13088_s0 + $0x94] ss:$8 sps:$4 sm:$0xff]  }
  0x1f   :  { %v10195_v24 = vld [vmem:[%s13088_s0 + $0x84] ss:$8 sps:$4 sm:$0xff]   ;;  %v10199_v26 = vld [vmem:[%s13088_s0 + $0x80] ss:$8 sps:$4 sm:$0xff]   ;;  %v10239_v27 = vld [vmem:[%s13089_s3 + $0xf0] sm:$0xff]  }
  0x20   :  { %8910 = vmatpush3.bf16.msra.mxu0 %v10129_v30  ;;  %v10197_v25 = vld [vmem:[%s13088_s0 + $0x184] ss:$8 sps:$4 sm:$0xff]   ;;  %v10200_v28 = vld [vmem:[%s13088_s0 + $0x180] ss:$8 sps:$4 sm:$0xff]   ;;  %v10203_v30 = vld [vmem:[%s13088_s0 + $0x194] ss:$8 sps:$4 sm:$0xff]  }
  0x21   :  { %9022 = vmatpush3.bf16.msra.mxu1 %v10130_v31  ;;  %9119 = vmatprep.subr.bf16.mxu0 %v10179_v47  ;;  %v10205_v31 = vld [vmem:[%s13088_s0 + $0x90] ss:$8 sps:$4 sm:$0xff]   ;;  %v10211_v33 = vld [vmem:[%s13088_s0 + $0xa4] ss:$8 sps:$4 sm:$0xff]   ;;  %v10215_v35 = vld [vmem:[%s13088_s0 + $0xa0] ss:$8 sps:$4 sm:$0xff]  }
  0x22   :  { %9147 = vmatprep.subr.bf16.mxu1 %v10181_v52  ;;  %v10257_v47 = vld [vmem:[%s13089_s3 + $0x78] sm:$0xff]   ;;  %v10259_v52 = vld [vmem:[%s13089_s3 + $0x1c0] sm:$0xff]  }
  0x23   :  { %399 = vmatmul.mubr.bf16.vlgmr.msra.gmra.mrb[0].mxu0 %v10131_v32  ;;  %v10206_v32 = vld [vmem:[%s13088_s0 + $0x190] ss:$8 sps:$4 sm:$0xff]  }
  0x24   :  { %952 = vmatmul.mubr.bf16.vlgmr.msra.gmra.mrb[0].mxu1 %v10134_v34  ;;  %406 = vmatprep.mubr.bf16.mxu0 %v10137_v36  ;;  %v10213_v34 = vld [vmem:[%s13088_s0 + $0x1a4] ss:$8 sps:$4 sm:$0xff]   ;;  %v10216_v36 = vld [vmem:[%s13088_s0 + $0x1a0] ss:$8 sps:$4 sm:$0xff]  }
  0x25   :  { %959 = vmatprep.mubr.bf16.mxu1 %v10139_v37  ;;  %9120 = vmatpush3.bf16.msra.mxu0 %v10180_v50  ;;  %v10217_v37 = vld [vmem:[%s13088_s0 + $0xb4] ss:$8 sps:$4 sm:$0xff]  }
  0x26   :  { %9148 = vmatpush3.bf16.msra.mxu1 %v10182_v53  ;;  %9121 = vmatprep.subr.bf16.mxu0 %v10183_v54  ;;  %v10258_v50 = vld [vmem:[%s13089_s3 + $0x38] sm:$0xff]  }
  0x27   :  { %9149 = vmatprep.subr.bf16.mxu1 %v10185_v56  ;;  %v10237_v53 = vld [vmem:[%s13088_s0 + $0xd0] ss:$8 sps:$4 sm:$0xff]   ;;  %v10245_v56 = vld [vmem:[%s13088_s0 + $0x1e4] ss:$8 sps:$4 sm:$0xff]  }
  0x28   :  { %v10238_v54 = vld [vmem:[%s13088_s0 + $0x1d0] ss:$8 sps:$4 sm:$0xff]  }
  0x29   :  { %9122 = vmatpush3.bf16.msra.mxu0 %v10184_v55  ;;  %v10243_v55 = vld [vmem:[%s13088_s0 + $0xe4] ss:$8 sps:$4 sm:$0xff]  }
  0x2a   :  { %9150 = vmatpush3.bf16.msra.mxu1 %v10186_v57  ;;  %9123 = vmatprep.subr.bf16.mxu0 %v10187_v59  ;;  %v10255_v57 = vld [vmem:[%s13089_s3 + $0xf8] sm:$0xff]   ;;  %v10265_v59 = vld [vmem:[%s13089_s3 + $0x140] sm:$0xff]  }
  0x2b   :  { %407 = vmatmul.mubr.bf16.gmra.mrb[4].mxu0 %v10141_v38  ;;  %9151 = vmatprep.subr.bf16.mxu1 %v10189_v0  ;;  %v10219_v38 = vld [vmem:[%s13088_s0 + $0x1b4] ss:$8 sps:$4 sm:$0xff]   ;;  %v10253_v0 = vld [vmem:[%s13088_s0 + $0xf0] ss:$8 sps:$4 sm:$0xff]  }
  0x2c   :  { %960 = vmatmul.mubr.bf16.gmra.mrb[4].mxu1 %v10142_v39  ;;  %414 = vmatprep.mubr.bf16.mxu0 %v10145_v40  ;;  %v10221_v39 = vld [vmem:[%s13088_s0 + $0xb0] ss:$8 sps:$4 sm:$0xff]  }
  0x2d   :  { %967 = vmatprep.mubr.bf16.mxu1 %v10143_v41  ;;  %9124 = vmatpush3.bf16.msra.mxu0 %v10188_v62  ;;  %v10222_v40 = vld [vmem:[%s13088_s0 + $0x1b0] ss:$8 sps:$4 sm:$0xff]   ;;  %v10249_v62 = vld [vmem:[%s13088_s0 + $0xf4] ss:$8 sps:$4 sm:$0xff]  }
  0x2e   :  { %9152 = vmatpush3.bf16.msra.mxu1 %v10190_v1  ;;  %9125 = vmatprep.subr.bf16.mxu0 %v10191_v2  ;;  %v10240_v41 = vld [vmem:[%s13089_s3 + $0xb0] sm:$0xff]  }
  0x2f   :  { %9153 = vmatprep.subr.bf16.mxu1 %v10193_v4  ;;  %v10254_v1 = vld [vmem:[%s13088_s0 + $0x1f0] ss:$8 sps:$4 sm:$0xff]   ;;  %v11230_v4 = vld [vmem:[%s13090_s2] ss:$0 sm:$0xff] }
  0x31   :  { %9126 = vmatpush3.bf16.msra.mxu0 %v10192_v3 }
  0x32   :  { %9154 = vmatpush3.bf16.msra.mxu1 %v10194_v5  ;;  %9127 = vmatprep.subr.bf16.mxu0 %v10207_v10 }
  0x33   :  { %415 = vmatmul.mubr.bf16.gmra.mrb[8].mxu0 %v10148_v43  ;;  %9155 = vmatprep.subr.bf16.mxu1 %v10209_v12  ;;  %v10229_v43 = vld [vmem:[%s13088_s0 + $0x1c4] ss:$8 sps:$4 sm:$0xff]  }
  0x34   :  { %968 = vmatmul.mubr.bf16.gmra.mrb[8].mxu1 %v10147_v42  ;;  %422 = vmatprep.mubr.bf16.mxu0 %v10151_v44  ;;  %v10227_v42 = vld [vmem:[%s13088_s0 + $0xc4] ss:$8 sps:$4 sm:$0xff]   ;;  %v10241_v44 = vld [vmem:[%s13089_s3 + $0x70] sm:$0xff]  }
  0x35   :  { %975 = vmatprep.mubr.bf16.mxu1 %v10149_v45  ;;  %9128 = vmatpush3.bf16.msra.mxu0 %v10208_v11  ;;  %v10242_v45 = vld [vmem:[%s13089_s3 + $0x30] sm:$0xff]  }
  0x36   :  { %9156 = vmatpush3.bf16.msra.mxu1 %v10210_v13  ;;  %9129 = vmatprep.subr.bf16.mxu0 %v10223_v18 }
  0x37   :  { %9157 = vmatprep.subr.bf16.mxu1 %v10225_v20 }
  0x39   :  { %9130 = vmatpush3.bf16.msra.mxu0 %v10224_v19 }
  0x3a   :  { %9158 = vmatpush3.bf16.msra.mxu1 %v10226_v22  ;;  %9131 = vmatprep.subr.bf16.mxu0 %v10239_v27 }
  0x3b   :  { %423 = vmatmul.mubr.bf16.gmra.mrb[12].mxu0 %v10154_v46  ;;  %9159 = vmatprep.subr.bf16.mxu1 %v10241_v44  ;;  %v10231_v46 = vld [vmem:[%s13088_s0 + $0xc0] ss:$8 sps:$4 sm:$0xff]  }
  0x3c   :  { %976 = vmatmul.mubr.bf16.gmra.mrb[12].mxu1 %v10153_v48  ;;  %430 = vmatprep.mubr.bf16.mxu0 %v10157_v49  ;;  %v10232_v48 = vld [vmem:[%s13088_s0 + $0x1c0] ss:$8 sps:$4 sm:$0xff]   ;;  %v10233_v49 = vld [vmem:[%s13088_s0 + $0xd4] ss:$8 sps:$4 sm:$0xff]  }
  0x3d   :  { %983 = vmatprep.mubr.bf16.mxu1 %v10155_v51  ;;  %9132 = vmatpush3.bf16.msra.mxu0 %v10240_v41  ;;  %v10235_v51 = vld [vmem:[%s13088_s0 + $0x1d4] ss:$8 sps:$4 sm:$0xff]  }
  0x3e   :  { %9160 = vmatpush3.bf16.msra.mxu1 %v10242_v45  ;;  %9133 = vmatprep.subr.bf16.mxu0 %v10255_v57 }
  0x3f   :  { %9161 = vmatprep.subr.bf16.mxu1 %v10257_v47  ;;  %v10263_v47 = vld [vmem:[%s13089_s3 + $0x1d0] sm:$0xff]  }
  0x42   :  { %9162 = vmatpush3.bf16.msra.mxu1 %v10258_v50 }
  0x43   :  { %431 = vmatmul.mubr.bf16.gmra.mrb[16].mxu0 %v10160_v58  ;;  %9203 = vmatprep.subr.bf16.mxu1 %v10259_v52  ;;  %v10256_v58 = vld [vmem:[%s13089_s3 + $0xb8] sm:$0xff]  }
  0x44   :  { %984 = vmatmul.mubr.bf16.gmra.mrb[16].mxu1 %v10159_v60  ;;  %438 = vmatprep.mubr.bf16.mxu0 %v10163_v61  ;;  %v10247_v60 = vld [vmem:[%s13088_s0 + $0xe0] ss:$8 sps:$4 sm:$0xff]  }
  0x45   :  { %991 = vmatprep.mubr.bf16.mxu1 %v10161_v63  ;;  %9134 = vmatpush3.bf16.msra.mxu0 %v10256_v58  ;;  %v10248_v61 = vld [vmem:[%s13088_s0 + $0x1e0] ss:$8 sps:$4 sm:$0xff]   ;;  %v10251_v63 = vld [vmem:[%s13088_s0 + $0x1f4] ss:$8 sps:$4 sm:$0xff]  }
  0x46   :  { %9175 = vmatprep.subr.bf16.mxu0 %v10265_v59 }
  0x4b   :  { %439 = vmatmul.mubr.bf16.gmra.mrb[20].mxu0 %v10166_v7 }
  0x4c   :  { %992 = vmatmul.mubr.bf16.gmra.mrb[20].mxu1 %v10165_v6  ;;  %446 = vmatprep.mubr.bf16.mxu0 %v10169_v8 }
  0x4d   :  { %999 = vmatprep.mubr.bf16.mxu1 %v10167_v9 }
  0x53   :  { %447 = vmatmul.mubr.bf16.gmra.mrb[24].mxu0 %v10172_v15 }
  0x54   :  { %1000 = vmatmul.mubr.bf16.gmra.mrb[24].mxu1 %v10171_v14  ;;  %454 = vmatprep.mubr.bf16.mxu0 %v10175_v16 }
  0x55   :  { %1007 = vmatprep.mubr.bf16.mxu1 %v10173_v17 }
  0x5b   :  { %455 = vmatmul.mubr.bf16.gmra.mrb[28].mxu0 %v10178_v23 }
  0x5c   :  { %1008 = vmatmul.mubr.bf16.gmra.mrb[28].mxu1 %v10177_v21  ;;  %462 = vmatprep.mubr.bf16.mxu0 %v10195_v24 }
  0x5d   :  { %1015 = vmatprep.mubr.bf16.mxu1 %v10197_v25 }
  0x63   :  { %463 = vmatmul.mubr.bf16.gmra.mrb[32].mxu0 %v10199_v26 }
  0x64   :  { %1016 = vmatmul.mubr.bf16.gmra.mrb[32].mxu1 %v10200_v28  ;;  %470 = vmatprep.mubr.bf16.mxu0 %v10201_v29 }
  0x65   :  { %1023 = vmatprep.mubr.bf16.mxu1 %v10203_v30 }
  0x6b   :  { %471 = vmatmul.mubr.bf16.gmra.mrb[36].mxu0 %v10205_v31 }
  0x6c   :  { %1024 = vmatmul.mubr.bf16.gmra.mrb[36].mxu1 %v10206_v32  ;;  %478 = vmatprep.mubr.bf16.mxu0 %v10211_v33 }
  0x6d   :  { %1031 = vmatprep.mubr.bf16.mxu1 %v10213_v34  ;;  %v10260_v34 = vld [vmem:[%s13089_s3 + $0x180] sm:$0xff]  }
  0x73   :  { %479 = vmatmul.mubr.bf16.gmra.mrb[40].mxu0 %v10215_v35 }
  0x74   :  { %1032 = vmatmul.mubr.bf16.gmra.mrb[40].mxu1 %v10216_v36  ;;  %486 = vmatprep.mubr.bf16.mxu0 %v10217_v37 }
  0x75   :  { %1039 = vmatprep.mubr.bf16.mxu1 %v10219_v38  ;;  %v10261_v38 = vld [vmem:[%s13089_s3 + $0x1c8] sm:$0xff]  }
  0x7b   :  { %487 = vmatmul.mubr.bf16.gmra.mrb[44].mxu0 %v10221_v39 }
  0x7c   :  { %1040 = vmatmul.mubr.bf16.gmra.mrb[44].mxu1 %v10222_v40  ;;  %494 = vmatprep.mubr.bf16.mxu0 %v10227_v42 }
  0x7d   :  { %1047 = vmatprep.mubr.bf16.mxu1 %v10229_v43  ;;  %v10262_v43 = vld [vmem:[%s13089_s3 + $0x188] sm:$0xff]  }
  0x83   :  { %495 = vmatmul.mubr.bf16.gmra.mrb[48].mxu0 %v10231_v46 }
  0x84   :  { %1048 = vmatmul.mubr.bf16.gmra.mrb[48].mxu1 %v10232_v48  ;;  %502 = vmatprep.mubr.bf16.mxu0 %v10233_v49 }
  0x85   :  { %1055 = vmatprep.mubr.bf16.mxu1 %v10235_v51 }
  0x8b   :  { %503 = vmatmul.mubr.bf16.gmra.mrb[52].mxu0 %v10237_v53 }
  0x8c   :  { %1056 = vmatmul.mubr.bf16.gmra.mrb[52].mxu1 %v10238_v54  ;;  %510 = vmatprep.mubr.bf16.mxu0 %v10243_v55 }
  0x8d   :  { %1063 = vmatprep.mubr.bf16.mxu1 %v10245_v56 }
  0x93   :  { %511 = vmatmul.mubr.bf16.gmra.mrb[56].mxu0 %v10247_v60  ;;  %v10264_v60 = vld [vmem:[%s13089_s3 + $0x190] sm:$0xff]  }
  0x94   :  { %1064 = vmatmul.mubr.bf16.gmra.mrb[56].mxu1 %v10248_v61  ;;  %518 = vmatprep.mubr.bf16.mxu0 %v10249_v62 }
  0x95   :  { %1071 = vmatprep.mubr.bf16.mxu1 %v10251_v63 }
  0x9b   :  { %519 = vmatmul.mubr.bf16.gmra.mrb[60].mxu0 %v10253_v0 }
  0x9c   :  { %1072 = vmatmul.mubr.bf16.gmra.mrb[60].mxu1 %v10254_v1 }
  0xf6   :  { %v8911_v2 = vpop.f32.mrb[0].mxu0 }
  0xf7   :  { %v9023_v3 = vpop.f32.mrb[0].mxu1  ;;  %v8912_v5 = vpop.f32.mrb[1].mxu0 }
  0xf8   :  { %v8913_v6 = vadd.f32 %v8912_v5, %v8911_v2  ;;  %v9024_v7 = vpop.f32.mrb[1].mxu1  ;;  %v8914_v8 = vpop.f32.mrb[2].mxu0  ;;  %v10267_v5 = vld [vmem:[%s13089_s3 + $0x1d8] sm:$0xff]  }
  0xf9   :  { %v9025_v9 = vadd.f32 %v9024_v7, %v9023_v3  ;;  %v9026_v10 = vpop.f32.mrb[2].mxu1  ;;  %v8915_v11 = vpop.f32.mrb[3].mxu0 }
  0xfa   :  { %v401_v12 = vadd.f32 %v8913_v6, %v11230_v4  ;;  %v8916_v13 = vadd.f32 %v8915_v11, %v8914_v8  ;;  %v9027_v14 = vpop.f32.mrb[3].mxu1 }
  0xfb   :  { %v954_v15 = vadd.f32 %v9025_v9, %v11230_v4  ;;  %v9028_v16 = vadd.f32 %v9027_v14, %v9026_v10  ;;  %v10266_v10 = vld [vmem:[%s13089_s3 + $0x100] sm:$0xff]   ;;  %v10268_v14 = vld [vmem:[%s13089_s3 + $0x198] sm:$0xff]  }
  0xfc   :  { %v404_v17 = vadd.f32 %v8916_v13, %v11230_v4  ;;  %v527_v19 = vmax.f32 %v401_v12, 0.0 }
  0xfd   :  { %v957_v18 = vadd.f32 %v9028_v16, %v11230_v4  ;;  %v1080_v22 = vmax.f32 %v954_v15, 0.0 }
  0xfe   :  { %v528_v20 = vmax.f32 %v404_v17, 0.0  ;;  %v8917_v21 = vpop.f32.mrb[4].mxu0 }
  0xff   :  { %v1081_v23 = vmax.f32 %v957_v18, 0.0  ;;  %v9029_v24 = vpop.f32.mrb[4].mxu1  ;;  %v8918_v25 = vpop.f32.mrb[5].mxu0  ;;  %v10269_v18 = vld [vmem:[%s13089_s3 + $0x148] sm:$0xff]  }
 0x100   :  { %v559_v26 = vpack.c.bf16 %v528_v20, %v527_v19  ;;  %v8919_v27 = vadd.f32 %v8918_v25, %v8917_v21  ;;  %v9030_v28 = vpop.f32.mrb[5].mxu1  ;;  %v8920_v29 = vpop.f32.mrb[6].mxu0  ;;  %v10271_v21 = vld [vmem:[%s13089_s3 + $0x1e0] sm:$0xff]   ;;  %v10270_v25 = vld [vmem:[%s13089_s3 + $0x108] sm:$0xff]  }
 0x101   :  { %v1112_v30 = vpack.c.bf16 %v1081_v23, %v1080_v22  ;;  %v9031_v31 = vadd.f32 %v9030_v28, %v9029_v24  ;;  %v9032_v32 = vpop.f32.mrb[6].mxu1  ;;  %v8921_v33 = vpop.f32.mrb[7].mxu0 }
 0x102   :  { %575 = vst [vmem:[#allocation2] sm:$0xff] %v559_v26  ;;  %v409_v35 = vadd.f32 %v8919_v27, %v11230_v4  ;;  %v8922_v36 = vadd.f32 %v8921_v33, %v8920_v29  ;;  %v9033_v37 = vpop.f32.mrb[7].mxu1 }
 0x103   :  { %1128 = vst [vmem:[#allocation2 + $0x8] sm:$0xff] %v1112_v30  ;;  %v962_v39 = vadd.f32 %v9031_v31, %v11230_v4  ;;  %v9034_v40 = vadd.f32 %v9033_v37, %v9032_v32  ;;  %1504 = vmatprep.mubr.bf16.mxu1 %v1112_v30 }
 0x104   :  { %v412_v41 = vadd.f32 %v8922_v36, %v11230_v4  ;;  %1505 = vmatmul.mubr.bf16.vlgmr.msra.gmra.mrb[64].mxu1 %v559_v26  ;;  %v529_v44 = vmax.f32 %v409_v35, 0.0  ;;  %v10272_v35 = vld [vmem:[%s13089_s3 + $0x1a0] sm:$0xff]   ;;  %v10273_v36 = vld [vmem:[%s13089_s3 + $0x150] sm:$0xff]  }
 0x105   :  { %v965_v42 = vadd.f32 %v9034_v40, %v11230_v4  ;;  %9204 = vmatpush3.bf16.msra.mxu1 %v10260_v34  ;;  %v1082_v48 = vmax.f32 %v962_v39, 0.0 }
 0x106   :  { %v530_v45 = vmax.f32 %v412_v41, 0.0  ;;  %9205 = vmatprep.subr.bf16.mxu1 %v10261_v38  ;;  %v8923_v46 = vpop.f32.mrb[8].mxu0  ;;  %v10275_v41 = vld [vmem:[%s13089_s3 + $0x1e8] sm:$0xff]  }
 0x107   :  { %v1083_v49 = vmax.f32 %v965_v42, 0.0  ;;  %v9035_v50 = vpop.f32.mrb[8].mxu1  ;;  %v8924_v51 = vpop.f32.mrb[9].mxu0 }
 0x108   :  { %v11252_v52 = vpack.c.bf16 %v530_v45, %v529_v44  ;;  %v9036_v53 = vpop.f32.mrb[9].mxu1  ;;  %v8925_v54 = vadd.f32 %v8924_v51, %v8923_v46  ;;  %v8926_v55 = vpop.f32.mrb[10].mxu0  ;;  %v10274_v44 = vld [vmem:[%s13089_s3 + $0x110] sm:$0xff]  }
 0x109   :  { %v1113_v56 = vpack.c.bf16 %v1083_v49, %v1082_v48  ;;  %v9037_v57 = vadd.f32 %v9036_v53, %v9035_v50  ;;  %9206 = vmatpush3.bf16.msra.mxu1 %v10262_v43  ;;  %v9038_v58 = vpop.f32.mrb[10].mxu1  ;;  %v8927_v59 = vpop.f32.mrb[11].mxu0  ;;  %v1180_v61 = vld [vmem:[#allocation2] sm:$0xf0]  ;;  %v10277_v50 = vld [vmem:[%s13089_s3 + $0x158] sm:$0xff]   ;;  %v10279_v53 = vld [vmem:[%s13089_s3 + $0x1f0] sm:$0xff]  }
 0x10a   :  { %576 = vst [vmem:[#allocation2 + $0x10] sm:$0xff] %v11252_v52  ;;  %v417_v62 = vadd.f32 %v8925_v54, %v11230_v4  ;;  %v9039_v63 = vpop.f32.mrb[11].mxu1  ;;  %v8928_v0 = vadd.f32 %v8927_v59, %v8926_v55  ;;  %9207 = vmatprep.subr.bf16.mxu1 %v10263_v47  ;;  %v1181_v1 = vld [vmem:[#allocation2 + $0x8] sm:$0xf0]  ;;  %v1222_v2 = vrot.slane %v1180_v61, 4  ;;  %v1223_v3 = vrot.slane %v11252_v52, 4 }
 0x10b   :  { %1129 = vst [vmem:[#allocation2 + $0x18] sm:$0xff] %v1113_v56  ;;  %v970_v6 = vadd.f32 %v9037_v57, %v11230_v4  ;;  %v9040_v7 = vadd.f32 %v9039_v63, %v9038_v58  ;;  %v1225_v8 = vrot.slane %v1181_v1, 4  ;;  %v1226_v9 = vrot.slane %v1113_v56, 4  ;;  %v10276_v47 = vld [vmem:[%s13089_s3 + $0x1a8] sm:$0xff]   ;;  %v10278_v56 = vld [vmem:[%s13089_s3 + $0x118] sm:$0xff]   ;;  %v10280_v52 = vld [vmem:[%s13089_s3 + $0x1b0] sm:$0xff]  }
 0x10c   :  { %v531_v11 = vmax.f32 %v417_v62, 0.0  ;;  %v420_v12 = vadd.f32 %v8928_v0, %v11230_v4  ;;  %v1224_v13 = vsel %vm1221_vm0, %v1222_v2, %v1223_v3  ;;  %v10281_v0 = vld [vmem:[%s13089_s3 + $0x160] sm:$0xff]  }
 0x10d   :  { %v1084_v15 = vmax.f32 %v970_v6, 0.0  ;;  %v973_v16 = vadd.f32 %v9040_v7, %v11230_v4  ;;  %9208 = vmatpush3.bf16.msra.mxu1 %v10264_v60  ;;  %v1227_v17 = vsel %vm1221_vm0, %v1225_v8, %v1226_v9  ;;  %v10283_v6 = vld [vmem:[%s13089_s3 + $0x1f8] sm:$0xff]  }
 0x10e   :  { %v532_v19 = vmax.f32 %v420_v12, 0.0  ;;  %v8929_v20 = vpop.f32.mrb[12].mxu0  ;;  %1360 = vmatprep.mubr.bf16.mxu0 %v1227_v17  ;;  %9209 = vmatprep.subr.bf16.mxu1 %v10267_v5 }
 0x10f   :  { %v1085_v22 = vmax.f32 %v973_v16, 0.0  ;;  %v9041_v23 = vpop.f32.mrb[12].mxu1  ;;  %v8930_v24 = vpop.f32.mrb[13].mxu0  ;;  %1361 = vmatmul.mubr.bf16.vlgmr.msra.gmra.mrb[64].mxu0 %v1224_v13 }
 0x110   :  { %v11285_v26 = vpack.c.bf16 %v532_v19, %v531_v11  ;;  %v9042_v27 = vpop.f32.mrb[13].mxu1  ;;  %v8931_v28 = vadd.f32 %v8930_v24, %v8929_v20  ;;  %v8932_v29 = vpop.f32.mrb[14].mxu0  ;;  %9176 = vmatpush3.bf16.msra.mxu0 %v10266_v10  ;;  %1368 = vmatprep.mubr.bf16.mxu0 %v1226_v9  ;;  %v10282_v11 = vld [vmem:[%s13089_s3 + $0x120] sm:$0xff]   ;;  %v10284_v19 = vld [vmem:[%s13089_s3 + $0x1b8] sm:$0xff]   ;;  %v10285_v20 = vld [vmem:[%s13089_s3 + $0x168] sm:$0xff]  }
 0x111   :  { %v1114_v30 = vpack.c.bf16 %v1085_v22, %v1084_v15  ;;  %v9043_v31 = vadd.f32 %v9042_v27, %v9041_v23  ;;  %v1146_v32 = vld [vmem:[#allocation2 + $0x10] sm:$0xf]  ;;  %v9044_v33 = vpop.f32.mrb[14].mxu1  ;;  %v8933_v34 = vpop.f32.mrb[15].mxu0  ;;  %9210 = vmatpush3.bf16.msra.mxu1 %v10268_v14  ;;  %9177 = vmatprep.subr.bf16.mxu0 %v10269_v18 }
 0x112   :  { %577 = vst [vmem:[#allocation2 + $0x20] sm:$0xff] %v11285_v26  ;;  %v1147_v37 = vld [vmem:[#allocation2 + $0x18] sm:$0xf]  ;;  %v425_v38 = vadd.f32 %v8931_v28, %v11230_v4  ;;  %v9045_v39 = vpop.f32.mrb[15].mxu1  ;;  %v8934_v40 = vadd.f32 %v8933_v34, %v8932_v29  ;;  %9211 = vmatprep.subr.bf16.mxu1 %v10271_v21  ;;  %v10286_v29 = vld [vmem:[%s13089_s3 + $0x128] sm:$0xff]  }
 0x113   :  { %1130 = vst [vmem:[#allocation2 + $0x28] sm:$0xff] %v1114_v30  ;;  %1512 = vmatprep.mubr.bf16.mxu1 %v1147_v37  ;;  %v978_v42 = vadd.f32 %v9043_v31, %v11230_v4  ;;  %v9046_v43 = vadd.f32 %v9045_v39, %v9044_v33  ;;  %v10289_v39 = vld [vmem:[%s13089_s3 + $0x170] sm:$0xff]  }
 0x114   :  { %1513 = vmatmul.mubr.bf16.gmra.mrb[68].mxu1 %v1146_v32  ;;  %v533_v45 = vmax.f32 %v425_v38, 0.0  ;;  %v428_v46 = vadd.f32 %v8934_v40, %v11230_v4  ;;  %9178 = vmatpush3.bf16.msra.mxu0 %v10270_v25  ;;  %v10287_v25 = vld [vmem:[%s13089_s3 + $0x2c0] sm:$0xff]  }
 0x115   :  { %v1086_v48 = vmax.f32 %v978_v42, 0.0  ;;  %v981_v49 = vadd.f32 %v9046_v43, %v11230_v4  ;;  %9212 = vmatpush3.bf16.msra.mxu1 %v10272_v35  ;;  %9179 = vmatprep.subr.bf16.mxu0 %v10273_v36  ;;  %v10288_v38 = vld [vmem:[%s13089_s3 + $0x280] sm:$0xff]  }
 0x116   :  { %v534_v51 = vmax.f32 %v428_v46, 0.0  ;;  %9213 = vmatprep.subr.bf16.mxu1 %v10275_v41  ;;  %v8935_v54 = vpop.f32.mrb[16].mxu0 }
 0x117   :  { %v1087_v55 = vmax.f32 %v981_v49, 0.0  ;;  %1369 = vmatmul.mubr.bf16.gmra.mrb[68].mxu0 %v1223_v3  ;;  %v9047_v57 = vpop.f32.mrb[16].mxu1  ;;  %v8936_v58 = vpop.f32.mrb[17].mxu0 }
 0x118   :  { %v11318_v59 = vpack.c.bf16 %v534_v51, %v533_v45  ;;  %9180 = vmatpush3.bf16.msra.mxu0 %v10274_v44  ;;  %1685 = vmatprep.mubr.bf16.mxu0 %v1114_v30  ;;  %v9048_v60 = vpop.f32.mrb[17].mxu1  ;;  %v8937_v61 = vadd.f32 %v8936_v58, %v8935_v54  ;;  %v8938_v62 = vpop.f32.mrb[18].mxu0  ;;  %v10291_v44 = vld [vmem:[%s13089_s3 + $0x2c8] sm:$0xff]   ;;  %v10295_v58 = vld [vmem:[%s13089_s3 + $0x2d0] sm:$0xff]  }
 0x119   :  { %v11320_v63 = vpack.c.bf16 %v1087_v55, %v1086_v48  ;;  %9214 = vmatpush3.bf16.msra.mxu1 %v10276_v47  ;;  %9181 = vmatprep.subr.bf16.mxu0 %v10277_v50  ;;  %v1704_v1 = vld [vmem:[#allocation2 + $0x20] sm:$0xf0]  ;;  %v9049_v2 = vadd.f32 %v9048_v60, %v9047_v57  ;;  %v9050_v3 = vpop.f32.mrb[18].mxu1  ;;  %v8939_v5 = vpop.f32.mrb[19].mxu0  ;;  %v10290_v48 = vld [vmem:[%s13089_s3 + $0x130] sm:$0xff]   ;;  %v10292_v51 = vld [vmem:[%s13089_s3 + $0x288] sm:$0xff]  }
 0x11a   :  { %578 = vst [vmem:[#allocation2 + $0x30] sm:$0xff] %v11318_v59  ;;  %9215 = vmatprep.subr.bf16.mxu1 %v10279_v53  ;;  %v1705_v7 = vld [vmem:[#allocation2 + $0x28] sm:$0xf0]  ;;  %v433_v8 = vadd.f32 %v8937_v61, %v11230_v4  ;;  %v9051_v9 = vpop.f32.mrb[19].mxu1  ;;  %v8940_v10 = vadd.f32 %v8939_v5, %v8938_v62  ;;  %v1745_v16 = vrot.slane %v1704_v1, 4  ;;  %v1746_v22 = vrot.slane %v11318_v59, 4 }
 0x11b   :  { %1131 = vst [vmem:[#allocation2 + $0x38] sm:$0xff] %v11320_v63  ;;  %v1748_v12 = vrot.slane %v1705_v7, 4  ;;  %v1749_v13 = vrot.slane %v11320_v63, 4  ;;  %v986_v14 = vadd.f32 %v9049_v2, %v11230_v4  ;;  %v9052_v15 = vadd.f32 %v9051_v9, %v9050_v3  ;;  %v10293_v55 = vld [vmem:[%s13089_s3 + $0x178] sm:$0xff]  }
 0x11c   :  { %9182 = vmatpush3.bf16.msra.mxu0 %v10278_v56  ;;  %v535_v17 = vmax.f32 %v433_v8, 0.0  ;;  %v436_v18 = vadd.f32 %v8940_v10, %v11230_v4  ;;  %v1747_v37 = vsel %vm1221_vm0, %v1745_v16, %v1746_v22  ;;  %v10294_v62 = vld [vmem:[%s13089_s3 + $0x138] sm:$0xff]   ;;  %v10297_v8 = vld [vmem:[%s13089_s3 + $0x240] sm:$0xff]  }
 0x11d   :  { %9216 = vmatpush3.bf16.msra.mxu1 %v10280_v52  ;;  %9183 = vmatprep.subr.bf16.mxu0 %v10281_v0  ;;  %v1750_v21 = vsel %vm1221_vm0, %v1748_v12, %v1749_v13  ;;  %v1088_v23 = vmax.f32 %v986_v14, 0.0  ;;  %v989_v24 = vadd.f32 %v9052_v15, %v11230_v4  ;;  %v10299_v12 = vld [vmem:[%s13089_s3 + $0x2d8] sm:$0xff]  }
 0x11e   :  { %9217 = vmatprep.subr.bf16.mxu1 %v10283_v6  ;;  %1883 = vmatprep.mubr.bf16.mxu1 %v1750_v21  ;;  %v536_v27 = vmax.f32 %v436_v18, 0.0  ;;  %v8941_v28 = vpop.f32.mrb[20].mxu0  ;;  %v10296_v6 = vld [vmem:[%s13089_s3 + $0x290] sm:$0xff]   ;;  %v10298_v21 = vld [vmem:[%s13089_s3 + $0x200] sm:$0xff]  }
 0x11f   :  { %v1089_v30 = vmax.f32 %v989_v24, 0.0  ;;  %v9053_v31 = vpop.f32.mrb[20].mxu1  ;;  %v8942_v32 = vpop.f32.mrb[21].mxu0 }
 0x120   :  { %9184 = vmatpush3.bf16.msra.mxu0 %v10282_v11  ;;  %v11355_v33 = vpack.c.bf16 %v536_v27, %v535_v17  ;;  %v9054_v34 = vpop.f32.mrb[21].mxu1  ;;  %v8943_v35 = vadd.f32 %v8942_v32, %v8941_v28  ;;  %v8944_v36 = vpop.f32.mrb[22].mxu0  ;;  %v10301_v28 = vld [vmem:[%s13089_s3 + $0x248] sm:$0xff]  }
 0x121   :  { %9218 = vmatpush3.bf16.msra.mxu1 %v10284_v19  ;;  %9185 = vmatprep.subr.bf16.mxu0 %v10285_v20  ;;  %v11366_v40 = vpack.c.bf16 %v1089_v30, %v1088_v23  ;;  %v9055_v41 = vadd.f32 %v9054_v34, %v9053_v31  ;;  %v9056_v42 = vpop.f32.mrb[22].mxu1  ;;  %v8945_v43 = vpop.f32.mrb[23].mxu0  ;;  %v10300_v23 = vld [vmem:[%s13089_s3 + $0x298] sm:$0xff]   ;;  %v10303_v30 = vld [vmem:[%s13089_s3 + $0x2e0] sm:$0xff]   ;;  %v10302_v34 = vld [vmem:[%s13089_s3 + $0x208] sm:$0xff]  }
 0x122   :  { %9259 = vmatprep.subr.bf16.mxu1 %v10287_v25  ;;  %579 = vst [vmem:[#allocation2 + $0x40] sm:$0xff] %v11355_v33  ;;  %v441_v45 = vadd.f32 %v8943_v35, %v11230_v4  ;;  %v9057_v46 = vpop.f32.mrb[23].mxu1  ;;  %v8946_v47 = vadd.f32 %v8945_v43, %v8944_v36  ;;  %v1523_v27 = vld [vmem:[#allocation2 + $0x38] sm:$0xf]  ;;  %v10305_v43 = vld [vmem:[%s13089_s3 + $0x250] sm:$0xff]  }
 0x123   :  { %1132 = vst [vmem:[#allocation2 + $0x48] sm:$0xff] %v11366_v40  ;;  %v994_v49 = vadd.f32 %v9055_v41, %v11230_v4  ;;  %v9058_v50 = vadd.f32 %v9057_v46, %v9056_v42 }
 0x124   :  { %9186 = vmatpush3.bf16.msra.mxu0 %v10286_v29  ;;  %1884 = vmatmul.mubr.bf16.vlgmr.msra.gmra.mrb[72].mxu1 %v1747_v37  ;;  %v537_v53 = vmax.f32 %v441_v45, 0.0  ;;  %v444_v54 = vadd.f32 %v8946_v47, %v11230_v4 }
 0x125   :  { %9260 = vmatpush3.bf16.msra.mxu1 %v10288_v38  ;;  %9187 = vmatprep.subr.bf16.mxu0 %v10289_v39  ;;  %v1090_v56 = vmax.f32 %v994_v49, 0.0  ;;  %v997_v57 = vadd.f32 %v9058_v50, %v11230_v4 }
 0x126   :  { %9261 = vmatprep.subr.bf16.mxu1 %v10291_v44  ;;  %1891 = vmatprep.mubr.bf16.mxu1 %v1749_v13  ;;  %v538_v60 = vmax.f32 %v444_v54, 0.0  ;;  %v8947_v61 = vpop.f32.mrb[24].mxu0  ;;  %v10308_v54 = vld [vmem:[%s13089_s3 + $0x2a8] sm:$0xff]  }
 0x127   :  { %v1091_v63 = vmax.f32 %v997_v57, 0.0  ;;  %v9059_v52 = vpop.f32.mrb[24].mxu1  ;;  %v8948_v0 = vpop.f32.mrb[25].mxu0  ;;  %v10309_v57 = vld [vmem:[%s13089_s3 + $0x258] sm:$0xff]  }
 0x128   :  { %9188 = vmatpush3.bf16.msra.mxu0 %v10290_v48  ;;  %v11392_v1 = vpack.c.bf16 %v538_v60, %v537_v53  ;;  %v9060_v2 = vpop.f32.mrb[25].mxu1  ;;  %v8949_v3 = vadd.f32 %v8948_v0, %v8947_v61  ;;  %v8950_v5 = vpop.f32.mrb[26].mxu0  ;;  %v10307_v48 = vld [vmem:[%s13089_s3 + $0x2e8] sm:$0xff]   ;;  %v10306_v53 = vld [vmem:[%s13089_s3 + $0x210] sm:$0xff]  }
 0x129   :  { %9262 = vmatpush3.bf16.msra.mxu1 %v10292_v51  ;;  %9189 = vmatprep.subr.bf16.mxu0 %v10293_v55  ;;  %v1117_v7 = vpack.c.bf16 %v1091_v63, %v1090_v56  ;;  %v9061_v9 = vadd.f32 %v9060_v2, %v9059_v52  ;;  %v9062_v10 = vpop.f32.mrb[26].mxu1  ;;  %v8951_v11 = vpop.f32.mrb[27].mxu0  ;;  %v10311_v61 = vld [vmem:[%s13089_s3 + $0x2f0] sm:$0xff]  }
 0x12a   :  { %9263 = vmatprep.subr.bf16.mxu1 %v10295_v58  ;;  %580 = vst [vmem:[#allocation2 + $0x50] sm:$0xff] %v11392_v1  ;;  %v2087_v13 = vld [vmem:[#allocation2 + $0x48] sm:$0xf0]  ;;  %v449_v14 = vadd.f32 %v8949_v3, %v11230_v4  ;;  %v9063_v15 = vpop.f32.mrb[27].mxu1  ;;  %v8952_v16 = vadd.f32 %v8951_v11, %v8950_v5  ;;  %v1522_v52 = vld [vmem:[#allocation2 + $0x30] sm:$0xf] }
 0x12b   :  { %1133 = vst [vmem:[#allocation2 + $0x58] sm:$0xff] %v1117_v7  ;;  %v2130_v17 = vrot.slane %v2087_v13, 4  ;;  %v11405_v18 = vrot.slane %v1117_v7, 4  ;;  %v1002_v19 = vadd.f32 %v9061_v9, %v11230_v4  ;;  %v9064_v20 = vadd.f32 %v9063_v15, %v9062_v10  ;;  %v10310_v3 = vld [vmem:[%s13089_s3 + $0x218] sm:$0xff]   ;;  %v10313_v13 = vld [vmem:[%s13089_s3 + $0x260] sm:$0xff]  }
 0x12c   :  { %9190 = vmatpush3.bf16.msra.mxu0 %v10294_v62  ;;  %1892 = vmatmul.mubr.bf16.gmra.mrb[76].mxu1 %v1746_v22  ;;  %v539_v24 = vmax.f32 %v449_v14, 0.0  ;;  %v452_v25 = vadd.f32 %v8952_v16, %v11230_v4 }
 0x12d   :  { %9264 = vmatpush3.bf16.msra.mxu1 %v10296_v6  ;;  %9231 = vmatprep.subr.bf16.mxu0 %v10297_v8  ;;  %v2132_v59 = vsel %vm1221_vm0, %v2130_v17, %v11405_v18  ;;  %v1092_v22 = vmax.f32 %v1002_v19, 0.0  ;;  %v1005_v29 = vadd.f32 %v9064_v20, %v11230_v4  ;;  %v10315_v19 = vld [vmem:[%s13089_s3 + $0x2f8] sm:$0xff]   ;;  %v2086_v20 = vld [vmem:[#allocation2 + $0x40] sm:$0xf0] }
 0x12e   :  { %9265 = vmatprep.subr.bf16.mxu1 %v10299_v12  ;;  %2265 = vmatprep.mubr.bf16.mxu1 %v2132_v59  ;;  %v540_v31 = vmax.f32 %v452_v25, 0.0  ;;  %v8953_v32 = vpop.f32.mrb[28].mxu0  ;;  %v10312_v12 = vld [vmem:[%s13089_s3 + $0x2b0] sm:$0xff]  }
 0x12f   :  { %1686 = vmatmul.mubr.bf16.vlgmr.msra.gmra.mrb[72].mxu0 %v11285_v26  ;;  %v1093_v35 = vmax.f32 %v1005_v29, 0.0  ;;  %v9065_v36 = vpop.f32.mrb[28].mxu1  ;;  %v8954_v37 = vpop.f32.mrb[29].mxu0  ;;  %v10304_v26 = vld [vmem:[%s13089_s3 + $0x2a0] sm:$0xff]   ;;  %v10316_v29 = vld [vmem:[%s13089_s3 + $0x2b8] sm:$0xff]  }
 0x130   :  { %1693 = vmatprep.mubr.bf16.mxu0 %v1523_v27  ;;  %9232 = vmatpush3.bf16.msra.mxu0 %v10298_v21  ;;  %v11430_v38 = vpack.c.bf16 %v540_v31, %v539_v24  ;;  %v9066_v39 = vpop.f32.mrb[29].mxu1  ;;  %v8955_v41 = vadd.f32 %v8954_v37, %v8953_v32  ;;  %v8956_v42 = vpop.f32.mrb[30].mxu0  ;;  %v10314_v27 = vld [vmem:[%s13089_s3 + $0x220] sm:$0xff]   ;;  %v2127_v31 = vrot.slane %v2086_v20, 4  ;;  %v11493_v32 = vrot.slane %v11392_v1, 4 }
 0x131   :  { %9266 = vmatpush3.bf16.msra.mxu1 %v10300_v23  ;;  %9233 = vmatprep.subr.bf16.mxu0 %v10301_v28  ;;  %v11438_v44 = vpack.c.bf16 %v1093_v35, %v1092_v22  ;;  %v9067_v45 = vadd.f32 %v9066_v39, %v9065_v36  ;;  %v9068_v46 = vpop.f32.mrb[30].mxu1  ;;  %v8957_v47 = vpop.f32.mrb[31].mxu0 }
 0x132   :  { %9267 = vmatprep.subr.bf16.mxu1 %v10303_v30  ;;  %581 = vst [vmem:[#allocation2 + $0x60] sm:$0xff] %v11430_v38  ;;  %v457_v49 = vadd.f32 %v8955_v41, %v11230_v4  ;;  %v9069_v50 = vpop.f32.mrb[31].mxu1  ;;  %v8958_v51 = vadd.f32 %v8957_v47, %v8956_v42  ;;  %v10317_v30 = vld [vmem:[%s13089_s3 + $0x268] sm:$0xff]  }
 0x133   :  { %1134 = vst [vmem:[#allocation2 + $0x68] sm:$0xff] %v11438_v44  ;;  %v1010_v55 = vadd.f32 %v9067_v45, %v11230_v4  ;;  %v9070_v56 = vadd.f32 %v9069_v50, %v9068_v46  ;;  %v10321_v50 = vld [vmem:[%s13089_s3 + $0x270] sm:$0xff]  }
 0x134   :  { %9234 = vmatpush3.bf16.msra.mxu0 %v10302_v34  ;;  %v541_v58 = vmax.f32 %v457_v49, 0.0  ;;  %v460_v60 = vadd.f32 %v8958_v51, %v11230_v4  ;;  %v10319_v34 = vld [vmem:[%s13089_s3 + $0x3c0] sm:$0xff]  }
 0x135   :  { %9268 = vmatpush3.bf16.msra.mxu1 %v10304_v26  ;;  %9235 = vmatprep.subr.bf16.mxu0 %v10305_v43  ;;  %v1094_v62 = vmax.f32 %v1010_v55, 0.0  ;;  %v1013_v63 = vadd.f32 %v9070_v56, %v11230_v4  ;;  %v10318_v26 = vld [vmem:[%s13089_s3 + $0x228] sm:$0xff]   ;;  %v10320_v49 = vld [vmem:[%s13089_s3 + $0x380] sm:$0xff]  }
 0x136   :  { %9269 = vmatprep.subr.bf16.mxu1 %v10307_v48  ;;  %v542_v0 = vmax.f32 %v460_v60, 0.0  ;;  %v8959_v2 = vpop.f32.mrb[32].mxu0  ;;  %v2129_v48 = vsel %vm1221_vm0, %v2127_v31, %v11493_v32  ;;  %v10323_v55 = vld [vmem:[%s13089_s3 + $0x3c8] sm:$0xff]  }
 0x137   :  { %1694 = vmatmul.mubr.bf16.gmra.mrb[76].mxu0 %v1522_v52  ;;  %v1095_v5 = vmax.f32 %v1013_v63, 0.0  ;;  %v8960_v6 = vpop.f32.mrb[33].mxu0  ;;  %v9071_v7 = vpop.f32.mrb[32].mxu1 }
 0x138   :  { %9236 = vmatpush3.bf16.msra.mxu0 %v10306_v53  ;;  %2067 = vmatprep.mubr.bf16.mxu0 %v11366_v40  ;;  %v11465_v8 = vpack.c.bf16 %v542_v0, %v541_v58  ;;  %v8961_v9 = vadd.f32 %v8960_v6, %v8959_v2  ;;  %v8962_v10 = vpop.f32.mrb[34].mxu0  ;;  %v9072_v11 = vpop.f32.mrb[33].mxu1  ;;  %v10324_v0 = vld [vmem:[%s13089_s3 + $0x388] sm:$0xff]  }
 0x139   :  { %9270 = vmatpush3.bf16.msra.mxu1 %v10308_v54  ;;  %9237 = vmatprep.subr.bf16.mxu0 %v10309_v57  ;;  %v11473_v14 = vpack.c.bf16 %v1095_v5, %v1094_v62  ;;  %v8963_v15 = vpop.f32.mrb[35].mxu0  ;;  %v9073_v16 = vadd.f32 %v9072_v11, %v9071_v7  ;;  %v9074_v17 = vpop.f32.mrb[34].mxu1  ;;  %v10325_v5 = vld [vmem:[%s13089_s3 + $0x278] sm:$0xff]  }
 0x13a   :  { %9271 = vmatprep.subr.bf16.mxu1 %v10311_v61  ;;  %582 = vst [vmem:[#allocation2 + $0x70] sm:$0xff] %v11465_v8  ;;  %v465_v21 = vadd.f32 %v8961_v9, %v11230_v4  ;;  %v8964_v23 = vadd.f32 %v8963_v15, %v8962_v10  ;;  %v9075_v25 = vpop.f32.mrb[35].mxu1  ;;  %v10322_v61 = vld [vmem:[%s13089_s3 + $0x230] sm:$0xff]   ;;  %v2469_v62 = vld [vmem:[#allocation2 + $0x68] sm:$0xf0]  ;;  %v10326_v9 = vld [vmem:[%s13089_s3 + $0x238] sm:$0xff]  }
 0x13b   :  { %1135 = vst [vmem:[#allocation2 + $0x78] sm:$0xff] %v11473_v14  ;;  %v1018_v24 = vadd.f32 %v9073_v16, %v11230_v4  ;;  %v9076_v22 = vadd.f32 %v9075_v25, %v9074_v17  ;;  %v10327_v10 = vld [vmem:[%s13089_s3 + $0x3d0] sm:$0xff]   ;;  %v2512_v11 = vrot.slane %v2469_v62, 4  ;;  %v11534_v15 = vrot.slane %v11473_v14, 4  ;;  %v10329_v25 = vld [vmem:[%s13089_s3 + $0x340] sm:$0xff]  }
 0x13c   :  { %9238 = vmatpush3.bf16.msra.mxu0 %v10310_v3  ;;  %v543_v28 = vmax.f32 %v465_v21, 0.0  ;;  %v468_v59 = vadd.f32 %v8964_v23, %v11230_v4 }
 0x13d   :  { %9272 = vmatpush3.bf16.msra.mxu1 %v10312_v12  ;;  %9239 = vmatprep.subr.bf16.mxu0 %v10313_v13  ;;  %v1096_v36 = vmax.f32 %v1018_v24, 0.0  ;;  %v1021_v39 = vadd.f32 %v9076_v22, %v11230_v4  ;;  %v10328_v24 = vld [vmem:[%s13089_s3 + $0x390] sm:$0xff]   ;;  %v10331_v22 = vld [vmem:[%s13089_s3 + $0x3d8] sm:$0xff]  }
 0x13e   :  { %9273 = vmatprep.subr.bf16.mxu1 %v10315_v19  ;;  %v544_v35 = vmax.f32 %v468_v59, 0.0  ;;  %v8965_v37 = vpop.f32.mrb[36].mxu0 }
 0x13f   :  { %v8966_v41 = vpop.f32.mrb[37].mxu0  ;;  %v9077_v42 = vpop.f32.mrb[36].mxu1  ;;  %v1097_v45 = vmax.f32 %v1021_v39, 0.0 }
 0x140   :  { %9240 = vmatpush3.bf16.msra.mxu0 %v10314_v27  ;;  %v567_v43 = vpack.c.bf16 %v544_v35, %v543_v28  ;;  %v8967_v1 = vadd.f32 %v8966_v41, %v8965_v37  ;;  %v8968_v46 = vpop.f32.mrb[38].mxu0  ;;  %v9078_v47 = vpop.f32.mrb[37].mxu1  ;;  %v1905_v35 = vld [vmem:[#allocation2 + $0x58] sm:$0xf]  ;;  %v2514_v37 = vsel %vm1221_vm0, %v2512_v11, %v11534_v15 }
 0x141   :  { %9274 = vmatpush3.bf16.msra.mxu1 %v10316_v29  ;;  %9241 = vmatprep.subr.bf16.mxu0 %v10317_v30  ;;  %v8969_v51 = vpop.f32.mrb[39].mxu0  ;;  %v9079_v53 = vadd.f32 %v9078_v47, %v9077_v42  ;;  %v9080_v54 = vpop.f32.mrb[38].mxu1  ;;  %v1120_v57 = vpack.c.bf16 %v1097_v45, %v1096_v36  ;;  %v11548_v29 = vld [vmem:[%s13090_s2] ss:$0 sm:$0xff]  ;;  %v10332_v42 = vld [vmem:[%s13089_s3 + $0x398] sm:$0xff]  }
 0x142   :  { %9315 = vmatprep.subr.bf16.mxu1 %v10319_v34  ;;  %583 = vst [vmem:[#allocation2 + $0x80] sm:$0xff] %v567_v43  ;;  %v473_v56 = vadd.f32 %v8967_v1, %v11230_v4  ;;  %v8970_v58 = vadd.f32 %v8969_v51, %v8968_v46  ;;  %v9081_v60 = vpop.f32.mrb[39].mxu1  ;;  %v10330_v36 = vld [vmem:[%s13089_s3 + $0x300] sm:$0xff]   ;;  %v10333_v1 = vld [vmem:[%s13089_s3 + $0x348] sm:$0xff]   ;;  %v10341_v11 = vld [vmem:[%s13089_s3 + $0x358] sm:$0xff]  }
 0x143   :  { %v1026_v63 = vadd.f32 %v9079_v53, %v11230_v4  ;;  %v9082_v52 = vadd.f32 %v9081_v60, %v9080_v54  ;;  %1136 = vst [vmem:[#allocation2 + $0x88] sm:$0xff] %v1120_v57  ;;  %v10335_v47 = vld [vmem:[%s13089_s3 + $0x3e0] sm:$0xff]  }
 0x144   :  { %9242 = vmatpush3.bf16.msra.mxu0 %v10318_v26  ;;  %2266 = vmatmul.mubr.bf16.vlgmr.msra.gmra.mrb[80].mxu1 %v2129_v48  ;;  %v545_v2 = vmax.f32 %v473_v56, 0.0  ;;  %v476_v3 = vadd.f32 %v8970_v58, %v11230_v4  ;;  %v10336_v60 = vld [vmem:[%s13089_s3 + $0x3a0] sm:$0xff]  }
 0x145   :  { %9316 = vmatpush3.bf16.msra.mxu1 %v10320_v49  ;;  %9243 = vmatprep.subr.bf16.mxu0 %v10321_v50  ;;  %v1098_v6 = vmax.f32 %v1026_v63, 0.0  ;;  %v1029_v7 = vadd.f32 %v9082_v52, %v11230_v4  ;;  %v10334_v50 = vld [vmem:[%s13089_s3 + $0x308] sm:$0xff]  }
 0x146   :  { %9317 = vmatprep.subr.bf16.mxu1 %v10323_v55  ;;  %2273 = vmatprep.mubr.bf16.mxu1 %v11405_v18  ;;  %v546_v12 = vmax.f32 %v476_v3, 0.0  ;;  %v8971_v13 = vpop.f32.mrb[40].mxu0 }
 0x147   :  { %v1099_v16 = vmax.f32 %v1029_v7, 0.0  ;;  %v8972_v17 = vpop.f32.mrb[41].mxu0  ;;  %v9083_v4 = vpop.f32.mrb[40].mxu1  ;;  %v10340_v7 = vld [vmem:[%s13089_s3 + $0x3a8] sm:$0xff]  }
 0x148   :  { %9244 = vmatpush3.bf16.msra.mxu0 %v10322_v61  ;;  %v568_v19 = vpack.c.bf16 %v546_v12, %v545_v2  ;;  %v8973_v20 = vadd.f32 %v8972_v17, %v8971_v13  ;;  %v8974_v21 = vpop.f32.mrb[42].mxu0  ;;  %v9084_v23 = vpop.f32.mrb[41].mxu1  ;;  %v10339_v2 = vld [vmem:[%s13089_s3 + $0x3e8] sm:$0xff]  }
 0x149   :  { %9318 = vmatpush3.bf16.msra.mxu1 %v10324_v0  ;;  %9245 = vmatprep.subr.bf16.mxu0 %v10325_v5  ;;  %v1121_v14 = vpack.c.bf16 %v1099_v16, %v1098_v6  ;;  %v8975_v27 = vpop.f32.mrb[43].mxu0  ;;  %v9085_v28 = vadd.f32 %v9084_v23, %v9083_v4  ;;  %v9086_v59 = vpop.f32.mrb[42].mxu1  ;;  %v10338_v0 = vld [vmem:[%s13089_s3 + $0x310] sm:$0xff]  }
 0x14a   :  { %9319 = vmatprep.subr.bf16.mxu1 %v10327_v10  ;;  %584 = vst [vmem:[#allocation2 + $0x90] sm:$0xff] %v568_v19  ;;  %v481_v30 = vadd.f32 %v11548_v29, %v8973_v20  ;;  %v8976_v31 = vadd.f32 %v8975_v27, %v8974_v21  ;;  %v9087_v34 = vpop.f32.mrb[43].mxu1  ;;  %v10343_v16 = vld [vmem:[%s13089_s3 + $0x3f0] sm:$0xff]   ;;  %v10342_v20 = vld [vmem:[%s13089_s3 + $0x318] sm:$0xff]  }
 0x14b   :  { %1137 = vst [vmem:[#allocation2 + $0x98] sm:$0xff] %v1121_v14  ;;  %v1034_v39 = vadd.f32 %v11548_v29, %v9085_v28  ;;  %v9088_v41 = vadd.f32 %v9087_v34, %v9086_v59  ;;  %v1904_v19 = vld [vmem:[#allocation2 + $0x50] sm:$0xf]  ;;  %v2468_v34 = vld [vmem:[#allocation2 + $0x60] sm:$0xf0] }
 0x14c   :  { %9246 = vmatpush3.bf16.msra.mxu0 %v10326_v9  ;;  %2274 = vmatmul.mubr.bf16.gmra.mrb[84].mxu1 %v11493_v32  ;;  %v547_v26 = vmax.f32 %v481_v30, 0.0  ;;  %v484_v43 = vadd.f32 %v11548_v29, %v8976_v31 }
 0x14d   :  { %9320 = vmatpush3.bf16.msra.mxu1 %v10328_v24  ;;  %9287 = vmatprep.subr.bf16.mxu0 %v10329_v25  ;;  %v1100_v45 = vmax.f32 %v1034_v39, 0.0  ;;  %v1037_v46 = vadd.f32 %v11548_v29, %v9088_v41  ;;  %v10344_v24 = vld [vmem:[%s13089_s3 + $0x3b0] sm:$0xff]   ;;  %v10345_v25 = vld [vmem:[%s13089_s3 + $0x360] sm:$0xff]  }
 0x14e   :  { %9321 = vmatprep.subr.bf16.mxu1 %v10331_v22  ;;  %2647 = vmatprep.mubr.bf16.mxu1 %v2514_v37  ;;  %v548_v48 = vmax.f32 %v484_v43, 0.0  ;;  %v8977_v49 = vpop.f32.mrb[44].mxu0  ;;  %v10346_v41 = vld [vmem:[%s13089_s3 + $0x320] sm:$0xff]  }
 0x14f   :  { %2068 = vmatmul.mubr.bf16.vlgmr.msra.gmra.mrb[80].mxu0 %v11355_v33  ;;  %v8978_v51 = vpop.f32.mrb[45].mxu0  ;;  %v1101_v53 = vmax.f32 %v1037_v46, 0.0  ;;  %v9089_v54 = vpop.f32.mrb[44].mxu1  ;;  %v10337_v33 = vld [vmem:[%s13089_s3 + $0x350] sm:$0xff]  }
 0x150   :  { %2075 = vmatprep.mubr.bf16.mxu0 %v1905_v35  ;;  %9288 = vmatpush3.bf16.msra.mxu0 %v10330_v36  ;;  %v569_v55 = vpack.c.bf16 %v548_v48, %v547_v26  ;;  %v8979_v56 = vadd.f32 %v8978_v51, %v8977_v49  ;;  %v8980_v57 = vpop.f32.mrb[46].mxu0  ;;  %v9090_v58 = vpop.f32.mrb[45].mxu1  ;;  %v2509_v48 = vrot.slane %v2468_v34, 4  ;;  %v11624_v51 = vrot.slane %v11465_v8, 4  ;;  %v10353_v8 = vld [vmem:[%s13089_s3 + $0x370] sm:$0xff]  }
 0x151   :  { %9322 = vmatpush3.bf16.msra.mxu1 %v10332_v42  ;;  %9289 = vmatprep.subr.bf16.mxu0 %v10333_v1  ;;  %v1122_v61 = vpack.c.bf16 %v1101_v53, %v1100_v45  ;;  %v8981_v62 = vpop.f32.mrb[47].mxu0  ;;  %v9091_v63 = vadd.f32 %v9090_v58, %v9089_v54  ;;  %v9092_v52 = vpop.f32.mrb[46].mxu1  ;;  %v10348_v1 = vld [vmem:[%s13089_s3 + $0x3b8] sm:$0xff]   ;;  %v10349_v45 = vld [vmem:[%s13089_s3 + $0x368] sm:$0xff]  }
 0x152   :  { %9323 = vmatprep.subr.bf16.mxu1 %v10335_v47  ;;  %585 = vst [vmem:[#allocation2 + $0xa0] sm:$0xff] %v569_v55  ;;  %v489_v3 = vadd.f32 %v11548_v29, %v8979_v56  ;;  %v8982_v5 = vadd.f32 %v8981_v62, %v8980_v57  ;;  %v9093_v6 = vpop.f32.mrb[47].mxu1  ;;  %v10350_v55 = vld [vmem:[%s13089_s3 + $0x328] sm:$0xff]   ;;  %v10351_v56 = vld [vmem:[%s13089_s3 + $0x40] sm:$0xff]  }
 0x153   :  { %1138 = vst [vmem:[#allocation2 + $0xa8] sm:$0xff] %v1122_v61  ;;  %v1042_v9 = vadd.f32 %v11548_v29, %v9091_v63  ;;  %v9094_v10 = vadd.f32 %v9093_v6, %v9092_v52 }
 0x154   :  { %9290 = vmatpush3.bf16.msra.mxu0 %v10334_v50  ;;  %v549_v12 = vmax.f32 %v489_v3, 0.0  ;;  %v492_v13 = vadd.f32 %v11548_v29, %v8982_v5  ;;  %v2511_v3 = vsel %vm1221_vm0, %v2509_v48, %v11624_v51 }
 0x155   :  { %9324 = vmatpush3.bf16.msra.mxu1 %v10336_v60  ;;  %9291 = vmatprep.subr.bf16.mxu0 %v10337_v33  ;;  %v1102_v17 = vmax.f32 %v1042_v9, 0.0  ;;  %v1045_v4 = vadd.f32 %v11548_v29, %v9094_v10  ;;  %v10352_v60 = vld [vmem:[%s13089_s3] sm:$0xff]   ;;  %v10355_v10 = vld [vmem:[%s13089_s3 + $0x48] sm:$0xff]  }
 0x156   :  { %9325 = vmatprep.subr.bf16.mxu1 %v10339_v2  ;;  %v550_v21 = vmax.f32 %v492_v13, 0.0  ;;  %v8983_v23 = vpop.f32.mrb[48].mxu0 }
 0x157   :  { %2076 = vmatmul.mubr.bf16.gmra.mrb[84].mxu0 %v1904_v19  ;;  %v1103_v14 = vmax.f32 %v1045_v4, 0.0  ;;  %v8984_v27 = vpop.f32.mrb[49].mxu0  ;;  %v9095_v28 = vpop.f32.mrb[48].mxu1  ;;  %v10356_v19 = vld [vmem:[%s13089_s3 + $0x8] sm:$0xff]  }
 0x158   :  { %9292 = vmatpush3.bf16.msra.mxu0 %v10338_v0  ;;  %2449 = vmatprep.mubr.bf16.mxu0 %v11438_v44  ;;  %v570_v59 = vpack.c.bf16 %v550_v21, %v549_v12  ;;  %v8985_v22 = vadd.f32 %v8984_v27, %v8983_v23  ;;  %v8986_v30 = vpop.f32.mrb[50].mxu0  ;;  %v9096_v31 = vpop.f32.mrb[49].mxu1  ;;  %v10347_v44 = vld [vmem:[%s13089_s3 + $0x3f8] sm:$0xff]   ;;  %v10359_v27 = vld [vmem:[%s13089_s3 + $0x50] sm:$0xff]  }
 0x159   :  { %9326 = vmatpush3.bf16.msra.mxu1 %v10340_v7  ;;  %9293 = vmatprep.subr.bf16.mxu0 %v10341_v11  ;;  %v1123_v35 = vpack.c.bf16 %v1103_v14, %v1102_v17  ;;  %v8987_v36 = vpop.f32.mrb[51].mxu0  ;;  %v9097_v37 = vadd.f32 %v9096_v31, %v9095_v28  ;;  %v9098_v39 = vpop.f32.mrb[50].mxu1  ;;  %v10357_v23 = vld [vmem:[%s13089_s3 + $0x378] sm:$0xff]  }
 0x15a   :  { %9327 = vmatprep.subr.bf16.mxu1 %v10343_v16  ;;  %586 = vst [vmem:[#allocation2 + $0xb0] sm:$0xff] %v570_v59  ;;  %v497_v42 = vadd.f32 %v11548_v29, %v8985_v22  ;;  %v8988_v26 = vadd.f32 %v8987_v36, %v8986_v30  ;;  %v9099_v43 = vpop.f32.mrb[51].mxu1  ;;  %v10354_v16 = vld [vmem:[%s13089_s3 + $0x330] sm:$0xff]   ;;  %v10358_v14 = vld [vmem:[%s13089_s3 + $0x338] sm:$0xff]  }
 0x15b   :  { %1139 = vst [vmem:[#allocation2 + $0xb8] sm:$0xff] %v1123_v35  ;;  %v1050_v46 = vadd.f32 %v11548_v29, %v9097_v37  ;;  %v9100_v47 = vadd.f32 %v9099_v43, %v9098_v39  ;;  %v10360_v22 = vld [vmem:[%s13089_s3 + $0x10] sm:$0xff]   ;;  %v10361_v35 = vld [vmem:[%s13089_s3 + $0xc0] sm:$0xff]  }
 0x15c   :  { %9294 = vmatpush3.bf16.msra.mxu0 %v10342_v20  ;;  %v551_v49 = vmax.f32 %v497_v42, 0.0  ;;  %v500_v50 = vadd.f32 %v11548_v29, %v8988_v26 }
 0x15d   :  { %9328 = vmatpush3.bf16.msra.mxu1 %v10344_v24  ;;  %9295 = vmatprep.subr.bf16.mxu0 %v10345_v25  ;;  %v1104_v53 = vmax.f32 %v1050_v46, 0.0  ;;  %v1053_v54 = vadd.f32 %v11548_v29, %v9100_v47 }
 0x15e   :  { %9329 = vmatprep.subr.bf16.mxu1 %v10347_v44  ;;  %v552_v57 = vmax.f32 %v500_v50, 0.0  ;;  %v8989_v58 = vpop.f32.mrb[52].mxu0  ;;  %v10364_v50 = vld [vmem:[%s13089_s3 + $0x18] sm:$0xff]  }
 0x15f   :  { %v8990_v33 = vpop.f32.mrb[53].mxu0  ;;  %v1105_v61 = vmax.f32 %v1053_v54, 0.0  ;;  %v9101_v62 = vpop.f32.mrb[52].mxu1 }
 0x160   :  { %9296 = vmatpush3.bf16.msra.mxu0 %v10346_v41  ;;  %v571_v63 = vpack.c.bf16 %v552_v57, %v551_v49  ;;  %v8991_v52 = vadd.f32 %v8990_v33, %v8989_v58  ;;  %v8992_v0 = vpop.f32.mrb[54].mxu0  ;;  %v9102_v2 = vpop.f32.mrb[53].mxu1  ;;  %v2287_v49 = vld [vmem:[#allocation2 + $0x78] sm:$0xf]  ;;  %v10367_v58 = vld [vmem:[%s13089_s3 + $0x60] sm:$0xff]  }
 0x161   :  { %9330 = vmatpush3.bf16.msra.mxu1 %v10348_v1  ;;  %9297 = vmatprep.subr.bf16.mxu0 %v10349_v45  ;;  %v1124_v5 = vpack.c.bf16 %v1105_v61, %v1104_v53  ;;  %v8993_v6 = vpop.f32.mrb[55].mxu0  ;;  %v9103_v7 = vadd.f32 %v9102_v2, %v9101_v62  ;;  %v9104_v9 = vpop.f32.mrb[54].mxu1  ;;  %v10362_v1 = vld [vmem:[%s13089_s3 + $0x80] sm:$0xff]   ;;  %v10363_v45 = vld [vmem:[%s13089_s3 + $0x58] sm:$0xff]   ;;  %v2732_v33 = vld [vmem:[#allocation2 + $0x48] sm:$0xf0] }
 0x162   :  { %9371 = vmatprep.subr.bf16.mxu1 %v10351_v56  ;;  %587 = vst [vmem:[#allocation2 + $0xc0] sm:$0xff] %v571_v63  ;;  %v505_v11 = vadd.f32 %v11548_v29, %v8991_v52  ;;  %v8994_v12 = vadd.f32 %v8993_v6, %v8992_v0  ;;  %v9105_v13 = vpop.f32.mrb[55].mxu1  ;;  %v10366_v63 = vld [vmem:[%s13089_s3 + $0x88] sm:$0xff]  }
 0x163   :  { %1140 = vst [vmem:[#allocation2 + $0xc8] sm:$0xff] %v1124_v5  ;;  %v1058_v17 = vadd.f32 %v11548_v29, %v9103_v7  ;;  %v9106_v4 = vadd.f32 %v9105_v13, %v9104_v9  ;;  %v10368_v7 = vld [vmem:[%s13089_s3 + $0x20] sm:$0xff]   ;;  %v10371_v13 = vld [vmem:[%s13089_s3 + $0x68] sm:$0xff]  }
 0x164   :  { %9298 = vmatpush3.bf16.msra.mxu0 %v10350_v55  ;;  %2648 = vmatmul.mubr.bf16.vlgmr.msra.gmra.mrb[88].mxu1 %v2511_v3  ;;  %v553_v20 = vmax.f32 %v505_v11, 0.0  ;;  %v508_v21 = vadd.f32 %v11548_v29, %v8994_v12  ;;  %v10365_v55 = vld [vmem:[%s13089_s3 + $0xc8] sm:$0xff]  }
 0x165   :  { %9372 = vmatpush3.bf16.msra.mxu1 %v10352_v60  ;;  %9299 = vmatprep.subr.bf16.mxu0 %v10353_v8  ;;  %v1106_v24 = vmax.f32 %v1058_v17, 0.0  ;;  %v1061_v25 = vadd.f32 %v11548_v29, %v9106_v4 }
 0x166   :  { %9373 = vmatprep.subr.bf16.mxu1 %v10355_v10  ;;  %2655 = vmatprep.mubr.bf16.mxu1 %v11534_v15  ;;  %v554_v28 = vmax.f32 %v508_v21, 0.0  ;;  %v8995_v59 = vpop.f32.mrb[56].mxu0 }
 0x167   :  { %v1107_v30 = vmax.f32 %v1061_v25, 0.0  ;;  %v8996_v31 = vpop.f32.mrb[57].mxu0  ;;  %v9107_v34 = vpop.f32.mrb[56].mxu1  ;;  %v10372_v25 = vld [vmem:[%s13089_s3 + $0x28] sm:$0xff]  }
 0x168   :  { %9300 = vmatpush3.bf16.msra.mxu0 %v10354_v16  ;;  %v572_v36 = vpack.c.bf16 %v554_v28, %v553_v20  ;;  %v8997_v37 = vadd.f32 %v8996_v31, %v8995_v59  ;;  %v8998_v39 = vpop.f32.mrb[58].mxu0  ;;  %v9108_v41 = vpop.f32.mrb[57].mxu1  ;;  %v2774_v20 = vrot.slane %v2732_v33, 4  ;;  %v10373_v28 = vld [vmem:[%s13089_s3 + $0xd8] sm:$0xff]  }
 0x169   :  { %9374 = vmatpush3.bf16.msra.mxu1 %v10356_v19  ;;  %9301 = vmatprep.subr.bf16.mxu0 %v10357_v23  ;;  %v1125_v44 = vpack.c.bf16 %v1107_v30, %v1106_v24  ;;  %v8999_v42 = vpop.f32.mrb[59].mxu0  ;;  %v9109_v26 = vadd.f32 %v9108_v41, %v9107_v34  ;;  %v9110_v43 = vpop.f32.mrb[58].mxu1  ;;  %v10370_v19 = vld [vmem:[%s13089_s3 + $0x90] sm:$0xff]  }
 0x16a   :  { %9375 = vmatprep.subr.bf16.mxu1 %v10359_v27  ;;  %588 = vst [vmem:[#allocation2 + $0xd0] sm:$0xff] %v572_v36  ;;  %v513_v46 = vadd.f32 %v11548_v29, %v8997_v37  ;;  %v9000_v47 = vadd.f32 %v8999_v42, %v8998_v39  ;;  %v9111_v48 = vpop.f32.mrb[59].mxu1  ;;  %v2286_v24 = vld [vmem:[#allocation2 + $0x70] sm:$0xf]  ;;  %v2776_v34 = vsel %vm1221_vm0, %v2774_v20, %v11405_v18  ;;  %v10374_v36 = vld [vmem:[%s13089_s3 + $0x98] sm:$0xff]   ;;  %v10377_v39 = vld [vmem:[%s13089_s3 + $0xe0] sm:$0xff]  }
 0x16b   :  { %1141 = vst [vmem:[#allocation2 + $0xd8] sm:$0xff] %v1125_v44  ;;  %v1066_v53 = vadd.f32 %v11548_v29, %v9109_v26  ;;  %v9112_v54 = vadd.f32 %v9111_v48, %v9110_v43  ;;  %v10375_v30 = vld [vmem:[%s13089_s3 + $0x70] sm:$0xff]   ;;  %v10379_v44 = vld [vmem:[%s13089_s3 + $0x78] sm:$0xff]   ;;  %v10378_v42 = vld [vmem:[%s13089_s3 + $0xa0] sm:$0xff]  }
 0x16c   :  { %9302 = vmatpush3.bf16.msra.mxu0 %v10358_v14  ;;  %2656 = vmatmul.mubr.bf16.gmra.mrb[92].mxu1 %v11624_v51  ;;  %v555_v56 = vmax.f32 %v513_v46, 0.0  ;;  %v516_v57 = vadd.f32 %v11548_v29, %v9000_v47  ;;  %v10380_v26 = vld [vmem:[%s13089_s3 + $0x38] sm:$0xff]   ;;  %v10381_v43 = vld [vmem:[%s13089_s3 + $0xe8] sm:$0xff]   ;;  %v10384_v46 = vld [vmem:[%s13089_s3 + $0x180] sm:$0xff]  }
 0x16d   :  { %9376 = vmatpush3.bf16.msra.mxu1 %v10360_v22  ;;  %3053 = vmatprep.mubr.bf16.mxu1 %v11366_v40  ;;  %v1108_v60 = vmax.f32 %v1066_v53, 0.0  ;;  %v1069_v8 = vadd.f32 %v11548_v29, %v9112_v54  ;;  %v10385_v47 = vld [vmem:[%s13089_s3 + $0xf0] sm:$0xff]   ;;  %v10389_v53 = vld [vmem:[%s13089_s3 + $0xf8] sm:$0xff]   ;;  %v10764_v54 = vld [vmem:[#allocation2 + $0x40] sm:$0xff] }
 0x16e   :  { %9343 = vmatprep.subr.bf16.mxu0 %v10361_v35  ;;  %9377 = vmatprep.subr.bf16.mxu1 %v10363_v45  ;;  %v556_v61 = vmax.f32 %v516_v57, 0.0  ;;  %v9001_v62 = vpop.f32.mrb[60].mxu0  ;;  %v10382_v45 = vld [vmem:[%s13089_s3 + $0xa8] sm:$0xff]   ;;  %v10386_v48 = vld [vmem:[%s13089_s3 + $0xb0] sm:$0xff]   ;;  %v10411_v20 = vld [vmem:[%s13089_s3 + $0x1f8] sm:$0xff]  }
 0x16f   :  { %2450 = vmatmul.mubr.bf16.vlgmr.msra.gmra.mrb[88].mxu0 %v11430_v38  ;;  %v9002_v52 = vpop.f32.mrb[61].mxu0  ;;  %v1109_v40 = vmax.f32 %v1069_v8, 0.0  ;;  %v9113_v0 = vpop.f32.mrb[60].mxu1  ;;  %v10369_v38 = vld [vmem:[%s13089_s3 + $0xd0] sm:$0xff]  }
 0x170   :  { %2457 = vmatprep.mubr.bf16.mxu0 %v2287_v49  ;;  %9344 = vmatpush3.bf16.msra.mxu0 %v10362_v1  ;;  %v573_v2 = vpack.c.bf16 %v556_v61, %v555_v56  ;;  %v9003_v3 = vadd.f32 %v9002_v52, %v9001_v62  ;;  %v9004_v5 = vpop.f32.mrb[62].mxu0  ;;  %v9114_v6 = vpop.f32.mrb[61].mxu1  ;;  %v10383_v1 = vld [vmem:[%s13089_s3 + $0x1c0] sm:$0xff]   ;;  %v10387_v49 = vld [vmem:[%s13089_s3 + $0x1c8] sm:$0xff]   ;;  %v10391_v57 = vld [vmem:[%s13089_s3 + $0x1d0] sm:$0xff]  }
 0x171   :  { %9378 = vmatpush3.bf16.msra.mxu1 %v10364_v50  ;;  %9345 = vmatprep.subr.bf16.mxu0 %v10365_v55  ;;  %v1126_v9 = vpack.c.bf16 %v1109_v40, %v1108_v60  ;;  %v9005_v10 = vpop.f32.mrb[63].mxu0  ;;  %v9115_v11 = vadd.f32 %v9114_v6, %v9113_v0  ;;  %v9116_v12 = vpop.f32.mrb[62].mxu1  ;;  %v10388_v50 = vld [vmem:[%s13089_s3 + $0x188] sm:$0xff]   ;;  %v2698_v55 = vld [vmem:[#allocation2 + $0x58] sm:$0xf]  ;;  %v10392_v8 = vld [vmem:[%s13089_s3 + $0x190] sm:$0xff]  }
 0x172   :  { %9379 = vmatprep.subr.bf16.mxu1 %v10367_v58  ;;  %589 = vst [vmem:[#allocation2 + $0xe0] sm:$0xff] %v573_v2  ;;  %v521_v16 = vadd.f32 %v11548_v29, %v9003_v3  ;;  %v9006_v17 = vadd.f32 %v9005_v10, %v9004_v5  ;;  %v9117_v4 = vpop.f32.mrb[63].mxu1  ;;  %v3253_v56 = vld [vmem:[#allocation2 + $0x68] sm:$0xf0]  ;;  %v2731_v58 = vld [vmem:[#allocation2 + $0x40] sm:$0xf0] }
 0x173   :  { %1142 = vst [vmem:[#allocation2 + $0xe8] sm:$0xff] %v1126_v9  ;;  %v1074_v21 = vadd.f32 %v11548_v29, %v9115_v11  ;;  %v9118_v23 = vadd.f32 %v9117_v4, %v9116_v12  ;;  %v10390_v60 = vld [vmem:[%s13089_s3 + $0xb8] sm:$0xff]   ;;  %v3295_v33 = vrot.slane %v3253_v56, 4  ;;  %v10393_v61 = vld [vmem:[%s13089_s3 + $0x140] sm:$0xff]   ;;  %v2771_v62 = vrot.slane %v2731_v58, 4  ;;  %v10397_v3 = vld [vmem:[%s13089_s3 + $0x148] sm:$0xff]  }
 0x174   :  { %9346 = vmatpush3.bf16.msra.mxu0 %v10366_v63  ;;  %v557_v14 = vmax.f32 %v521_v16, 0.0  ;;  %v524_v27 = vadd.f32 %v11548_v29, %v9006_v17  ;;  %v10394_v63 = vld [vmem:[%s13089_s3 + $0x100] sm:$0xff]   ;;  %v10395_v52 = vld [vmem:[%s13089_s3 + $0x1d8] sm:$0xff]   ;;  %v2697_v40 = vld [vmem:[#allocation2 + $0x50] sm:$0xf] }
 0x175   :  { %9380 = vmatpush3.bf16.msra.mxu1 %v10368_v7  ;;  %9347 = vmatprep.subr.bf16.mxu0 %v10369_v38  ;;  %v1110_v59 = vmax.f32 %v1074_v21, 0.0  ;;  %v1077_v22 = vadd.f32 %v11548_v29, %v9118_v23  ;;  %v10376_v29 = vld [vmem:[%s13089_s3 + $0x30] sm:$0xff]   ;;  %v3297_v0 = vsel %vm1221_vm0, %v3295_v33, %v11534_v15  ;;  %v10396_v2 = vld [vmem:[%s13089_s3 + $0x198] sm:$0xff]   ;;  %v2773_v5 = vsel %vm1221_vm0, %v2771_v62, %v11493_v32  ;;  %v10399_v6 = vld [vmem:[%s13089_s3 + $0x1e0] sm:$0xff]  }
 0x176   :  { %9381 = vmatprep.subr.bf16.mxu1 %v10371_v13  ;;  %v558_v31 = vmax.f32 %v524_v27, 0.0  ;;  %v10398_v7 = vld [vmem:[%s13089_s3 + $0x108] sm:$0xff]   ;;  %v10400_v38 = vld [vmem:[%s13089_s3 + $0x1a0] sm:$0xff]   ;;  %v10401_v9 = vld [vmem:[%s13089_s3 + $0x150] sm:$0xff]  }
 0x177   :  { %2458 = vmatmul.mubr.bf16.gmra.mrb[92].mxu0 %v2286_v24  ;;  %v1111_v35 = vmax.f32 %v1077_v22, 0.0  ;;  %v10403_v10 = vld [vmem:[%s13089_s3 + $0x1e8] sm:$0xff]   ;;  %v10405_v12 = vld [vmem:[%s13089_s3 + $0x158] sm:$0xff]   ;;  %v10407_v13 = vld [vmem:[%s13089_s3 + $0x1f0] sm:$0xff]  }
 0x178   :  { %9348 = vmatpush3.bf16.msra.mxu0 %v10370_v19  ;;  %2909 = vmatprep.mubr.bf16.mxu0 %v2776_v34  ;;  %v574_v37 = vpack.c.bf16 %v558_v31, %v557_v14  ;;  %v10404_v11 = vld [vmem:[%s13089_s3 + $0x1a8] sm:$0xff]   ;;  %v10406_v16 = vld [vmem:[%s13089_s3 + $0x118] sm:$0xff]   ;;  %v10408_v4 = vld [vmem:[%s13089_s3 + $0x1b0] sm:$0xff]  }
 0x179   :  { %9382 = vmatpush3.bf16.msra.mxu1 %v10372_v25  ;;  %9349 = vmatprep.subr.bf16.mxu0 %v10373_v28  ;;  %v1127_v41 = vpack.c.bf16 %v1111_v35, %v1110_v59  ;;  %v10765_v17 = vld [vmem:[#allocation2 + $0x68] sm:$0xff]  ;;  %v10409_v19 = vld [vmem:[%s13089_s3 + $0x160] sm:$0xff]   ;;  %v10412_v21 = vld [vmem:[%s13089_s3 + $0x1b8] sm:$0xff]  }
 0x17a   :  { %9383 = vmatprep.subr.bf16.mxu1 %v10375_v30  ;;  %590 = vst [vmem:[#allocation2 + $0xf0] sm:$0xff] %v574_v37  ;;  %v3252_v23 = vld [vmem:[#allocation2 + $0x60] sm:$0xf0]  ;;  %v10413_v24 = vld [vmem:[%s13089_s3 + $0x168] sm:$0xff]   ;;  %v10417_v59 = vld [vmem:[%s13089_s3 + $0x170] sm:$0xff]  }
 0x17b   :  { %1143 = vst [vmem:[#allocation2 + $0xf8] sm:$0xff] %v1127_v41  ;;  %v10415_v25 = vld [vmem:[%s13089_s3 + $0x2c0] sm:$0xff]   ;;  %v10414_v14 = vld [vmem:[%s13089_s3 + $0x128] sm:$0xff]   ;;  %v3292_v27 = vrot.slane %v3252_v23, 4  ;;  %v10418_v22 = vld [vmem:[%s13089_s3 + $0x130] sm:$0xff]  }
 0x17c   :  { %9350 = vmatpush3.bf16.msra.mxu0 %v10374_v36  ;;  %v10416_v28 = vld [vmem:[%s13089_s3 + $0x280] sm:$0xff]   ;;  %v10419_v30 = vld [vmem:[%s13089_s3 + $0x2c8] sm:$0xff]   ;;  %v10421_v36 = vld [vmem:[%s13089_s3 + $0x178] sm:$0xff]  }
 0x17d   :  { %9384 = vmatpush3.bf16.msra.mxu1 %v10376_v29  ;;  %9351 = vmatprep.subr.bf16.mxu0 %v10377_v39  ;;  %v3294_v31 = vsel %vm1221_vm0, %v3292_v27, %v11624_v51  ;;  %v10420_v34 = vld [vmem:[%s13089_s3 + $0x288] sm:$0xff]   ;;  %v10422_v29 = vld [vmem:[%s13089_s3 + $0x138] sm:$0xff]   ;;  %v10423_v37 = vld [vmem:[%s13089_s3 + $0x2d0] sm:$0xff]  }
 0x17e   :  { %9385 = vmatprep.subr.bf16.mxu1 %v10379_v44  ;;  %v3633_v35 = vld [vmem:[#allocation2 + $0x88] sm:$0xf0]  ;;  %v11878_v41 = vld [vmem:[#allocation2 + $0x98] sm:$0xff]  ;;  %v10424_v44 = vld [vmem:[%s13089_s3 + $0x290] sm:$0xff]  }
 0x17f   :  { %v3675_v39 = vrot.slane %v3633_v35, 4  ;;  %v10436_v56 = vld [vmem:[%s13089_s3 + $0x2a8] sm:$0xff]   ;;  %v3071_v58 = vld [vmem:[#allocation2 + $0x70] sm:$0xf]  ;;  %v10441_v62 = vld [vmem:[%s13089_s3 + $0x260] sm:$0xff]  }
 0x180   :  { %9352 = vmatpush3.bf16.msra.mxu0 %v10378_v42  ;;  %v10425_v42 = vld [vmem:[%s13089_s3 + $0x240] sm:$0xff]   ;;  %v10767_v33 = vld [vmem:[#allocation2 + $0x88] sm:$0xff] }
 0x181   :  { %9386 = vmatpush3.bf16.msra.mxu1 %v10380_v26  ;;  %9353 = vmatprep.subr.bf16.mxu0 %v10381_v43  ;;  %v10426_v26 = vld [vmem:[%s13089_s3 + $0x200] sm:$0xff]   ;;  %v10427_v43 = vld [vmem:[%s13089_s3 + $0x2d8] sm:$0xff]  }
 0x182   :  { %9427 = vmatprep.subr.bf16.mxu1 %v10383_v1  ;;  %v10428_v1 = vld [vmem:[%s13089_s3 + $0x298] sm:$0xff]   ;;  %v10458_v27 = vld [vmem:[%s13089_s3 + $0x300] sm:$0xff]  }
 0x183   :  { %v10464_v35 = vld [vmem:[%s13089_s3 + $0x3a0] sm:$0xff]  }
 0x184   :  { %9354 = vmatpush3.bf16.msra.mxu0 %v10382_v45  ;;  %3054 = vmatmul.mubr.bf16.vlgmr.msra.gmra.mrb[96].mxu1 %v10764_v54  ;;  %v10435_v54 = vld [vmem:[%s13089_s3 + $0x2e8] sm:$0xff]  }
 0x185   :  { %3061 = vmatprep.mubr.bf16.mxu1 %v2698_v55  ;;  %9428 = vmatpush3.bf16.msra.mxu1 %v10384_v46  ;;  %v10429_v46 = vld [vmem:[%s13089_s3 + $0x248] sm:$0xff]   ;;  %v10434_v55 = vld [vmem:[%s13089_s3 + $0x210] sm:$0xff]  }
 0x186   :  { %9355 = vmatprep.subr.bf16.mxu0 %v10385_v47  ;;  %9429 = vmatprep.subr.bf16.mxu1 %v10387_v49  ;;  %v10431_v47 = vld [vmem:[%s13089_s3 + $0x2e0] sm:$0xff]   ;;  %v10430_v49 = vld [vmem:[%s13089_s3 + $0x208] sm:$0xff]  }
 0x188   :  { %9356 = vmatpush3.bf16.msra.mxu0 %v10386_v48  ;;  %v3069_v48 = vld [vmem:[#allocation2 + $0x60] sm:$0xff] }
 0x189   :  { %9430 = vmatpush3.bf16.msra.mxu1 %v10388_v50  ;;  %9357 = vmatprep.subr.bf16.mxu0 %v10389_v53  ;;  %v3072_v50 = vld [vmem:[#allocation2 + $0x78] sm:$0xf]  ;;  %v10433_v53 = vld [vmem:[%s13089_s3 + $0x250] sm:$0xff]  }
 0x18a   :  { %9431 = vmatprep.subr.bf16.mxu1 %v10391_v57  ;;  %v10437_v57 = vld [vmem:[%s13089_s3 + $0x258] sm:$0xff]  }
 0x18c   :  { %9358 = vmatpush3.bf16.msra.mxu0 %v10390_v60  ;;  %3062 = vmatmul.mubr.bf16.gmra.mrb[100].mxu1 %v2697_v40  ;;  %v10439_v60 = vld [vmem:[%s13089_s3 + $0x2f0] sm:$0xff]   ;;  %v10444_v40 = vld [vmem:[%s13089_s3 + $0x2b8] sm:$0xff]  }
 0x18d   :  { %9432 = vmatpush3.bf16.msra.mxu1 %v10392_v8  ;;  %3430 = vmatprep.mubr.bf16.mxu1 %v3297_v0  ;;  %v10438_v8 = vld [vmem:[%s13089_s3 + $0x218] sm:$0xff]   ;;  %v3632_v0 = vld [vmem:[#allocation2 + $0x80] sm:$0xf0] }
 0x18e   :  { %9399 = vmatprep.subr.bf16.mxu0 %v10393_v61  ;;  %9433 = vmatprep.subr.bf16.mxu1 %v10395_v52  ;;  %v10440_v61 = vld [vmem:[%s13089_s3 + $0x2b0] sm:$0xff]   ;;  %v10443_v52 = vld [vmem:[%s13089_s3 + $0x2f8] sm:$0xff]  }
 0x18f   :  { %2910 = vmatmul.mubr.bf16.vlgmr.msra.gmra.mrb[96].mxu0 %v2773_v5  ;;  %v10447_v5 = vld [vmem:[%s13089_s3 + $0x3c0] sm:$0xff]  }
 0x190   :  { %2917 = vmatprep.mubr.bf16.mxu0 %v11405_v18  ;;  %9400 = vmatpush3.bf16.msra.mxu0 %v10394_v63  ;;  %v10402_v18 = vld [vmem:[%s13089_s3 + $0x110] sm:$0xff]   ;;  %v10442_v63 = vld [vmem:[%s13089_s3 + $0x220] sm:$0xff]  }
 0x191   :  { %9434 = vmatpush3.bf16.msra.mxu1 %v10396_v2  ;;  %9401 = vmatprep.subr.bf16.mxu0 %v10397_v3  ;;  %v10445_v2 = vld [vmem:[%s13089_s3 + $0x268] sm:$0xff]  }
 0x192   :  { %9435 = vmatprep.subr.bf16.mxu1 %v10399_v6  ;;  %v10446_v3 = vld [vmem:[%s13089_s3 + $0x228] sm:$0xff]   ;;  %v3672_v6 = vrot.slane %v3632_v0, 4 }
 0x194   :  { %9402 = vmatpush3.bf16.msra.mxu0 %v10398_v7  ;;  %v10768_v7 = vld [vmem:[#allocation2 + $0x90] sm:$0xff] }
 0x195   :  { %9436 = vmatpush3.bf16.msra.mxu1 %v10400_v38  ;;  %9403 = vmatprep.subr.bf16.mxu0 %v10401_v9  ;;  %v3673_v38 = vrot.slane %v10768_v7, 4  ;;  %v10448_v9 = vld [vmem:[%s13089_s3 + $0x380] sm:$0xff]  }
 0x196   :  { %9437 = vmatprep.subr.bf16.mxu1 %v10403_v10  ;;  %v10449_v10 = vld [vmem:[%s13089_s3 + $0x270] sm:$0xff]  }
 0x197   :  { %2918 = vmatmul.mubr.bf16.gmra.mrb[100].mxu0 %v11493_v32  ;;  %v10410_v32 = vld [vmem:[%s13089_s3 + $0x120] sm:$0xff]  }
 0x198   :  { %9404 = vmatpush3.bf16.msra.mxu0 %v10402_v18  ;;  %3233 = vmatprep.mubr.bf16.mxu0 %v10765_v17  ;;  %v10450_v18 = vld [vmem:[%s13089_s3 + $0x230] sm:$0xff]   ;;  %v4013_v17 = vld [vmem:[#allocation2 + $0xa8] sm:$0xf0] }
 0x199   :  { %9438 = vmatpush3.bf16.msra.mxu1 %v10404_v11  ;;  %9405 = vmatprep.subr.bf16.mxu0 %v10405_v12  ;;  %v10451_v11 = vld [vmem:[%s13089_s3 + $0x3c8] sm:$0xff]   ;;  %v3674_v12 = vsel %vm1221_vm0, %v3672_v6, %v3673_v38 }
 0x19a   :  { %9439 = vmatprep.subr.bf16.mxu1 %v10407_v13  ;;  %v10452_v13 = vld [vmem:[%s13089_s3 + $0x388] sm:$0xff]  }
 0x19b   :  { %v10484_v6 = vld [vmem:[%s13089_s3 + $0x8] sm:$0xff]  }
 0x19c   :  { %9406 = vmatpush3.bf16.msra.mxu0 %v10406_v16  ;;  %v10453_v16 = vld [vmem:[%s13089_s3 + $0x278] sm:$0xff]  }
 0x19d   :  { %9440 = vmatpush3.bf16.msra.mxu1 %v10408_v4  ;;  %9407 = vmatprep.subr.bf16.mxu0 %v10409_v19  ;;  %v10454_v4 = vld [vmem:[%s13089_s3 + $0x238] sm:$0xff]   ;;  %v10455_v19 = vld [vmem:[%s13089_s3 + $0x3d0] sm:$0xff]  }
 0x19e   :  { %9441 = vmatprep.subr.bf16.mxu1 %v10411_v20  ;;  %v4055_v20 = vrot.slane %v4013_v17, 4  ;;  %v10488_v17 = vld [vmem:[%s13089_s3 + $0x10] sm:$0xff]  }
 0x1a0   :  { %9408 = vmatpush3.bf16.msra.mxu0 %v10410_v32  ;;  %v10456_v32 = vld [vmem:[%s13089_s3 + $0x390] sm:$0xff]  }
 0x1a1   :  { %9442 = vmatpush3.bf16.msra.mxu1 %v10412_v21  ;;  %9409 = vmatprep.subr.bf16.mxu0 %v10413_v24  ;;  %v11987_v21 = vld [vmem:[#allocation2 + $0xb8] sm:$0xff]  ;;  %v10457_v24 = vld [vmem:[%s13089_s3 + $0x340] sm:$0xff]  }
 0x1a2   :  { %9483 = vmatprep.subr.bf16.mxu1 %v10415_v25  ;;  %v4056_v23 = vrot.slane %v11987_v21, 4  ;;  %v10459_v25 = vld [vmem:[%s13089_s3 + $0x3d8] sm:$0xff]  }
 0x1a4   :  { %9410 = vmatpush3.bf16.msra.mxu0 %v10414_v14  ;;  %3431 = vmatmul.mubr.bf16.vlgmr.msra.gmra.mrb[104].mxu1 %v3294_v31  ;;  %v4057_v14 = vsel %vm1221_vm0, %v4055_v20, %v4056_v23  ;;  %v10770_v31 = vld [vmem:[#allocation2 + $0x80] sm:$0xff] }
 0x1a5   :  { %3438 = vmatprep.mubr.bf16.mxu1 %v11534_v15  ;;  %9484 = vmatpush3.bf16.msra.mxu1 %v10416_v28  ;;  %v3676_v15 = vrot.slane %v11878_v41, 4  ;;  %v10460_v28 = vld [vmem:[%s13089_s3 + $0x398] sm:$0xff]   ;;  %v10468_v41 = vld [vmem:[%s13089_s3 + $0x3a8] sm:$0xff]  }
 0x1a6   :  { %9411 = vmatprep.subr.bf16.mxu0 %v10417_v59  ;;  %9485 = vmatprep.subr.bf16.mxu1 %v10419_v30  ;;  %v10461_v59 = vld [vmem:[%s13089_s3 + $0x348] sm:$0xff]   ;;  %v10463_v30 = vld [vmem:[%s13089_s3 + $0x3e0] sm:$0xff]  }
 0x1a7   :  { %v3677_v45 = vsel %vm1221_vm0, %v3675_v39, %v3676_v15  ;;  %v3451_v39 = vld [vmem:[#allocation2 + $0x90] sm:$0xf] }
 0x1a8   :  { %9412 = vmatpush3.bf16.msra.mxu0 %v10418_v22  ;;  %v10462_v22 = vld [vmem:[%s13089_s3 + $0x308] sm:$0xff]  }
 0x1a9   :  { %9486 = vmatpush3.bf16.msra.mxu1 %v10420_v34  ;;  %9413 = vmatprep.subr.bf16.mxu0 %v10421_v36  ;;  %v3452_v34 = vld [vmem:[#allocation2 + $0x98] sm:$0xf]  ;;  %v10465_v36 = vld [vmem:[%s13089_s3 + $0x350] sm:$0xff]  }
 0x1aa   :  { %9487 = vmatprep.subr.bf16.mxu1 %v10423_v37  ;;  %v10466_v37 = vld [vmem:[%s13089_s3 + $0x310] sm:$0xff]  }
 0x1ac   :  { %9414 = vmatpush3.bf16.msra.mxu0 %v10422_v29  ;;  %3439 = vmatmul.mubr.bf16.gmra.mrb[108].mxu1 %v11624_v51  ;;  %v10432_v51 = vld [vmem:[%s13089_s3 + $0x2a0] sm:$0xff]   ;;  %v10467_v29 = vld [vmem:[%s13089_s3 + $0x3e8] sm:$0xff]  }
 0x1ad   :  { %9488 = vmatpush3.bf16.msra.mxu1 %v10424_v44  ;;  %9455 = vmatprep.subr.bf16.mxu0 %v10425_v42  ;;  %v10471_v44 = vld [vmem:[%s13089_s3 + $0x3f0] sm:$0xff]  }
 0x1ae   :  { %9489 = vmatprep.subr.bf16.mxu1 %v10427_v43  ;;  %3810 = vmatprep.mubr.bf16.mxu1 %v3677_v45 }
 0x1af   :  { %3234 = vmatmul.mubr.bf16.vlgmr.msra.gmra.mrb[104].mxu0 %v3069_v48  ;;  %v10473_v48 = vld [vmem:[%s13089_s3 + $0x360] sm:$0xff]  }
 0x1b0   :  { %3241 = vmatprep.mubr.bf16.mxu0 %v3072_v50  ;;  %9456 = vmatpush3.bf16.msra.mxu0 %v10426_v26  ;;  %v10771_v26 = vld [vmem:[#allocation2 + $0xa8] sm:$0xff]  ;;  %v10474_v50 = vld [vmem:[%s13089_s3 + $0x320] sm:$0xff]  }
 0x1b1   :  { %9490 = vmatpush3.bf16.msra.mxu1 %v10428_v1  ;;  %9457 = vmatprep.subr.bf16.mxu0 %v10429_v46  ;;  %v10470_v1 = vld [vmem:[%s13089_s3 + $0x318] sm:$0xff]  }
 0x1b2   :  { %9491 = vmatprep.subr.bf16.mxu1 %v10431_v47  ;;  %v10472_v47 = vld [vmem:[%s13089_s3 + $0x3b0] sm:$0xff]  }
 0x1b4   :  { %9458 = vmatpush3.bf16.msra.mxu0 %v10430_v49 }
 0x1b5   :  { %9492 = vmatpush3.bf16.msra.mxu1 %v10432_v51  ;;  %9459 = vmatprep.subr.bf16.mxu0 %v10433_v53  ;;  %v10475_v51 = vld [vmem:[%s13089_s3 + $0x3f8] sm:$0xff]  }
 0x1b6   :  { %9493 = vmatprep.subr.bf16.mxu1 %v10435_v54  ;;  %v10476_v54 = vld [vmem:[%s13089_s3 + $0x3b8] sm:$0xff]  }
 0x1b7   :  { %3242 = vmatmul.mubr.bf16.gmra.mrb[108].mxu0 %v3071_v58 }
 0x1b8   :  { %9460 = vmatpush3.bf16.msra.mxu0 %v10434_v55  ;;  %3613 = vmatprep.mubr.bf16.mxu0 %v10767_v33  ;;  %v4012_v55 = vld [vmem:[#allocation2 + $0xa0] sm:$0xf0]  ;;  %v10478_v33 = vld [vmem:[%s13089_s3 + $0x328] sm:$0xff]  }
 0x1b9   :  { %9494 = vmatpush3.bf16.msra.mxu1 %v10436_v56  ;;  %9461 = vmatprep.subr.bf16.mxu0 %v10437_v57  ;;  %v10477_v56 = vld [vmem:[%s13089_s3 + $0x368] sm:$0xff]   ;;  %v10479_v57 = vld [vmem:[%s13089_s3 + $0x40] sm:$0xff]   ;;  %v4052_v58 = vrot.slane %v4012_v55, 4 }
 0x1ba   :  { %9495 = vmatprep.subr.bf16.mxu1 %v10439_v60  ;;  %v10772_v60 = vld [vmem:[#allocation2 + $0xb0] sm:$0xff] }
 0x1bc   :  { %9462 = vmatpush3.bf16.msra.mxu0 %v10438_v8  ;;  %v4053_v8 = vrot.slane %v10772_v60, 4 }
 0x1bd   :  { %9496 = vmatpush3.bf16.msra.mxu1 %v10440_v61  ;;  %9463 = vmatprep.subr.bf16.mxu0 %v10441_v62  ;;  %v10480_v61 = vld [vmem:[%s13089_s3] sm:$0xff]  }
 0x1be   :  { %9497 = vmatprep.subr.bf16.mxu1 %v10443_v52  ;;  %v10483_v52 = vld [vmem:[%s13089_s3 + $0x48] sm:$0xff]   ;;  %v4054_v0 = vsel %vm1221_vm0, %v4052_v58, %v4053_v8  ;;  %v10507_v58 = vld [vmem:[%s13089_s3 + $0x78] sm:$0xff]  }
 0x1c0   :  { %9464 = vmatpush3.bf16.msra.mxu0 %v10442_v63  ;;  %v10481_v63 = vld [vmem:[%s13089_s3 + $0x370] sm:$0xff]  }
 0x1c1   :  { %9498 = vmatpush3.bf16.msra.mxu1 %v10444_v40  ;;  %9465 = vmatprep.subr.bf16.mxu0 %v10445_v2  ;;  %v10482_v2 = vld [vmem:[%s13089_s3 + $0x330] sm:$0xff]  }
 0x1c2   :  { %9539 = vmatprep.subr.bf16.mxu1 %v10447_v5 }
 0x1c4   :  { %9466 = vmatpush3.bf16.msra.mxu0 %v10446_v3  ;;  %3811 = vmatmul.mubr.bf16.vlgmr.msra.gmra.mrb[112].mxu1 %v3674_v12  ;;  %v10486_v12 = vld [vmem:[%s13089_s3 + $0x338] sm:$0xff]  }
 0x1c5   :  { %3818 = vmatprep.mubr.bf16.mxu1 %v3676_v15  ;;  %9540 = vmatpush3.bf16.msra.mxu1 %v10448_v9  ;;  %v10469_v15 = vld [vmem:[%s13089_s3 + $0x358] sm:$0xff]  }
 0x1c6   :  { %9467 = vmatprep.subr.bf16.mxu0 %v10449_v10  ;;  %9541 = vmatprep.subr.bf16.mxu1 %v10451_v11 }
 0x1c8   :  { %9468 = vmatpush3.bf16.msra.mxu0 %v10450_v18  ;;  %v10487_v18 = vld [vmem:[%s13089_s3 + $0x50] sm:$0xff]  }
 0x1c9   :  { %9542 = vmatpush3.bf16.msra.mxu1 %v10452_v13  ;;  %9469 = vmatprep.subr.bf16.mxu0 %v10453_v16 }
 0x1ca   :  { %9543 = vmatprep.subr.bf16.mxu1 %v10455_v19 }
 0x1cc   :  { %9470 = vmatpush3.bf16.msra.mxu0 %v10454_v4  ;;  %3819 = vmatmul.mubr.bf16.gmra.mrb[116].mxu1 %v3673_v38  ;;  %v10485_v38 = vld [vmem:[%s13089_s3 + $0x378] sm:$0xff]  }
 0x1cd   :  { %9544 = vmatpush3.bf16.msra.mxu1 %v10456_v32  ;;  %4190 = vmatprep.mubr.bf16.mxu1 %v4057_v14  ;;  %v10489_v32 = vld [vmem:[%s13089_s3 + $0xc0] sm:$0xff]  }
 0x1ce   :  { %9511 = vmatprep.subr.bf16.mxu0 %v10457_v24  ;;  %9545 = vmatprep.subr.bf16.mxu1 %v10459_v25  ;;  %v10490_v24 = vld [vmem:[%s13089_s3 + $0x80] sm:$0xff]   ;;  %v10491_v25 = vld [vmem:[%s13089_s3 + $0x58] sm:$0xff]  }
 0x1cf   :  { %3614 = vmatmul.mubr.bf16.vlgmr.msra.gmra.mrb[112].mxu0 %v10770_v31  ;;  %v3832_v31 = vld [vmem:[#allocation2 + $0xb8] sm:$0xf] }
 0x1d0   :  { %3621 = vmatprep.mubr.bf16.mxu0 %v3452_v34  ;;  %9512 = vmatpush3.bf16.msra.mxu0 %v10458_v27  ;;  %v10492_v27 = vld [vmem:[%s13089_s3 + $0x18] sm:$0xff]   ;;  %v10495_v34 = vld [vmem:[%s13089_s3 + $0x60] sm:$0xff]  }
 0x1d1   :  { %9546 = vmatpush3.bf16.msra.mxu1 %v10460_v28  ;;  %9513 = vmatprep.subr.bf16.mxu0 %v10461_v59 }
 0x1d2   :  { %9547 = vmatprep.subr.bf16.mxu1 %v10463_v30 }
 0x1d4   :  { %9514 = vmatpush3.bf16.msra.mxu0 %v10462_v22  ;;  %v10493_v22 = vld [vmem:[%s13089_s3 + $0xc8] sm:$0xff]  }
 0x1d5   :  { %9548 = vmatpush3.bf16.msra.mxu1 %v10464_v35  ;;  %9515 = vmatprep.subr.bf16.mxu0 %v10465_v36  ;;  %v12114_v35 = vld [vmem:[#allocation2 + $0x98] sm:$0xff] }
 0x1d6   :  { %9549 = vmatprep.subr.bf16.mxu1 %v10467_v29  ;;  %v10773_v29 = vld [vmem:[#allocation2 + $0xa0] sm:$0xff] }
 0x1d7   :  { %3622 = vmatmul.mubr.bf16.gmra.mrb[116].mxu0 %v3451_v39  ;;  %v9163_v42 = vpop.f32.mrb[64].mxu1  ;;  %v10496_v39 = vld [vmem:[%s13089_s3 + $0x20] sm:$0xff]  }
 0x1d8   :  { %9516 = vmatpush3.bf16.msra.mxu0 %v10466_v37  ;;  %3993 = vmatprep.mubr.bf16.mxu0 %v10771_v26  ;;  %v9164_v43 = vpop.f32.mrb[65].mxu1  ;;  %v10494_v37 = vld [vmem:[%s13089_s3 + $0x88] sm:$0xff]   ;;  %v10498_v26 = vld [vmem:[%s13089_s3 + $0x90] sm:$0xff]  }
 0x1d9   :  { %v9165_v45 = vadd.f32 %v9164_v43, %v9163_v42  ;;  %9550 = vmatpush3.bf16.msra.mxu1 %v10468_v41  ;;  %v9166_v46 = vpop.f32.mrb[66].mxu1  ;;  %9517 = vmatprep.subr.bf16.mxu0 %v10469_v15  ;;  %v4275_v41 = vld [vmem:[#allocation2 + $0x88] sm:$0xf0]  ;;  %v10497_v15 = vld [vmem:[%s13089_s3 + $0xd0] sm:$0xff]  }
 0x1da   :  { %v9167_v49 = vpop.f32.mrb[67].mxu1  ;;  %9551 = vmatprep.subr.bf16.mxu1 %v10471_v44  ;;  %v4318_v44 = vrot.slane %v12114_v35, 4  ;;  %v10499_v42 = vld [vmem:[%s13089_s3 + $0x68] sm:$0xff]   ;;  %v4317_v43 = vrot.slane %v4275_v41, 4 }
 0x1db   :  { %v9168_v53 = vadd.f32 %v9167_v49, %v9166_v46  ;;  %v10501_v46 = vld [vmem:[%s13089_s3 + $0xd8] sm:$0xff]   ;;  %v10532_v35 = vld [vmem:[%s13089_s3 + $0x1a8] sm:$0xff]  }
 0x1dc   :  { %9518 = vmatpush3.bf16.msra.mxu0 %v10470_v1  ;;  %v3831_v1 = vld [vmem:[#allocation2 + $0xb0] sm:$0xf]  ;;  %v4319_v49 = vsel %vm1221_vm0, %v4317_v43, %v4318_v44 }
 0x1dd   :  { %9552 = vmatpush3.bf16.msra.mxu1 %v10472_v47  ;;  %9519 = vmatprep.subr.bf16.mxu0 %v10473_v48  ;;  %v10503_v47 = vld [vmem:[%s13089_s3 + $0x70] sm:$0xff]  }
 0x1de   :  { %9553 = vmatprep.subr.bf16.mxu1 %v10475_v51  ;;  %v10502_v51 = vld [vmem:[%s13089_s3 + $0x98] sm:$0xff]  }
 0x1e0   :  { %9520 = vmatpush3.bf16.msra.mxu0 %v10474_v50 }
 0x1e1   :  { %9554 = vmatpush3.bf16.msra.mxu1 %v10476_v54  ;;  %9521 = vmatprep.subr.bf16.mxu0 %v10477_v56  ;;  %v10505_v56 = vld [vmem:[%s13089_s3 + $0xe0] sm:$0xff]  }
 0x1e2   :  { %v9135_v62 = vpop.f32.mrb[64].mxu0  ;;  %9595 = vmatprep.subr.bf16.mxu1 %v10479_v57 }
 0x1e3   :  { %v9136_v40 = vpop.f32.mrb[65].mxu0 }
 0x1e4   :  { %v9137_v3 = vadd.f32 %v9136_v40, %v9135_v62  ;;  %9522 = vmatpush3.bf16.msra.mxu0 %v10478_v33  ;;  %4191 = vmatmul.mubr.bf16.vlgmr.msra.gmra.mrb[120].mxu1 %v4054_v0  ;;  %v9138_v5 = vpop.f32.mrb[66].mxu0  ;;  %v10508_v33 = vld [vmem:[%s13089_s3 + $0x38] sm:$0xff]   ;;  %v10510_v62 = vld [vmem:[%s13089_s3 + $0xa8] sm:$0xff]   ;;  %v10512_v40 = vld [vmem:[%s13089_s3 + $0x180] sm:$0xff]  }
 0x1e5   :  { %4198 = vmatprep.mubr.bf16.mxu1 %v4056_v23  ;;  %9596 = vmatpush3.bf16.msra.mxu1 %v10480_v61  ;;  %v9139_v7 = vpop.f32.mrb[67].mxu0  ;;  %v4239_v23 = vld [vmem:[#allocation2 + $0x88] sm:$0xff] }
 0x1e6   :  { %v12083_v9 = vadd.f32 %v9165_v45, %v9137_v3  ;;  %v9140_v10 = vadd.f32 %v9139_v7, %v9138_v5  ;;  %9523 = vmatprep.subr.bf16.mxu0 %v10481_v63  ;;  %9597 = vmatprep.subr.bf16.mxu1 %v10483_v52  ;;  %v10500_v45 = vld [vmem:[%s13089_s3 + $0x28] sm:$0xff]   ;;  %v10511_v63 = vld [vmem:[%s13089_s3 + $0x1c0] sm:$0xff]  }
 0x1e7   :  { %v9169_v11 = vpop.f32.mrb[68].mxu1  ;;  %v10509_v61 = vld [vmem:[%s13089_s3 + $0xe8] sm:$0xff]  }
 0x1e8   :  { %v9170_v13 = vpop.f32.mrb[69].mxu1  ;;  %v12091_v16 = vadd.f32 %v9168_v53, %v9140_v10  ;;  %9524 = vmatpush3.bf16.msra.mxu0 %v10482_v2  ;;  %v10504_v53 = vld [vmem:[%s13089_s3 + $0x30] sm:$0xff]   ;;  %v10515_v7 = vld [vmem:[%s13089_s3 + $0x1c8] sm:$0xff]  }
 0x1e9   :  { %v9171_v4 = vadd.f32 %v9170_v13, %v9169_v11  ;;  %v9172_v19 = vpop.f32.mrb[70].mxu1  ;;  %9598 = vmatpush3.bf16.msra.mxu1 %v10484_v6  ;;  %9525 = vmatprep.subr.bf16.mxu0 %v10485_v38  ;;  %v10513_v2 = vld [vmem:[%s13089_s3 + $0xf0] sm:$0xff]   ;;  %v4238_v6 = vld [vmem:[#allocation2 + $0x80] sm:$0xff] }
 0x1ea   :  { %v9173_v20 = vpop.f32.mrb[71].mxu1  ;;  %v9141_v21 = vpop.f32.mrb[68].mxu0  ;;  %9599 = vmatprep.subr.bf16.mxu1 %v10487_v18  ;;  %v4241_v18 = vld [vmem:[#allocation2 + $0x98] sm:$0xf]  ;;  %v10514_v11 = vld [vmem:[%s13089_s3 + $0xb0] sm:$0xff]  }
 0x1eb   :  { %v9142_v14 = vpop.f32.mrb[69].mxu0  ;;  %v12193_v19 = vld [vmem:[#allocation2 + $0xb8] sm:$0xff] }
 0x1ec   :  { %v9143_v28 = vadd.f32 %v9142_v14, %v9141_v21  ;;  %9526 = vmatpush3.bf16.msra.mxu0 %v10486_v12  ;;  %4199 = vmatmul.mubr.bf16.gmra.mrb[124].mxu1 %v4053_v8  ;;  %v9144_v59 = vpop.f32.mrb[70].mxu0  ;;  %v10506_v8 = vld [vmem:[%s13089_s3 + $0xa0] sm:$0xff]   ;;  %v4796_v12 = vld [vmem:[#allocation2 + $0xa8] sm:$0xf0] }
 0x1ed   :  { %9600 = vmatpush3.bf16.msra.mxu1 %v10488_v17  ;;  %4596 = vmatprep.mubr.bf16.mxu1 %v4239_v23  ;;  %v9145_v30 = vpop.f32.mrb[71].mxu0  ;;  %v10516_v17 = vld [vmem:[%s13089_s3 + $0x188] sm:$0xff]   ;;  %v10519_v23 = vld [vmem:[%s13089_s3 + $0x1d0] sm:$0xff]   ;;  %v4838_v59 = vrot.slane %v4796_v12, 4  ;;  %v10543_v12 = vld [vmem:[%s13089_s3 + $0x2c0] sm:$0xff]  }
 0x1ee   :  { %v12116_v36 = vadd.f32 %v9171_v4, %v9143_v28  ;;  %9567 = vmatprep.subr.bf16.mxu0 %v10489_v32  ;;  %9601 = vmatprep.subr.bf16.mxu1 %v10491_v25  ;;  %v10517_v4 = vld [vmem:[%s13089_s3 + $0xf8] sm:$0xff]   ;;  %v4274_v32 = vld [vmem:[#allocation2 + $0x80] sm:$0xf0]  ;;  %v4276_v25 = vld [vmem:[#allocation2 + $0x90] sm:$0xff] }
 0x1ef   :  { %3994 = vmatmul.mubr.bf16.vlgmr.msra.gmra.mrb[120].mxu0 %v10773_v29  ;;  %v10518_v28 = vld [vmem:[%s13089_s3 + $0xb8] sm:$0xff]   ;;  %v10520_v30 = vld [vmem:[%s13089_s3 + $0x190] sm:$0xff]   ;;  %v4315_v29 = vrot.slane %v4276_v25, 4  ;;  %v5176_v25 = vld [vmem:[#allocation2 + $0xc8] sm:$0xf0] }
 0x1f0   :  { %4001 = vmatprep.mubr.bf16.mxu0 %v3832_v31  ;;  %9568 = vmatpush3.bf16.msra.mxu0 %v10490_v24 }
 0x1f1   :  { %9602 = vmatpush3.bf16.msra.mxu1 %v10492_v27  ;;  %9569 = vmatprep.subr.bf16.mxu0 %v10493_v22  ;;  %v4839_v22 = vrot.slane %v12193_v19, 4  ;;  %v10552_v19 = vld [vmem:[%s13089_s3 + $0x290] sm:$0xff]  }
 0x1f2   :  { %9603 = vmatprep.subr.bf16.mxu1 %v10495_v34  ;;  %v4314_v34 = vrot.slane %v4274_v32, 4 }
 0x1f4   :  { %9570 = vmatpush3.bf16.msra.mxu0 %v10494_v37 }
 0x1f5   :  { %9604 = vmatpush3.bf16.msra.mxu1 %v10496_v39  ;;  %9571 = vmatprep.subr.bf16.mxu0 %v10497_v15  ;;  %v4240_v39 = vld [vmem:[#allocation2 + $0x90] sm:$0xf]  ;;  %v10523_v15 = vld [vmem:[%s13089_s3 + $0x1d8] sm:$0xff]  }
 0x1f6   :  { %9605 = vmatprep.subr.bf16.mxu1 %v10499_v42 }
 0x1f7   :  { %v9219_v48 = vpop.f32.mrb[72].mxu1  ;;  %4002 = vmatmul.mubr.bf16.gmra.mrb[124].mxu0 %v3831_v1 }
 0x1f8   :  { %v9220_v50 = vpop.f32.mrb[73].mxu1  ;;  %9572 = vmatpush3.bf16.msra.mxu0 %v10498_v26  ;;  %4452 = vmatprep.mubr.bf16.mxu0 %v4319_v49  ;;  %v10522_v26 = vld [vmem:[%s13089_s3 + $0x100] sm:$0xff]  }
 0x1f9   :  { %v9221_v54 = vadd.f32 %v9220_v50, %v9219_v48  ;;  %v9222_v55 = vpop.f32.mrb[74].mxu1  ;;  %9606 = vmatpush3.bf16.msra.mxu1 %v10500_v45  ;;  %9573 = vmatprep.subr.bf16.mxu0 %v10501_v46  ;;  %v4840_v45 = vsel %vm1221_vm0, %v4838_v59, %v4839_v22  ;;  %v10524_v46 = vld [vmem:[%s13089_s3 + $0x198] sm:$0xff]   ;;  %v10525_v48 = vld [vmem:[%s13089_s3 + $0x148] sm:$0xff]   ;;  %v4316_v50 = vsel %vm1221_vm0, %v4314_v34, %v4315_v29 }
 0x1fa   :  { %v9223_v57 = vpop.f32.mrb[75].mxu1  ;;  %9607 = vmatprep.subr.bf16.mxu1 %v10503_v47 }
 0x1fb   :  { %v9224_v60 = vadd.f32 %v9223_v57, %v9222_v55  ;;  %v10530_v57 = vld [vmem:[%s13089_s3 + $0x110] sm:$0xff]  }
 0x1fc   :  { %9574 = vmatpush3.bf16.msra.mxu0 %v10502_v51  ;;  %v10526_v51 = vld [vmem:[%s13089_s3 + $0x108] sm:$0xff]  }
 0x1fd   :  { %9608 = vmatpush3.bf16.msra.mxu1 %v10504_v53  ;;  %9575 = vmatprep.subr.bf16.mxu0 %v10505_v56  ;;  %v10527_v53 = vld [vmem:[%s13089_s3 + $0x1e0] sm:$0xff]   ;;  %v10531_v56 = vld [vmem:[%s13089_s3 + $0x1e8] sm:$0xff]  }
 0x1fe   :  { %9609 = vmatprep.subr.bf16.mxu1 %v10507_v58  ;;  %v10535_v58 = vld [vmem:[%s13089_s3 + $0x1f0] sm:$0xff]  }
 0x1ff   :  { %v9225_v52 = vpop.f32.mrb[76].mxu1 }
 0x200   :  { %v9226_v0 = vpop.f32.mrb[77].mxu1  ;;  %9576 = vmatpush3.bf16.msra.mxu0 %v10506_v8  ;;  %v10534_v8 = vld [vmem:[%s13089_s3 + $0x118] sm:$0xff]  }
 0x201   :  { %v12179_v3 = vadd.f32 %v9226_v0, %v9225_v52  ;;  %v9228_v5 = vpop.f32.mrb[78].mxu1  ;;  %9610 = vmatpush3.bf16.msra.mxu1 %v10508_v33  ;;  %9577 = vmatprep.subr.bf16.mxu0 %v10509_v61  ;;  %v4795_v33 = vld [vmem:[#allocation2 + $0xa0] sm:$0xf0]  ;;  %v12269_v52 = vld [vmem:[#allocation2 + $0xb0] sm:$0xff] }
 0x202   :  { %v9191_v38 = vpop.f32.mrb[72].mxu0  ;;  %v9229_v10 = vpop.f32.mrb[79].mxu1  ;;  %9651 = vmatprep.subr.bf16.mxu1 %v10511_v63  ;;  %v10538_v5 = vld [vmem:[%s13089_s3 + $0x120] sm:$0xff]  }
 0x203   :  { %v9192_v13 = vpop.f32.mrb[73].mxu0  ;;  %v10541_v10 = vld [vmem:[%s13089_s3 + $0x168] sm:$0xff]  }
 0x204   :  { %v9193_v20 = vadd.f32 %v9192_v13, %v9191_v38  ;;  %v9194_v21 = vpop.f32.mrb[74].mxu0  ;;  %9578 = vmatpush3.bf16.msra.mxu0 %v10510_v62  ;;  %4597 = vmatmul.mubr.bf16.vlgmr.msra.gmra.mrb[128].mxu1 %v4238_v6  ;;  %v10536_v62 = vld [vmem:[%s13089_s3 + $0x1b0] sm:$0xff]   ;;  %v10539_v6 = vld [vmem:[%s13089_s3 + $0x1f8] sm:$0xff]   ;;  %v10542_v13 = vld [vmem:[%s13089_s3 + $0x128] sm:$0xff]  }
 0x205   :  { %v9195_v24 = vpop.f32.mrb[75].mxu0  ;;  %4604 = vmatprep.mubr.bf16.mxu1 %v4241_v18  ;;  %9652 = vmatpush3.bf16.msra.mxu1 %v10512_v40  ;;  %v10540_v38 = vld [vmem:[%s13089_s3 + $0x1b8] sm:$0xff]   ;;  %v4835_v18 = vrot.slane %v4795_v33, 4  ;;  %v10560_v33 = vld [vmem:[%s13089_s3 + $0x2a0] sm:$0xff]  }
 0x206   :  { %v1701_v14 = vadd.f32 %v9193_v20, %v12083_v9  ;;  %v9196_v27 = vadd.f32 %v9195_v24, %v9194_v21  ;;  %9579 = vmatprep.subr.bf16.mxu0 %v10513_v2  ;;  %9653 = vmatprep.subr.bf16.mxu1 %v10515_v7  ;;  %v10521_v9 = vld [vmem:[%s13089_s3 + $0x140] sm:$0xff]   ;;  %v10545_v20 = vld [vmem:[%s13089_s3 + $0x170] sm:$0xff]   ;;  %v10547_v24 = vld [vmem:[%s13089_s3 + $0x2c8] sm:$0xff]  }
 0x207   :  { %v10537_v2 = vld [vmem:[%s13089_s3 + $0x160] sm:$0xff]  }
 0x208   :  { %v1702_v31 = vadd.f32 %v9196_v27, %v12091_v16  ;;  %9580 = vmatpush3.bf16.msra.mxu0 %v10514_v11  ;;  %v12210_v37 = vadd.f32 %v9221_v54, %v1701_v14  ;;  %v10528_v54 = vld [vmem:[%s13089_s3 + $0x1a0] sm:$0xff]   ;;  %v4836_v11 = vrot.slane %v12269_v52, 4  ;;  %v10564_v52 = vld [vmem:[%s13089_s3 + $0x2a8] sm:$0xff]  }
 0x209   :  { %9654 = vmatpush3.bf16.msra.mxu1 %v10516_v17  ;;  %9581 = vmatprep.subr.bf16.mxu0 %v10517_v4  ;;  %v10544_v4 = vld [vmem:[%s13089_s3 + $0x280] sm:$0xff]  }
 0x20a   :  { %v9197_v41 = vpop.f32.mrb[76].mxu0  ;;  %9655 = vmatprep.subr.bf16.mxu1 %v10519_v23  ;;  %v12215_v42 = vadd.f32 %v9224_v60, %v1702_v31  ;;  %v4613_v60 = vld [vmem:[#allocation2 + $0xa8] sm:$0xff] }
 0x20b   :  { %v9198_v16 = vpop.f32.mrb[77].mxu0  ;;  %v10548_v31 = vld [vmem:[%s13089_s3 + $0x288] sm:$0xff]  }
 0x20c   :  { %v9199_v43 = vadd.f32 %v9198_v16, %v9197_v41  ;;  %v9200_v1 = vpop.f32.mrb[78].mxu0  ;;  %9582 = vmatpush3.bf16.msra.mxu0 %v10518_v28  ;;  %4605 = vmatmul.mubr.bf16.gmra.mrb[132].mxu1 %v4240_v39  ;;  %v10546_v28 = vld [vmem:[%s13089_s3 + $0x130] sm:$0xff]   ;;  %v12316_v41 = vld [vmem:[#allocation2 + $0xd8] sm:$0xff] }
 0x20d   :  { %v9201_v47 = vpop.f32.mrb[79].mxu0  ;;  %9656 = vmatpush3.bf16.msra.mxu1 %v10520_v30  ;;  %4973 = vmatprep.mubr.bf16.mxu1 %v4840_v45  ;;  %v4837_v30 = vsel %vm1221_vm0, %v4835_v18, %v4836_v11  ;;  %v5218_v1 = vrot.slane %v5176_v25, 4  ;;  %v10553_v45 = vld [vmem:[%s13089_s3 + $0x240] sm:$0xff]   ;;  %v10568_v18 = vld [vmem:[%s13089_s3 + $0x2b0] sm:$0xff]  }
 0x20e   :  { %v1703_v49 = vadd.f32 %v9199_v43, %v12116_v36  ;;  %9623 = vmatprep.subr.bf16.mxu0 %v10521_v9  ;;  %9657 = vmatprep.subr.bf16.mxu1 %v10523_v15  ;;  %v10529_v36 = vld [vmem:[%s13089_s3 + $0x150] sm:$0xff]   ;;  %v10549_v9 = vld [vmem:[%s13089_s3 + $0x178] sm:$0xff]  }
 0x20f   :  { %4453 = vmatmul.mubr.bf16.vlgmr.msra.gmra.mrb[128].mxu0 %v4316_v50  ;;  %v10551_v43 = vld [vmem:[%s13089_s3 + $0x2d0] sm:$0xff]   ;;  %v10554_v50 = vld [vmem:[%s13089_s3 + $0x200] sm:$0xff]  }
 0x210   :  { %4460 = vmatprep.mubr.bf16.mxu0 %v4318_v44  ;;  %9624 = vmatpush3.bf16.msra.mxu0 %v10522_v26  ;;  %v12246_v55 = vadd.f32 %v12179_v3, %v1703_v49  ;;  %v10533_v44 = vld [vmem:[%s13089_s3 + $0x158] sm:$0xff]  }
 0x211   :  { %9658 = vmatpush3.bf16.msra.mxu1 %v10524_v46  ;;  %9625 = vmatprep.subr.bf16.mxu0 %v10525_v48  ;;  %v10550_v26 = vld [vmem:[%s13089_s3 + $0x138] sm:$0xff]  }
 0x212   :  { %9659 = vmatprep.subr.bf16.mxu1 %v10527_v53  ;;  %v10555_v48 = vld [vmem:[%s13089_s3 + $0x2d8] sm:$0xff]  }
 0x214   :  { %9626 = vmatpush3.bf16.msra.mxu0 %v10526_v51 }
 0x215   :  { %9660 = vmatpush3.bf16.msra.mxu1 %v10528_v54  ;;  %9627 = vmatprep.subr.bf16.mxu0 %v10529_v36  ;;  %v4612_v36 = vld [vmem:[#allocation2 + $0xa0] sm:$0xff] }
 0x216   :  { %9661 = vmatprep.subr.bf16.mxu1 %v10531_v56  ;;  %v10556_v56 = vld [vmem:[%s13089_s3 + $0x298] sm:$0xff]  }
 0x217   :  { %v9275_v61 = vpop.f32.mrb[80].mxu1  ;;  %4461 = vmatmul.mubr.bf16.gmra.mrb[132].mxu0 %v4315_v29 }
 0x218   :  { %v9276_v63 = vpop.f32.mrb[81].mxu1  ;;  %9628 = vmatpush3.bf16.msra.mxu0 %v10530_v57  ;;  %4776 = vmatprep.mubr.bf16.mxu0 %v4613_v60  ;;  %v10558_v60 = vld [vmem:[%s13089_s3 + $0x208] sm:$0xff]  }
 0x219   :  { %v9277_v40 = vadd.f32 %v9276_v63, %v9275_v61  ;;  %v9278_v0 = vpop.f32.mrb[82].mxu1  ;;  %9662 = vmatpush3.bf16.msra.mxu1 %v10532_v35  ;;  %9629 = vmatprep.subr.bf16.mxu0 %v10533_v44  ;;  %v4615_v35 = vld [vmem:[#allocation2 + $0xb8] sm:$0xf]  ;;  %v10557_v44 = vld [vmem:[%s13089_s3 + $0x248] sm:$0xff]   ;;  %v10561_v61 = vld [vmem:[%s13089_s3 + $0x250] sm:$0xff]  }
 0x21a   :  { %v9279_v3 = vpop.f32.mrb[83].mxu1  ;;  %9663 = vmatprep.subr.bf16.mxu1 %v10535_v58  ;;  %v10562_v63 = vld [vmem:[%s13089_s3 + $0x210] sm:$0xff]  }
 0x21b   :  { %v9280_v7 = vadd.f32 %v9279_v3, %v9278_v0  ;;  %v4614_v0 = vld [vmem:[#allocation2 + $0xb0] sm:$0xf] }
 0x21c   :  { %9630 = vmatpush3.bf16.msra.mxu0 %v10534_v8  ;;  %v10559_v8 = vld [vmem:[%s13089_s3 + $0x2e0] sm:$0xff]  }
 0x21d   :  { %9664 = vmatpush3.bf16.msra.mxu1 %v10536_v62  ;;  %9631 = vmatprep.subr.bf16.mxu0 %v10537_v2  ;;  %v10567_v2 = vld [vmem:[%s13089_s3 + $0x2f0] sm:$0xff]  }
 0x21e   :  { %9665 = vmatprep.subr.bf16.mxu1 %v10539_v6 }
 0x21f   :  { %v9281_v17 = vpop.f32.mrb[84].mxu1 }
 0x220   :  { %v9282_v32 = vpop.f32.mrb[85].mxu1  ;;  %9632 = vmatpush3.bf16.msra.mxu0 %v10538_v5  ;;  %v4993_v5 = vld [vmem:[#allocation2 + $0xc8] sm:$0xff] }
 0x221   :  { %v12299_v21 = vadd.f32 %v9282_v32, %v9281_v17  ;;  %v9284_v23 = vpop.f32.mrb[86].mxu1  ;;  %9666 = vmatpush3.bf16.msra.mxu1 %v10540_v38  ;;  %9633 = vmatprep.subr.bf16.mxu0 %v10541_v10  ;;  %v5175_v32 = vld [vmem:[#allocation2 + $0xc0] sm:$0xf0] }
 0x222   :  { %v9247_v14 = vpop.f32.mrb[80].mxu0  ;;  %v9285_v27 = vpop.f32.mrb[87].mxu1  ;;  %9707 = vmatprep.subr.bf16.mxu1 %v10543_v12  ;;  %v10573_v23 = vld [vmem:[%s13089_s3 + $0x268] sm:$0xff]  }
 0x223   :  { %v9248_v59 = vpop.f32.mrb[81].mxu0 }
 0x224   :  { %v9249_v34 = vadd.f32 %v9248_v59, %v9247_v14  ;;  %v9250_v29 = vpop.f32.mrb[82].mxu0  ;;  %9634 = vmatpush3.bf16.msra.mxu0 %v10542_v13  ;;  %4974 = vmatmul.mubr.bf16.vlgmr.msra.gmra.mrb[136].mxu1 %v4837_v30  ;;  %v10571_v13 = vld [vmem:[%s13089_s3 + $0x2f8] sm:$0xff]   ;;  %v5215_v14 = vrot.slane %v5175_v32, 4  ;;  %v10574_v59 = vld [vmem:[%s13089_s3 + $0x228] sm:$0xff]  }
 0x225   :  { %v9251_v39 = vpop.f32.mrb[83].mxu0  ;;  %4981 = vmatprep.mubr.bf16.mxu1 %v4839_v22  ;;  %9708 = vmatpush3.bf16.msra.mxu1 %v10544_v4  ;;  %v10570_v4 = vld [vmem:[%s13089_s3 + $0x220] sm:$0xff]  }
 0x226   :  { %v2083_v15 = vadd.f32 %v9249_v34, %v12210_v37  ;;  %v9252_v16 = vadd.f32 %v9251_v39, %v9250_v29  ;;  %9635 = vmatprep.subr.bf16.mxu0 %v10545_v20  ;;  %9709 = vmatprep.subr.bf16.mxu1 %v10547_v24  ;;  %v5219_v37 = vrot.slane %v12316_v41, 4  ;;  %v12398_v20 = vld [vmem:[#allocation2 + $0xd0] sm:$0xff]  ;;  %v10575_v24 = vld [vmem:[%s13089_s3 + $0x3c0] sm:$0xff]  }
 0x227   :  { %v5216_v27 = vrot.slane %v12398_v20, 4  ;;  %v10576_v34 = vld [vmem:[%s13089_s3 + $0x380] sm:$0xff]   ;;  %v10577_v39 = vld [vmem:[%s13089_s3 + $0x270] sm:$0xff]  }
 0x228   :  { %v2084_v22 = vadd.f32 %v9252_v16, %v12215_v42  ;;  %9636 = vmatpush3.bf16.msra.mxu0 %v10546_v28  ;;  %v12333_v46 = vadd.f32 %v9277_v40, %v2083_v15  ;;  %v5220_v54 = vsel %vm1221_vm0, %v5218_v1, %v5219_v37  ;;  %v10565_v40 = vld [vmem:[%s13089_s3 + $0x258] sm:$0xff]   ;;  %v10579_v15 = vld [vmem:[%s13089_s3 + $0x3c8] sm:$0xff]   ;;  %v12445_v41 = vld [vmem:[%s13092_s4] ss:$0 sm:$0xff] }
 0x229   :  { %9710 = vmatpush3.bf16.msra.mxu1 %v10548_v31  ;;  %9637 = vmatprep.subr.bf16.mxu0 %v10549_v9  ;;  %v10594_v20 = vld [vmem:[%s13089_s3 + $0x310] sm:$0xff]  }
 0x22a   :  { %v9253_v47 = vpop.f32.mrb[84].mxu0  ;;  %9711 = vmatprep.subr.bf16.mxu1 %v10551_v43  ;;  %v12338_v49 = vadd.f32 %v9280_v7, %v2084_v22  ;;  %v10566_v7 = vld [vmem:[%s13089_s3 + $0x218] sm:$0xff]   ;;  %v10580_v22 = vld [vmem:[%s13089_s3 + $0x388] sm:$0xff]  }
 0x22b   :  { %v9254_v42 = vpop.f32.mrb[85].mxu0 }
 0x22c   :  { %v9255_v51 = vadd.f32 %v9254_v42, %v9253_v47  ;;  %v9256_v53 = vpop.f32.mrb[86].mxu0  ;;  %9638 = vmatpush3.bf16.msra.mxu0 %v10550_v26  ;;  %4982 = vmatmul.mubr.bf16.gmra.mrb[140].mxu1 %v4836_v11  ;;  %v10569_v11 = vld [vmem:[%s13089_s3 + $0x260] sm:$0xff]   ;;  %v5217_v26 = vsel %vm1221_vm0, %v5215_v14, %v5216_v27  ;;  %v10581_v47 = vld [vmem:[%s13089_s3 + $0x278] sm:$0xff]   ;;  %v10599_v14 = vld [vmem:[%s13089_s3 + $0x3f0] sm:$0xff]  }
 0x22d   :  { %v9257_v57 = vpop.f32.mrb[87].mxu0  ;;  %9712 = vmatpush3.bf16.msra.mxu1 %v10552_v19  ;;  %5353 = vmatprep.mubr.bf16.mxu1 %v5220_v54  ;;  %v10578_v19 = vld [vmem:[%s13089_s3 + $0x230] sm:$0xff]   ;;  %v12436_v42 = vld [vmem:[#allocation2 + $0xf8] sm:$0xff] }
 0x22e   :  { %v2085_v58 = vadd.f32 %v9255_v51, %v12246_v55  ;;  %9679 = vmatprep.subr.bf16.mxu0 %v10553_v45  ;;  %9713 = vmatprep.subr.bf16.mxu1 %v10555_v48  ;;  %v10563_v55 = vld [vmem:[%s13089_s3 + $0x2e8] sm:$0xff]   ;;  %v10583_v53 = vld [vmem:[%s13089_s3 + $0x3d0] sm:$0xff]  }
 0x22f   :  { %4777 = vmatmul.mubr.bf16.vlgmr.msra.gmra.mrb[136].mxu0 %v4612_v36  ;;  %v5556_v48 = vld [vmem:[#allocation2 + $0xe8] sm:$0xf0]  ;;  %v10584_v57 = vld [vmem:[%s13089_s3 + $0x390] sm:$0xff]  }
 0x230   :  { %4784 = vmatprep.mubr.bf16.mxu0 %v4615_v35  ;;  %9680 = vmatpush3.bf16.msra.mxu0 %v10554_v50  ;;  %v12369_v62 = vadd.f32 %v12299_v21, %v2085_v58  ;;  %v10572_v21 = vld [vmem:[%s13089_s3 + $0x2b8] sm:$0xff]   ;;  %v5598_v36 = vrot.slane %v5556_v48, 4 }
 0x231   :  { %9714 = vmatpush3.bf16.msra.mxu1 %v10556_v56  ;;  %9681 = vmatprep.subr.bf16.mxu0 %v10557_v44  ;;  %v5599_v56 = vrot.slane %v12436_v42, 4  ;;  %v10612_v42 = vld [vmem:[%s13089_s3 + $0x338] sm:$0xff]  }
 0x232   :  { %9715 = vmatprep.subr.bf16.mxu1 %v10559_v8 }
 0x234   :  { %9682 = vmatpush3.bf16.msra.mxu0 %v10558_v60  ;;  %v10587_v60 = vld [vmem:[%s13089_s3 + $0x3d8] sm:$0xff]  }
 0x235   :  { %9716 = vmatpush3.bf16.msra.mxu1 %v10560_v33  ;;  %9683 = vmatprep.subr.bf16.mxu0 %v10561_v61 }
 0x236   :  { %9717 = vmatprep.subr.bf16.mxu1 %v10563_v55 }
 0x237   :  { %v9331_v3 = vpop.f32.mrb[88].mxu1  ;;  %4785 = vmatmul.mubr.bf16.gmra.mrb[140].mxu0 %v4614_v0  ;;  %v10588_v0 = vld [vmem:[%s13089_s3 + $0x398] sm:$0xff]  }
 0x238   :  { %v9332_v6 = vpop.f32.mrb[89].mxu1  ;;  %9684 = vmatpush3.bf16.msra.mxu0 %v10562_v63  ;;  %5156 = vmatprep.mubr.bf16.mxu0 %v4993_v5  ;;  %v5600_v63 = vsel %vm1221_vm0, %v5598_v36, %v5599_v56 }
 0x239   :  { %v9333_v38 = vadd.f32 %v9332_v6, %v9331_v3  ;;  %v9334_v10 = vpop.f32.mrb[90].mxu1  ;;  %9718 = vmatpush3.bf16.msra.mxu1 %v10564_v52  ;;  %9685 = vmatprep.subr.bf16.mxu0 %v10565_v40  ;;  %v10586_v52 = vld [vmem:[%s13089_s3 + $0x300] sm:$0xff]  }
 0x23a   :  { %v9335_v12 = vpop.f32.mrb[91].mxu1  ;;  %9719 = vmatprep.subr.bf16.mxu1 %v10567_v2  ;;  %v10589_v2 = vld [vmem:[%s13089_s3 + $0x348] sm:$0xff]  }
 0x23b   :  { %v9336_v17 = vadd.f32 %v9335_v12, %v9334_v10  ;;  %v4995_v10 = vld [vmem:[#allocation2 + $0xd8] sm:$0xf]  ;;  %v10590_v12 = vld [vmem:[%s13089_s3 + $0x308] sm:$0xff]  }
 0x23c   :  { %9686 = vmatpush3.bf16.msra.mxu0 %v10566_v7  ;;  %v4992_v7 = vld [vmem:[#allocation2 + $0xc0] sm:$0xff] }
 0x23d   :  { %9720 = vmatpush3.bf16.msra.mxu1 %v10568_v18  ;;  %9687 = vmatprep.subr.bf16.mxu0 %v10569_v11 }
 0x23e   :  { %9721 = vmatprep.subr.bf16.mxu1 %v10571_v13  ;;  %v10593_v13 = vld [vmem:[%s13089_s3 + $0x350] sm:$0xff]  }
 0x23f   :  { %v9337_v25 = vpop.f32.mrb[92].mxu1 }
 0x240   :  { %v9338_v28 = vpop.f32.mrb[93].mxu1  ;;  %9688 = vmatpush3.bf16.msra.mxu0 %v10570_v4  ;;  %v10595_v4 = vld [vmem:[%s13089_s3 + $0x3e8] sm:$0xff]  }
 0x241   :  { %v12413_v30 = vadd.f32 %v9338_v28, %v9337_v25  ;;  %v9340_v31 = vpop.f32.mrb[94].mxu1  ;;  %9722 = vmatpush3.bf16.msra.mxu1 %v10572_v21  ;;  %9689 = vmatprep.subr.bf16.mxu0 %v10573_v23  ;;  %v10596_v21 = vld [vmem:[%s13089_s3 + $0x3a8] sm:$0xff]   ;;  %v10597_v23 = vld [vmem:[%s13089_s3 + $0x358] sm:$0xff]   ;;  %v4994_v25 = vld [vmem:[#allocation2 + $0xd0] sm:$0xf] }
 0x242   :  { %v9303_v29 = vpop.f32.mrb[88].mxu0  ;;  %v9341_v9 = vpop.f32.mrb[95].mxu1  ;;  %9763 = vmatprep.subr.bf16.mxu1 %v10575_v24  ;;  %v5373_v28 = vld [vmem:[#allocation2 + $0xe8] sm:$0xff] }
 0x243   :  { %v9304_v16 = vpop.f32.mrb[89].mxu0  ;;  %v10601_v9 = vld [vmem:[%s13089_s3 + $0x360] sm:$0xff]  }
 0x244   :  { %v9305_v43 = vadd.f32 %v9304_v16, %v9303_v29  ;;  %v9306_v1 = vpop.f32.mrb[90].mxu0  ;;  %9690 = vmatpush3.bf16.msra.mxu0 %v10574_v59  ;;  %5354 = vmatmul.mubr.bf16.vlgmr.msra.gmra.mrb[144].mxu1 %v5217_v26  ;;  %v10600_v29 = vld [vmem:[%s13089_s3 + $0x3b0] sm:$0xff]   ;;  %v10602_v26 = vld [vmem:[%s13089_s3 + $0x320] sm:$0xff]  }
 0x245   :  { %v9307_v45 = vpop.f32.mrb[91].mxu0  ;;  %5361 = vmatprep.mubr.bf16.mxu1 %v5219_v37  ;;  %9764 = vmatpush3.bf16.msra.mxu1 %v10576_v34 }
 0x246   :  { %v2465_v50 = vadd.f32 %v9305_v43, %v12333_v46  ;;  %v9308_v51 = vadd.f32 %v9307_v45, %v9306_v1  ;;  %9691 = vmatprep.subr.bf16.mxu0 %v10577_v39  ;;  %9765 = vmatprep.subr.bf16.mxu1 %v10579_v15  ;;  %v10582_v46 = vld [vmem:[%s13089_s3 + $0x238] sm:$0xff]   ;;  %v5555_v43 = vld [vmem:[#allocation2 + $0xe0] sm:$0xf0]  ;;  %v5557_v1 = vld [vmem:[#allocation2 + $0xf0] sm:$0xff] }
 0x247   :  { %v10603_v15 = vld [vmem:[%s13089_s3 + $0x3f8] sm:$0xff]   ;;  %v5596_v48 = vrot.slane %v5557_v1, 4 }
 0x248   :  { %v2663_v37 = vadd.f32 %v9333_v38, %v2465_v50  ;;  %v2466_v54 = vadd.f32 %v9308_v51, %v12338_v49  ;;  %9692 = vmatpush3.bf16.msra.mxu0 %v10578_v19  ;;  %v10585_v49 = vld [vmem:[%s13089_s3 + $0x340] sm:$0xff]   ;;  %v10604_v19 = vld [vmem:[%s13089_s3 + $0x3b8] sm:$0xff]   ;;  %v10606_v51 = vld [vmem:[%s13089_s3 + $0x328] sm:$0xff]  }
 0x249   :  { %9766 = vmatpush3.bf16.msra.mxu1 %v10580_v22  ;;  %9693 = vmatprep.subr.bf16.mxu0 %v10581_v47  ;;  %v10591_v38 = vld [vmem:[%s13089_s3 + $0x3e0] sm:$0xff]   ;;  %v10605_v22 = vld [vmem:[%s13089_s3 + $0x368] sm:$0xff]   ;;  %v5595_v47 = vrot.slane %v5555_v43, 4 }
 0x24a   :  { %v2673_v35 = vadd.f32 %v12445_v41, %v2663_v37  ;;  %v2664_v44 = vadd.f32 %v9336_v17, %v2466_v54  ;;  %v9309_v58 = vpop.f32.mrb[92].mxu0  ;;  %9767 = vmatprep.subr.bf16.mxu1 %v10583_v53  ;;  %v10607_v54 = vld [vmem:[%s13091_s5] sm:$0xff]  }
 0x24b   :  { %v9310_v8 = vpop.f32.mrb[93].mxu0 }
 0x24c   :  { %v2674_v33 = vadd.f32 %v12445_v41, %v2664_v44  ;;  %v9311_v61 = vadd.f32 %v9310_v8, %v9309_v58  ;;  %v9312_v55 = vpop.f32.mrb[94].mxu0  ;;  %9694 = vmatpush3.bf16.msra.mxu0 %v10582_v46  ;;  %5362 = vmatmul.mubr.bf16.gmra.mrb[148].mxu1 %v5216_v27  ;;  %v2676_v3 = vmax.f32 %v2673_v35, 0.0  ;;  %v10608_v35 = vld [vmem:[%s13089_s3 + $0x370] sm:$0xff]   ;;  %v5597_v58 = vsel %vm1221_vm0, %v5595_v47, %v5596_v48  ;;  %v10636_v47 = vld [vmem:[%s13091_s5 + $0xc8] sm:$0xff]  }
 0x24d   :  { %v9313_v40 = vpop.f32.mrb[95].mxu0  ;;  %9768 = vmatpush3.bf16.msra.mxu1 %v10584_v57  ;;  %5733 = vmatprep.mubr.bf16.mxu1 %v5600_v63  ;;  %v10774_v57 = vmov 0.0   ;;  %v10609_v8 = vld [vmem:[%s13089_s3 + $0x330] sm:$0xff]   ;;  %v10611_v55 = vld [vmem:[%s13089_s3 + $0x378] sm:$0xff]  }
 0x24e   :  { %v2677_v5 = vmax.f32 %v2674_v33, 0.0  ;;  %v2467_v6 = vadd.f32 %v9311_v61, %v12369_v62  ;;  %9735 = vmatprep.subr.bf16.mxu0 %v10585_v49  ;;  %9769 = vmatprep.subr.bf16.mxu1 %v10587_v60  ;;  %v10592_v62 = vld [vmem:[%s13089_s3 + $0x3a0] sm:$0xff]   ;;  %v10610_v61 = vld [vmem:[%s13091_s5 + $0x8] sm:$0xff]  }
 0x24f   :  { %5157 = vmatmul.mubr.bf16.vlgmr.msra.gmra.mrb[144].mxu0 %v4992_v7 }
 0x250   :  { %v8881_v18 = vpack.c.bf16 %v2677_v5, %v2676_v3  ;;  %v2665_v11 = vadd.f32 %v12413_v30, %v2467_v6  ;;  %5164 = vmatprep.mubr.bf16.mxu0 %v4995_v10  ;;  %9736 = vmatpush3.bf16.msra.mxu0 %v10586_v52  ;;  %v10598_v30 = vld [vmem:[%s13089_s3 + $0x318] sm:$0xff]   ;;  %v10614_v6 = vld [vmem:[%s13091_s5 + $0x40] sm:$0xff]  }
 0x251   :  { %9770 = vmatpush3.bf16.msra.mxu1 %v10588_v0  ;;  %9737 = vmatprep.subr.bf16.mxu0 %v10589_v2 }
 0x252   :  { %8882 = vst [vmem:[#allocation3] sm:$0xff] %v8881_v18   ;;  %v2675_v17 = vadd.f32 %v12445_v41, %v2665_v11  ;;  %9771 = vmatprep.subr.bf16.mxu1 %v10591_v38  ;;  %v10615_v38 = vld [vmem:[%s13091_s5 + $0x18] sm:$0xff]   ;;  %v5372_v18 = vld [vmem:[#allocation2 + $0xe0] sm:$0xff] }
 0x253   :  { %v5375_v11 = vld [vmem:[#allocation2 + $0xf8] sm:$0xf] }
 0x254   :  { %v2678_v32 = vmax.f32 %v2675_v17, 0.0  ;;  %9738 = vmatpush3.bf16.msra.mxu0 %v10590_v12  ;;  %v10616_v12 = vld [vmem:[%s13091_s5 + $0x48] sm:$0xff]  }
 0x255   :  { %9772 = vmatpush3.bf16.msra.mxu1 %v10592_v62  ;;  %9739 = vmatprep.subr.bf16.mxu0 %v10593_v13  ;;  %v10617_v62 = vld [vmem:[%s13091_s5 + $0x20] sm:$0xff]   ;;  %v10618_v13 = vld [vmem:[%s13091_s5 + $0x50] sm:$0xff]   ;;  %v10619_v17 = vld [vmem:[%s13091_s5 + $0x28] sm:$0xff]  }
 0x256   :  { %v8871_v24 = vpack.c.bf16 %v2678_v32, %v2678_v32  ;;  %9773 = vmatprep.subr.bf16.mxu1 %v10595_v4  ;;  %v5374_v4 = vld [vmem:[#allocation2 + $0xf0] sm:$0xf] }
 0x257   :  { %v9387_v27 = vpop.f32.mrb[96].mxu1  ;;  %5165 = vmatmul.mubr.bf16.gmra.mrb[148].mxu0 %v4994_v25  ;;  %v10621_v25 = vld [vmem:[%s13091_s5 + $0x30] sm:$0xff]  }
 0x258   :  { %2694 = vst [vmem:[#allocation3 + $0x8] sm:$0xf] %v8871_v24  ;;  %v9388_v59 = vpop.f32.mrb[97].mxu1  ;;  %9740 = vmatpush3.bf16.msra.mxu0 %v10594_v20  ;;  %5536 = vmatprep.mubr.bf16.mxu0 %v5373_v28  ;;  %v10622_v28 = vld [vmem:[%s13091_s5 + $0x60] sm:$0xff]  }
 0x259   :  { %v9389_v31 = vadd.f32 %v9388_v59, %v9387_v27  ;;  %v9390_v34 = vpop.f32.mrb[98].mxu1  ;;  %9774 = vmatpush3.bf16.msra.mxu1 %v10596_v21  ;;  %9741 = vmatprep.subr.bf16.mxu0 %v10597_v23  ;;  %v10620_v21 = vld [vmem:[%s13091_s5 + $0x58] sm:$0xff]   ;;  %v5781_v43 = vld [vmem:[#allocation3] sm:$0xf] }
 0x25a   :  { %v9391_v39 = vpop.f32.mrb[99].mxu1  ;;  %9775 = vmatprep.subr.bf16.mxu1 %v10599_v14  ;;  %v10623_v59 = vld [vmem:[%s13091_s5 + $0x38] sm:$0xff]  }
 0x25b   :  { %v9392_v16 = vadd.f32 %v9391_v39, %v9390_v34  ;;  %v10624_v34 = vld [vmem:[%s13091_s5 + $0x68] sm:$0xff]   ;;  %v10635_v39 = vld [vmem:[%s13091_s5 + $0xc0] sm:$0xff]  }
 0x25c   :  { %9742 = vmatpush3.bf16.msra.mxu0 %v10598_v30 }
 0x25d   :  { %9776 = vmatpush3.bf16.msra.mxu1 %v10600_v29  ;;  %9743 = vmatprep.subr.bf16.mxu0 %v10601_v9 }
 0x25e   :  { %9777 = vmatprep.subr.bf16.mxu1 %v10603_v15 }
 0x25f   :  { %v9393_v45 = vpop.f32.mrb[100].mxu1 }
 0x260   :  { %v9394_v50 = vpop.f32.mrb[101].mxu1  ;;  %9744 = vmatpush3.bf16.msra.mxu0 %v10602_v26 }
 0x261   :  { %v9395_v53 = vadd.f32 %v9394_v50, %v9393_v45  ;;  %v9396_v37 = vpop.f32.mrb[102].mxu1  ;;  %9778 = vmatpush3.bf16.msra.mxu1 %v10604_v19  ;;  %9745 = vmatprep.subr.bf16.mxu0 %v10605_v22  ;;  %v10625_v22 = vld [vmem:[%s13091_s5 + $0x70] sm:$0xff]  }
 0x262   :  { %v9359_v46 = vpop.f32.mrb[96].mxu0  ;;  %v9397_v36 = vpop.f32.mrb[103].mxu1  ;;  %9936 = vmatprep.subr.bf16.mxu1 %v10774_v57 }
 0x263   :  { %v9360_v44 = vpop.f32.mrb[97].mxu0 }
 0x264   :  { %v9361_v49 = vadd.f32 %v9360_v44, %v9359_v46  ;;  %v9362_v60 = vpop.f32.mrb[98].mxu0  ;;  %9746 = vmatpush3.bf16.msra.mxu0 %v10606_v51  ;;  %5734 = vmatmul.mubr.bf16.vlgmr.msra.gmra.mrb[152].mxu1 %v5597_v58 }
 0x265   :  { %v9363_v33 = vpop.f32.mrb[99].mxu0  ;;  %5741 = vmatprep.mubr.bf16.mxu1 %v5599_v56  ;;  %9937 = vmatpush3.bf16.msra.mxu1 %v10607_v54  ;;  %v10613_v56 = vld [vmem:[%s13091_s5 + $0x10] sm:$0xff]  }
 0x266   :  { %v12548_v63 = vadd.f32 %v9389_v31, %v9361_v49  ;;  %v9364_v52 = vadd.f32 %v9363_v33, %v9362_v60  ;;  %9747 = vmatprep.subr.bf16.mxu0 %v10608_v35  ;;  %9938 = vmatprep.subr.bf16.mxu1 %v10774_v57  ;;  %v10637_v54 = vld [vmem:[%s13091_s5 + $0xd0] sm:$0xff]   ;;  %v10627_v49 = vld [vmem:[%s13091_s5 + $0x80] sm:$0xff]  }
 0x268   :  { %v12551_v40 = vadd.f32 %v9392_v16, %v9364_v52  ;;  %9748 = vmatpush3.bf16.msra.mxu0 %v10609_v8  ;;  %v10639_v8 = vld [vmem:[%s13091_s5 + $0xd8] sm:$0xff]   ;;  %v10641_v52 = vld [vmem:[%s13091_s5 + $0xe0] sm:$0xff]  }
 0x269   :  { %9939 = vmatpush3.bf16.msra.mxu1 %v10610_v61  ;;  %9749 = vmatprep.subr.bf16.mxu0 %v10611_v55  ;;  %v5798_v61 = vld [vmem:[#allocation3 + $0x4] sm:$0xf]  ;;  %v10628_v55 = vld [vmem:[%s13091_s5 + $0x88] sm:$0xff]  }
 0x26a   :  { %v9365_v0 = vpop.f32.mrb[100].mxu0  ;;  %9940 = vmatprep.subr.bf16.mxu1 %v10774_v57 }
 0x26b   :  { %v9366_v2 = vpop.f32.mrb[101].mxu0 }
 0x26c   :  { %v9367_v3 = vadd.f32 %v9366_v2, %v9365_v0  ;;  %v9368_v5 = vpop.f32.mrb[102].mxu0  ;;  %9750 = vmatpush3.bf16.msra.mxu0 %v10612_v42  ;;  %5742 = vmatmul.mubr.bf16.gmra.mrb[156].mxu1 %v5596_v48  ;;  %v10643_v42 = vld [vmem:[%s13091_s5 + $0xe8] sm:$0xff]   ;;  %v10630_v2 = vld [vmem:[%s13091_s5 + $0x98] sm:$0xff]  }
 0x26d   :  { %v9369_v7 = vpop.f32.mrb[103].mxu0  ;;  %9941 = vmatpush3.bf16.msra.mxu1 %v10613_v56  ;;  %9916 = vmatprep.subr.bf16.mxu0 %v10774_v57 }
 0x26e   :  { %v12567_v10 = vadd.f32 %v9395_v53, %v9367_v3  ;;  %9942 = vmatprep.subr.bf16.mxu1 %v10774_v57  ;;  %9952 = vmatprep.mubr.msk.bf16.mxu1 %vm10775_vm1, %v10774_v57  ;;  %v10626_v53 = vld [vmem:[%s13091_s5 + $0x78] sm:$0xff]  }
 0x26f   :  { %5537 = vmatmul.mubr.bf16.vlgmr.msra.gmra.mrb[152].mxu0 %v5372_v18  ;;  %v10647_v18 = vld [vmem:[%s13091_s5 + $0xf8] sm:$0xff]  }
 0x270   :  { %5544 = vmatprep.mubr.bf16.mxu0 %v5375_v11  ;;  %9917 = vmatpush3.bf16.msra.mxu0 %v10614_v6  ;;  %v10645_v6 = vld [vmem:[%s13091_s5 + $0xf0] sm:$0xff]  }
 0x271   :  { %9943 = vmatpush3.bf16.msra.mxu1 %v10615_v38  ;;  %9918 = vmatprep.subr.bf16.mxu0 %v10774_v57 }
 0x272   :  { %9944 = vmatprep.subr.bf16.mxu1 %v10774_v57 }
 0x274   :  { %9919 = vmatpush3.bf16.msra.mxu0 %v10616_v12 }
 0x275   :  { %9945 = vmatpush3.bf16.msra.mxu1 %v10617_v62  ;;  %9920 = vmatprep.subr.bf16.mxu0 %v10774_v57  ;;  %v10632_v62 = vld [vmem:[%s13091_s5 + $0xa8] sm:$0xff]  }
 0x276   :  { %9946 = vmatprep.subr.bf16.mxu1 %v10774_v57 }
 0x277   :  { %v9443_v32 = vpop.f32.mrb[104].mxu1  ;;  %5545 = vmatmul.mubr.bf16.gmra.mrb[156].mxu0 %v5374_v4 }
 0x278   :  { %v9444_v20 = vpop.f32.mrb[105].mxu1  ;;  %9921 = vmatpush3.bf16.msra.mxu0 %v10618_v13  ;;  %9932 = vmatprep.mubr.msk.bf16.mxu0 %vm10775_vm1, %v10774_v57 }
 0x279   :  { %v9445_v23 = vadd.f32 %v9444_v20, %v9443_v32  ;;  %v9446_v24 = vpop.f32.mrb[106].mxu1  ;;  %9947 = vmatpush3.bf16.msra.mxu1 %v10619_v17  ;;  %9922 = vmatprep.subr.bf16.mxu0 %v10774_v57 }
 0x27a   :  { %v9447_v14 = vpop.f32.mrb[107].mxu1  ;;  %9948 = vmatprep.subr.bf16.mxu1 %v10774_v57 }
 0x27b   :  { %v9448_v27 = vadd.f32 %v9447_v14, %v9446_v24  ;;  %v10633_v24 = vld [vmem:[%s13091_s5 + $0xb0] sm:$0xff]  }
 0x27c   :  { %9923 = vmatpush3.bf16.msra.mxu0 %v10620_v21 }
 0x27d   :  { %9949 = vmatpush3.bf16.msra.mxu1 %v10621_v25  ;;  %9924 = vmatprep.subr.bf16.mxu0 %v10774_v57 }
 0x27e   :  { %9950 = vmatprep.subr.bf16.mxu1 %v10774_v57 }
 0x27f   :  { %v9449_v30 = vpop.f32.mrb[108].mxu1 }
 0x280   :  { %v9450_v31 = vpop.f32.mrb[109].mxu1  ;;  %9925 = vmatpush3.bf16.msra.mxu0 %v10622_v28 }
 0x281   :  { %v9451_v29 = vadd.f32 %v9450_v31, %v9449_v30  ;;  %v9452_v9 = vpop.f32.mrb[110].mxu1  ;;  %9951 = vmatpush3.bf16.msra.mxu1 %v10623_v59  ;;  %9926 = vmatprep.subr.bf16.mxu0 %v10774_v57  ;;  %v10634_v59 = vld [vmem:[%s13091_s5 + $0xb8] sm:$0xff]  }
 0x282   :  { %v9415_v15 = vpop.f32.mrb[104].mxu0  ;;  %v9453_v16 = vpop.f32.mrb[111].mxu1  ;;  %9976 = vmatprep.subr.bf16.mxu1 %v10774_v57 }
 0x283   :  { %v9416_v26 = vpop.f32.mrb[105].mxu0 }
 0x284   :  { %v9417_v1 = vadd.f32 %v9416_v26, %v9415_v15  ;;  %v9418_v19 = vpop.f32.mrb[106].mxu0  ;;  %9927 = vmatpush3.bf16.msra.mxu0 %v10624_v34  ;;  %9953 = vmatmul.mubr.bf16.vlgmr.msra.gmra.mrb[160].mxu1 %v5781_v43  ;;  %v10638_v15 = vld [vmem:[%s13091_s5 + $0x100] sm:$0xff]   ;;  %v5992_v43 = vld [vmem:[#allocation3 + $0x8] sm:$0xf] }
 0x285   :  { %v9419_v45 = vpop.f32.mrb[107].mxu0  ;;  %9928 = vmatprep.subr.bf16.mxu0 %v10774_v57  ;;  %9977 = vmatpush3.bf16.msra.mxu1 %v10635_v39 }
 0x286   :  { %v3249_v48 = vadd.f32 %v9417_v1, %v12548_v63  ;;  %v9420_v50 = vadd.f32 %v9419_v45, %v9418_v19  ;;  %9978 = vmatprep.subr.bf16.mxu1 %v10774_v57  ;;  %9992 = vmatprep.mubr.msk.bf16.mxu1 %vm10775_vm1, %v10774_v57  ;;  %v10640_v1 = vld [vmem:[%s13091_s5 + $0x108] sm:$0xff]  }
 0x288   :  { %v3250_v51 = vadd.f32 %v9420_v50, %v12551_v40  ;;  %9929 = vmatpush3.bf16.msra.mxu0 %v10625_v22  ;;  %v12629_v37 = vadd.f32 %v9445_v23, %v3249_v48  ;;  %v10629_v40 = vld [vmem:[%s13091_s5 + $0x90] sm:$0xff]   ;;  %v10644_v48 = vld [vmem:[%s13091_s5 + $0x118] sm:$0xff]  }
 0x289   :  { %9930 = vmatprep.subr.bf16.mxu0 %v10774_v57  ;;  %9979 = vmatpush3.bf16.msra.mxu1 %v10636_v47  ;;  %v10642_v22 = vld [vmem:[%s13091_s5 + $0x110] sm:$0xff]  }
 0x28a   :  { %v9421_v46 = vpop.f32.mrb[108].mxu0  ;;  %v12635_v36 = vadd.f32 %v9448_v27, %v3250_v51  ;;  %9980 = vmatprep.subr.bf16.mxu1 %v10774_v57 }
 0x28b   :  { %v9422_v35 = vpop.f32.mrb[109].mxu0 }
 0x28c   :  { %v9423_v44 = vadd.f32 %v9422_v35, %v9421_v46  ;;  %v9424_v58 = vpop.f32.mrb[110].mxu0  ;;  %9931 = vmatpush3.bf16.msra.mxu0 %v10626_v53  ;;  %v10648_v35 = vld [vmem:[%s13091_s5 + $0x128] sm:$0xff]  }
 0x28d   :  { %v9425_v60 = vpop.f32.mrb[111].mxu0  ;;  %9956 = vmatprep.subr.bf16.mxu0 %v10774_v57  ;;  %9981 = vmatpush3.bf16.msra.mxu1 %v10637_v54  ;;  %v10646_v54 = vld [vmem:[%s13091_s5 + $0x120] sm:$0xff]  }
 0x28e   :  { %v3251_v33 = vadd.f32 %v9423_v44, %v12567_v10  ;;  %9982 = vmatprep.subr.bf16.mxu1 %v10774_v57  ;;  %v10631_v10 = vld [vmem:[%s13091_s5 + $0xa0] sm:$0xff]  }
 0x28f   :  { %9933 = vmatmul.mubr.bf16.vlgmr.msra.gmra.mrb[160].mxu0 %v5798_v61 }
 0x290   :  { %9957 = vmatpush3.bf16.msra.mxu0 %v10627_v49  ;;  %v12650_v63 = vadd.f32 %v9451_v29, %v3251_v33  ;;  %9972 = vmatprep.mubr.msk.bf16.mxu0 %vm10775_vm1, %v10774_v57 }
 0x291   :  { %9958 = vmatprep.subr.bf16.mxu0 %v10774_v57  ;;  %9983 = vmatpush3.bf16.msra.mxu1 %v10639_v8 }
 0x292   :  { %9984 = vmatprep.subr.bf16.mxu1 %v10774_v57 }
 0x294   :  { %9959 = vmatpush3.bf16.msra.mxu0 %v10628_v55  ;;  %v10650_v55 = vld [vmem:[%s13091_s5 + $0x130] sm:$0xff]  }
 0x295   :  { %9960 = vmatprep.subr.bf16.mxu0 %v10774_v57  ;;  %9985 = vmatpush3.bf16.msra.mxu1 %v10641_v52 }
 0x296   :  { %9986 = vmatprep.subr.bf16.mxu1 %v10774_v57 }
 0x297   :  { %v9499_v56 = vpop.f32.mrb[112].mxu1 }
 0x298   :  { %v9500_v0 = vpop.f32.mrb[113].mxu1  ;;  %9961 = vmatpush3.bf16.msra.mxu0 %v10629_v40 }
 0x299   :  { %v9501_v3 = vadd.f32 %v9500_v0, %v9499_v56  ;;  %v9502_v5 = vpop.f32.mrb[114].mxu1  ;;  %9962 = vmatprep.subr.bf16.mxu0 %v10774_v57  ;;  %9987 = vmatpush3.bf16.msra.mxu1 %v10643_v42  ;;  %v10652_v0 = vld [vmem:[%s13091_s5 + $0x138] sm:$0xff]  }
 0x29a   :  { %v9503_v7 = vpop.f32.mrb[115].mxu1  ;;  %9988 = vmatprep.subr.bf16.mxu1 %v10774_v57 }
 0x29b   :  { %v9504_v38 = vadd.f32 %v9503_v7, %v9502_v5 }
 0x29c   :  { %9963 = vmatpush3.bf16.msra.mxu0 %v10630_v2 }
 0x29d   :  { %9964 = vmatprep.subr.bf16.mxu0 %v10774_v57  ;;  %9989 = vmatpush3.bf16.msra.mxu1 %v10645_v6 }
 0x29e   :  { %9990 = vmatprep.subr.bf16.mxu1 %v10774_v57 }
 0x29f   :  { %v9505_v11 = vpop.f32.mrb[116].mxu1 }
 0x2a0   :  { %v9506_v12 = vpop.f32.mrb[117].mxu1  ;;  %9965 = vmatpush3.bf16.msra.mxu0 %v10631_v10 }
 0x2a1   :  { %v9507_v13 = vadd.f32 %v9506_v12, %v9505_v11  ;;  %v9508_v17 = vpop.f32.mrb[118].mxu1  ;;  %9966 = vmatprep.subr.bf16.mxu0 %v10774_v57  ;;  %9991 = vmatpush3.bf16.msra.mxu1 %v10647_v18 }
 0x2a2   :  { %v9471_v4 = vpop.f32.mrb[112].mxu0  ;;  %v9509_v32 = vpop.f32.mrb[119].mxu1  ;;  %10016 = vmatprep.subr.bf16.mxu1 %v10774_v57 }
 0x2a3   :  { %v9472_v20 = vpop.f32.mrb[113].mxu0 }
 0x2a4   :  { %v9473_v21 = vadd.f32 %v9472_v20, %v9471_v4  ;;  %v9474_v23 = vpop.f32.mrb[114].mxu0  ;;  %9967 = vmatpush3.bf16.msra.mxu0 %v10632_v62  ;;  %v10649_v20 = vld [vmem:[%s13091_s5 + $0x140] sm:$0xff]  }
 0x2a5   :  { %v9475_v25 = vpop.f32.mrb[115].mxu0  ;;  %9968 = vmatprep.subr.bf16.mxu0 %v10774_v57 }
 0x2a6   :  { %v3629_v14 = vadd.f32 %v9473_v21, %v12629_v37  ;;  %v9476_v27 = vadd.f32 %v9475_v25, %v9474_v23 }
 0x2a8   :  { %v3630_v28 = vadd.f32 %v9476_v27, %v12635_v36  ;;  %9969 = vmatpush3.bf16.msra.mxu0 %v10633_v24  ;;  %v3826_v30 = vadd.f32 %v9501_v3, %v3629_v14 }
 0x2a9   :  { %9970 = vmatprep.subr.bf16.mxu0 %v10774_v57 }
 0x2aa   :  { %v9477_v31 = vpop.f32.mrb[116].mxu0  ;;  %v3827_v34 = vadd.f32 %v9504_v38, %v3630_v28  ;;  %v10651_v28 = vld [vmem:[%s13091_s5 + $0x148] sm:$0xff]  }
 0x2ab   :  { %v9478_v29 = vpop.f32.mrb[117].mxu0 }
 0x2ac   :  { %v9479_v9 = vadd.f32 %v9478_v29, %v9477_v31  ;;  %v9480_v39 = vpop.f32.mrb[118].mxu0  ;;  %9971 = vmatpush3.bf16.msra.mxu0 %v10634_v59  ;;  %v10659_v31 = vld [vmem:[%s13091_s5 + $0x180] sm:$0xff]  }
 0x2ad   :  { %v9481_v16 = vpop.f32.mrb[119].mxu0  ;;  %9996 = vmatprep.subr.bf16.mxu0 %v10774_v57 }
 0x2ae   :  { %v3631_v26 = vadd.f32 %v9479_v9, %v12650_v63  ;;  %v10654_v16 = vld [vmem:[%s13091_s5 + $0x158] sm:$0xff]  }
 0x2af   :  { %9973 = vmatmul.mubr.bf16.vlgmr.msra.gmra.mrb[164].mxu0 %v5992_v43 }
 0x2b0   :  { %9997 = vmatpush3.bf16.msra.mxu0 %v10638_v15  ;;  %v3828_v19 = vadd.f32 %v9507_v13, %v3631_v26  ;;  %10012 = vmatprep.mubr.msk.bf16.mxu0 %vm10775_vm1, %v10774_v57  ;;  %v10661_v26 = vld [vmem:[%s13091_s5 + $0x188] sm:$0xff]  }
 0x2b1   :  { %9998 = vmatprep.subr.bf16.mxu0 %v10774_v57 }
 0x2b4   :  { %9999 = vmatpush3.bf16.msra.mxu0 %v10640_v1 }
 0x2b5   :  { %10000 = vmatprep.subr.bf16.mxu0 %v10774_v57 }
 0x2b7   :  { %v9555_v45 = vpop.f32.mrb[120].mxu1 }
 0x2b8   :  { %v9556_v47 = vpop.f32.mrb[121].mxu1  ;;  %10001 = vmatpush3.bf16.msra.mxu0 %v10642_v22 }
 0x2b9   :  { %v9557_v50 = vadd.f32 %v9556_v47, %v9555_v45  ;;  %v9558_v51 = vpop.f32.mrb[122].mxu1  ;;  %10002 = vmatprep.subr.bf16.mxu0 %v10774_v57 }
 0x2ba   :  { %v9559_v53 = vpop.f32.mrb[123].mxu1 }
 0x2bb   :  { %v9560_v37 = vadd.f32 %v9559_v53, %v9558_v51 }
 0x2bc   :  { %10003 = vmatpush3.bf16.msra.mxu0 %v10644_v48  ;;  %v10655_v48 = vld [vmem:[%s13091_s5 + $0x160] sm:$0xff]  }
 0x2bd   :  { %10004 = vmatprep.subr.bf16.mxu0 %v10774_v57 }
 0x2bf   :  { %v9561_v46 = vpop.f32.mrb[124].mxu1 }
 0x2c0   :  { %v9562_v36 = vpop.f32.mrb[125].mxu1  ;;  %10005 = vmatpush3.bf16.msra.mxu0 %v10646_v54  ;;  %v10656_v54 = vld [vmem:[%s13091_s5 + $0x168] sm:$0xff]  }
 0x2c1   :  { %v9563_v44 = vadd.f32 %v9562_v36, %v9561_v46  ;;  %v9564_v58 = vpop.f32.mrb[126].mxu1  ;;  %10006 = vmatprep.subr.bf16.mxu0 %v10774_v57  ;;  %v10665_v46 = vld [vmem:[%s13091_s5 + $0x198] sm:$0xff]  }
 0x2c2   :  { %v9527_v49 = vpop.f32.mrb[120].mxu0  ;;  %v9565_v60 = vpop.f32.mrb[127].mxu1 }
 0x2c3   :  { %v9528_v8 = vpop.f32.mrb[121].mxu0  ;;  %v10657_v60 = vld [vmem:[%s13091_s5 + $0x170] sm:$0xff]  }
 0x2c4   :  { %v9529_v33 = vadd.f32 %v9528_v8, %v9527_v49  ;;  %v9530_v61 = vpop.f32.mrb[122].mxu0  ;;  %10007 = vmatpush3.bf16.msra.mxu0 %v10648_v35  ;;  %v10667_v8 = vld [vmem:[%s13091_s5 + $0x1a0] sm:$0xff]  }
 0x2c5   :  { %v9531_v63 = vpop.f32.mrb[123].mxu0  ;;  %10008 = vmatprep.subr.bf16.mxu0 %v10774_v57 }
 0x2c6   :  { %v4009_v52 = vadd.f32 %v9529_v33, %v3826_v30  ;;  %v9532_v40 = vadd.f32 %v9531_v63, %v9530_v61  ;;  %v10653_v30 = vld [vmem:[%s13091_s5 + $0x150] sm:$0xff]   ;;  %v10658_v61 = vld [vmem:[%s13091_s5 + $0x178] sm:$0xff]   ;;  %v10660_v63 = vld [vmem:[%s13091_s5 + $0x1c0] sm:$0xff]  }
 0x2c8   :  { %v4206_v42 = vadd.f32 %v9557_v50, %v4009_v52  ;;  %v4010_v56 = vadd.f32 %v9532_v40, %v3827_v34  ;;  %10009 = vmatpush3.bf16.msra.mxu0 %v10650_v55  ;;  %v10663_v50 = vld [vmem:[%s13091_s5 + $0x190] sm:$0xff]   ;;  %v10669_v55 = vld [vmem:[%s13091_s5 + $0x1a8] sm:$0xff]  }
 0x2c9   :  { %10010 = vmatprep.subr.bf16.mxu0 %v10774_v57  ;;  %v10671_v52 = vld [vmem:[%s13091_s5 + $0x1b0] sm:$0xff]  }
 0x2ca   :  { %v4216_v2 = vadd.f32 %v12445_v41, %v4206_v42  ;;  %v4207_v3 = vadd.f32 %v9560_v37, %v4010_v56  ;;  %v9533_v5 = vpop.f32.mrb[124].mxu0 }
 0x2cb   :  { %v9534_v6 = vpop.f32.mrb[125].mxu0 }
 0x2cc   :  { %v4219_v7 = vmax.f32 %v4216_v2, 0.0  ;;  %v9535_v38 = vadd.f32 %v9534_v6, %v9533_v5  ;;  %v9536_v10 = vpop.f32.mrb[126].mxu0  ;;  %10011 = vmatpush3.bf16.msra.mxu0 %v10652_v0  ;;  %v4217_v62 = vadd.f32 %v12445_v41, %v4207_v3  ;;  %v10662_v3 = vld [vmem:[%s13091_s5 + $0x1c8] sm:$0xff]   ;;  %v10673_v5 = vld [vmem:[%s13091_s5 + $0x1b8] sm:$0xff]  }
 0x2cd   :  { %v9537_v18 = vpop.f32.mrb[127].mxu0  ;;  %10036 = vmatprep.subr.bf16.mxu0 %v10774_v57 }
 0x2ce   :  { %v8872_v11 = vpack.c.bf16 %v4219_v7, %v4219_v7  ;;  %v4011_v12 = vadd.f32 %v9535_v38, %v3828_v19  ;;  %v4220_v4 = vmax.f32 %v4217_v62, 0.0  ;;  %v10664_v38 = vld [vmem:[%s13091_s5 + $0x1d0] sm:$0xff]   ;;  %v10666_v62 = vld [vmem:[%s13091_s5 + $0x1d8] sm:$0xff]  }
 0x2d0   :  { %4235 = vst [vmem:[#allocation3 + $0xc] sm:$0xf] %v8872_v11  ;;  %v4208_v13 = vadd.f32 %v9563_v44, %v4011_v12 }
 0x2d2   :  { %v4218_v17 = vadd.f32 %v12445_v41, %v4208_v13 }
 0x2d4   :  { %v4221_v32 = vmax.f32 %v4218_v17, 0.0 }
 0x2d6   :  { %v8886_v21 = vpack.c.bf16 %v4221_v32, %v4220_v4 }
 0x2d7   :  { %v9611_v23 = vpop.f32.mrb[128].mxu1  ;;  %v6099_v24 = vld [vmem:[#allocation3 + $0xc] sm:$0xf] }
 0x2d8   :  { %8893 = vst [vmem:[#allocation3 + $0x10] sm:$0xff] %v8886_v21   ;;  %v9612_v25 = vpop.f32.mrb[129].mxu1  ;;  %9993 = vmatmul.mubr.bf16.vlgmr.msra.gmra.mrb[164].mxu1 %v6099_v24 }
 0x2d9   :  { %v9613_v14 = vadd.f32 %v9612_v25, %v9611_v23  ;;  %10017 = vmatpush3.bf16.msra.mxu1 %v10649_v20  ;;  %v9614_v27 = vpop.f32.mrb[130].mxu1  ;;  %10032 = vmatprep.mubr.msk.bf16.mxu1 %vm10775_vm1, %v10774_v57  ;;  %v10668_v23 = vld [vmem:[%s13091_s5 + $0x1e0] sm:$0xff]  }
 0x2da   :  { %v9615_v41 = vpop.f32.mrb[131].mxu1  ;;  %10018 = vmatprep.subr.bf16.mxu1 %v10774_v57 }
 0x2db   :  { %v9616_v59 = vadd.f32 %v9615_v41, %v9614_v27 }
 0x2dd   :  { %10019 = vmatpush3.bf16.msra.mxu1 %v10651_v28  ;;  %v10670_v28 = vld [vmem:[%s13091_s5 + $0x1e8] sm:$0xff]  }
 0x2de   :  { %10020 = vmatprep.subr.bf16.mxu1 %v10774_v57 }
 0x2df   :  { %v9617_v34 = vpop.f32.mrb[132].mxu1  ;;  %v6206_v29 = vld [vmem:[#allocation3 + $0x10] sm:$0xf]  ;;  %v6313_v42 = vld [vmem:[#allocation3 + $0x14] sm:$0xf] }
 0x2e0   :  { %v9618_v9 = vpop.f32.mrb[133].mxu1  ;;  %10013 = vmatmul.mubr.bf16.vlgmr.msra.gmra.mrb[168].mxu0 %v6206_v29 }
 0x2e1   :  { %v9619_v39 = vadd.f32 %v9618_v9, %v9617_v34  ;;  %10021 = vmatpush3.bf16.msra.mxu1 %v10653_v30  ;;  %v9620_v15 = vpop.f32.mrb[134].mxu1  ;;  %10037 = vmatpush3.bf16.msra.mxu0 %v10659_v31  ;;  %v10672_v9 = vld [vmem:[%s13091_s5 + $0x1f0] sm:$0xff]  }
 0x2e2   :  { %v9583_v43 = vpop.f32.mrb[128].mxu0  ;;  %v9621_v1 = vpop.f32.mrb[135].mxu1  ;;  %10022 = vmatprep.subr.bf16.mxu1 %v10774_v57  ;;  %10038 = vmatprep.subr.bf16.mxu0 %v10774_v57 }
 0x2e3   :  { %v9584_v19 = vpop.f32.mrb[129].mxu0  ;;  %10052 = vmatprep.mubr.msk.bf16.mxu0 %vm10775_vm1, %v10774_v57 }
 0x2e4   :  { %v9585_v22 = vadd.f32 %v9584_v19, %v9583_v43  ;;  %v9586_v45 = vpop.f32.mrb[130].mxu0 }
 0x2e5   :  { %10023 = vmatpush3.bf16.msra.mxu1 %v10654_v16  ;;  %v9587_v47 = vpop.f32.mrb[131].mxu0  ;;  %10039 = vmatpush3.bf16.msra.mxu0 %v10661_v26  ;;  %v10674_v16 = vld [vmem:[%s13091_s5 + $0x1f8] sm:$0xff]  }
 0x2e6   :  { %v12769_v51 = vadd.f32 %v9613_v14, %v9585_v22  ;;  %v9588_v53 = vadd.f32 %v9587_v47, %v9586_v45  ;;  %10024 = vmatprep.subr.bf16.mxu1 %v10774_v57  ;;  %10040 = vmatprep.subr.bf16.mxu0 %v10774_v57 }
 0x2e8   :  { %v12773_v37 = vadd.f32 %v9616_v59, %v9588_v53 }
 0x2e9   :  { %10025 = vmatpush3.bf16.msra.mxu1 %v10655_v48  ;;  %10041 = vmatpush3.bf16.msra.mxu0 %v10663_v50 }
 0x2ea   :  { %v9589_v36 = vpop.f32.mrb[132].mxu0  ;;  %10026 = vmatprep.subr.bf16.mxu1 %v10774_v57  ;;  %10042 = vmatprep.subr.bf16.mxu0 %v10774_v57 }
 0x2eb   :  { %v9590_v35 = vpop.f32.mrb[133].mxu0 }
 0x2ec   :  { %v9591_v44 = vadd.f32 %v9590_v35, %v9589_v36  ;;  %v9592_v58 = vpop.f32.mrb[134].mxu0 }
 0x2ed   :  { %10027 = vmatpush3.bf16.msra.mxu1 %v10656_v54  ;;  %v9593_v49 = vpop.f32.mrb[135].mxu0  ;;  %10043 = vmatpush3.bf16.msra.mxu0 %v10665_v46 }
 0x2ee   :  { %v12789_v33 = vadd.f32 %v9619_v39, %v9591_v44  ;;  %10028 = vmatprep.subr.bf16.mxu1 %v10774_v57  ;;  %10044 = vmatprep.subr.bf16.mxu0 %v10774_v57 }
 0x2f1   :  { %10029 = vmatpush3.bf16.msra.mxu1 %v10657_v60  ;;  %10045 = vmatpush3.bf16.msra.mxu0 %v10667_v8 }
 0x2f2   :  { %10030 = vmatprep.subr.bf16.mxu1 %v10774_v57  ;;  %10046 = vmatprep.subr.bf16.mxu0 %v10774_v57 }
 0x2f5   :  { %10031 = vmatpush3.bf16.msra.mxu1 %v10658_v61  ;;  %10047 = vmatpush3.bf16.msra.mxu0 %v10669_v55 }
 0x2f6   :  { %10056 = vmatprep.subr.bf16.mxu1 %v10774_v57  ;;  %10048 = vmatprep.subr.bf16.mxu0 %v10774_v57 }
 0x2f7   :  { %v9667_v40 = vpop.f32.mrb[136].mxu1 }
 0x2f8   :  { %10033 = vmatmul.mubr.bf16.vlgmr.msra.gmra.mrb[168].mxu1 %v6313_v42  ;;  %v9668_v56 = vpop.f32.mrb[137].mxu1 }
 0x2f9   :  { %v9669_v0 = vadd.f32 %v9668_v56, %v9667_v40  ;;  %v9670_v2 = vpop.f32.mrb[138].mxu1  ;;  %10057 = vmatpush3.bf16.msra.mxu1 %v10660_v63  ;;  %10049 = vmatpush3.bf16.msra.mxu0 %v10671_v52 }
 0x2fa   :  { %v9671_v6 = vpop.f32.mrb[139].mxu1  ;;  %10058 = vmatprep.subr.bf16.mxu1 %v10774_v57  ;;  %10050 = vmatprep.subr.bf16.mxu0 %v10774_v57 }
 0x2fb   :  { %v9672_v7 = vadd.f32 %v9671_v6, %v9670_v2  ;;  %10072 = vmatprep.mubr.msk.bf16.mxu1 %vm10775_vm1, %v10774_v57 }
 0x2fd   :  { %10059 = vmatpush3.bf16.msra.mxu1 %v10662_v3  ;;  %10051 = vmatpush3.bf16.msra.mxu0 %v10673_v5 }
 0x2fe   :  { %10060 = vmatprep.subr.bf16.mxu1 %v10774_v57  ;;  %10076 = vmatprep.subr.bf16.mxu0 %v10774_v57 }
 0x2ff   :  { %v9673_v10 = vpop.f32.mrb[140].mxu1 }
 0x300   :  { %v9674_v18 = vpop.f32.mrb[141].mxu1 }
 0x301   :  { %v9675_v11 = vadd.f32 %v9674_v18, %v9673_v10  ;;  %v9676_v12 = vpop.f32.mrb[142].mxu1  ;;  %10061 = vmatpush3.bf16.msra.mxu1 %v10664_v38 }
 0x302   :  { %v9639_v13 = vpop.f32.mrb[136].mxu0  ;;  %v9677_v17 = vpop.f32.mrb[143].mxu1  ;;  %10062 = vmatprep.subr.bf16.mxu1 %v10774_v57 }
 0x303   :  { %v9640_v4 = vpop.f32.mrb[137].mxu0 }
 0x304   :  { %v9641_v32 = vadd.f32 %v9640_v4, %v9639_v13  ;;  %v9642_v20 = vpop.f32.mrb[138].mxu0 }
 0x305   :  { %v9643_v21 = vpop.f32.mrb[139].mxu0  ;;  %10063 = vmatpush3.bf16.msra.mxu1 %v10666_v62 }
 0x306   :  { %v4792_v24 = vadd.f32 %v9641_v32, %v12769_v51  ;;  %v9644_v25 = vadd.f32 %v9643_v21, %v9642_v20  ;;  %10064 = vmatprep.subr.bf16.mxu1 %v10774_v57  ;;  %v8599_v21 = vld [vmem:[%s13092_s4] ss:$0 sm:$0xff] }
 0x308   :  { %v4793_v14 = vadd.f32 %v9644_v25, %v12773_v37  ;;  %v4989_v27 = vadd.f32 %v9669_v0, %v4792_v24 }
 0x309   :  { %10065 = vmatpush3.bf16.msra.mxu1 %v10668_v23 }
 0x30a   :  { %v9645_v41 = vpop.f32.mrb[140].mxu0  ;;  %v4990_v59 = vadd.f32 %v9672_v7, %v4793_v14  ;;  %10066 = vmatprep.subr.bf16.mxu1 %v10774_v57 }
 0x30b   :  { %v9646_v30 = vpop.f32.mrb[141].mxu0 }
 0x30c   :  { %v9647_v31 = vadd.f32 %v9646_v30, %v9645_v41  ;;  %v9648_v34 = vpop.f32.mrb[142].mxu0 }
 0x30d   :  { %v9649_v29 = vpop.f32.mrb[143].mxu0  ;;  %10067 = vmatpush3.bf16.msra.mxu1 %v10670_v28 }
 0x30e   :  { %v4794_v39 = vadd.f32 %v9647_v31, %v12789_v33  ;;  %10068 = vmatprep.subr.bf16.mxu1 %v10774_v57 }
 0x310   :  { %v4991_v15 = vadd.f32 %v9675_v11, %v4794_v39 }
 0x311   :  { %10069 = vmatpush3.bf16.msra.mxu1 %v10672_v9 }
 0x312   :  { %10070 = vmatprep.subr.bf16.mxu1 %v10774_v57 }
 0x315   :  { %10071 = vmatpush3.bf16.msra.mxu1 %v10674_v16 }
 0x317   :  { %v9723_v26 = vpop.f32.mrb[144].mxu1 }
 0x318   :  { %v9724_v43 = vpop.f32.mrb[145].mxu1 }
 0x319   :  { %v9725_v1 = vadd.f32 %v9724_v43, %v9723_v26  ;;  %v9726_v19 = vpop.f32.mrb[146].mxu1 }
 0x31a   :  { %v9727_v22 = vpop.f32.mrb[147].mxu1 }
 0x31b   :  { %v9728_v45 = vadd.f32 %v9727_v22, %v9726_v19  ;;  %v10675_v19 = vld [vmem:[%s13091_s5 + $0x200] sm:$0xff]  }
 0x31f   :  { %v9729_v47 = vpop.f32.mrb[148].mxu1 }
 0x320   :  { %v9730_v48 = vpop.f32.mrb[149].mxu1 }
 0x321   :  { %v9731_v50 = vadd.f32 %v9730_v48, %v9729_v47  ;;  %v9732_v51 = vpop.f32.mrb[150].mxu1 }
 0x322   :  { %v9695_v53 = vpop.f32.mrb[144].mxu0  ;;  %v9733_v37 = vpop.f32.mrb[151].mxu1  ;;  %v10676_v51 = vld [vmem:[%s13091_s5 + $0x208] sm:$0xff]  }
 0x323   :  { %v9696_v54 = vpop.f32.mrb[145].mxu0 }
 0x324   :  { %v9697_v46 = vadd.f32 %v9696_v54, %v9695_v53  ;;  %v9698_v36 = vpop.f32.mrb[146].mxu0  ;;  %v10677_v53 = vld [vmem:[%s13091_s5 + $0x210] sm:$0xff]  }
 0x325   :  { %v9699_v35 = vpop.f32.mrb[147].mxu0 }
 0x326   :  { %v5172_v44 = vadd.f32 %v9697_v46, %v4989_v27  ;;  %v9700_v58 = vadd.f32 %v9699_v35, %v9698_v36  ;;  %v10678_v36 = vld [vmem:[%s13091_s5 + $0x218] sm:$0xff]  }
 0x328   :  { %v5173_v49 = vadd.f32 %v9700_v58, %v4990_v59  ;;  %v5369_v60 = vadd.f32 %v9725_v1, %v5172_v44  ;;  %v10679_v58 = vld [vmem:[%s13091_s5 + $0x220] sm:$0xff]  }
 0x32a   :  { %v9701_v8 = vpop.f32.mrb[148].mxu0  ;;  %v5370_v33 = vadd.f32 %v9728_v45, %v5173_v49  ;;  %v10680_v49 = vld [vmem:[%s13091_s5 + $0x228] sm:$0xff]  }
 0x32b   :  { %v9702_v61 = vpop.f32.mrb[149].mxu0 }
 0x32c   :  { %v9703_v55 = vadd.f32 %v9702_v61, %v9701_v8  ;;  %v9704_v63 = vpop.f32.mrb[150].mxu0  ;;  %v10682_v8 = vld [vmem:[%s13091_s5 + $0x238] sm:$0xff]  }
 0x32d   :  { %v9705_v52 = vpop.f32.mrb[151].mxu0 }
 0x32e   :  { %v5174_v40 = vadd.f32 %v9703_v55, %v4991_v15 }
 0x330   :  { %v5371_v42 = vadd.f32 %v9731_v50, %v5174_v40 }
 0x337   :  { %v9779_v56 = vpop.f32.mrb[152].mxu1 }
 0x338   :  { %v9780_v0 = vpop.f32.mrb[153].mxu1 }
 0x339   :  { %v9781_v2 = vadd.f32 %v9780_v0, %v9779_v56  ;;  %v9782_v3 = vpop.f32.mrb[154].mxu1 }
 0x33a   :  { %v9783_v5 = vpop.f32.mrb[155].mxu1 }
 0x33b   :  { %v9784_v6 = vadd.f32 %v9783_v5, %v9782_v3  ;;  %v10683_v5 = vld [vmem:[%s13093_s7] ss:$16 sps:$4 sm:$0xff]  }
 0x33f   :  { %v9785_v7 = vpop.f32.mrb[156].mxu1 }
 0x340   :  { %v9786_v38 = vpop.f32.mrb[157].mxu1 }
 0x341   :  { %v9787_v10 = vadd.f32 %v9786_v38, %v9785_v7  ;;  %v9788_v18 = vpop.f32.mrb[158].mxu1  ;;  %v10686_v7 = vld [vmem:[%s13093_s7 + $0x8] ss:$16 sps:$4 sm:$0xff]   ;;  %v10688_v38 = vld [vmem:[%s13093_s7 + $0xc] ss:$16 sps:$4 sm:$0xff]  }
 0x342   :  { %v9751_v11 = vpop.f32.mrb[152].mxu0  ;;  %v9789_v12 = vpop.f32.mrb[159].mxu1 }
 0x343   :  { %v9752_v62 = vpop.f32.mrb[153].mxu0  ;;  %v10691_v12 = vld [vmem:[%s13093_s7 + $0x24] ss:$16 sps:$4 sm:$0xff]  }
 0x344   :  { %v9753_v13 = vadd.f32 %v9752_v62, %v9751_v11  ;;  %v9754_v17 = vpop.f32.mrb[154].mxu0  ;;  %v10689_v11 = vld [vmem:[%s13093_s7 + $0x20] ss:$16 sps:$4 sm:$0xff]  }
 0x345   :  { %v9755_v4 = vpop.f32.mrb[155].mxu0 }
 0x346   :  { %v5552_v32 = vadd.f32 %v9753_v13, %v5369_v60  ;;  %v9756_v20 = vadd.f32 %v9755_v4, %v9754_v17  ;;  %v10681_v60 = vld [vmem:[%s13091_s5 + $0x230] sm:$0xff]   ;;  %v10692_v13 = vld [vmem:[%s13093_s7 + $0x28] ss:$16 sps:$4 sm:$0xff]   ;;  %v10694_v4 = vld [vmem:[%s13093_s7 + $0x2c] ss:$16 sps:$4 sm:$0xff]  }
 0x348   :  { %v5749_v23 = vadd.f32 %v9781_v2, %v5552_v32  ;;  %v5553_v24 = vadd.f32 %v9756_v20, %v5370_v33  ;;  %v10697_v32 = vld [vmem:[%s13093_s7 + $0x44] ss:$16 sps:$4 sm:$0xff]   ;;  %v10695_v20 = vld [vmem:[%s13093_s7 + $0x40] ss:$16 sps:$4 sm:$0xff]  }
 0x34a   :  { %v5759_v25 = vadd.f32 %v8599_v21, %v5749_v23  ;;  %v5750_v14 = vadd.f32 %v9784_v6, %v5553_v24  ;;  %v9757_v27 = vpop.f32.mrb[156].mxu0  ;;  %v10698_v23 = vld [vmem:[%s13093_s7 + $0x48] ss:$16 sps:$4 sm:$0xff]   ;;  %v10703_v24 = vld [vmem:[%s13093_s7 + $0x64] ss:$16 sps:$4 sm:$0xff]  }
 0x34b   :  { %v9758_v28 = vpop.f32.mrb[157].mxu0 }
 0x34c   :  { %v5760_v41 = vadd.f32 %v8599_v21, %v5750_v14  ;;  %v9759_v59 = vadd.f32 %v9758_v28, %v9757_v27  ;;  %v9760_v30 = vpop.f32.mrb[158].mxu0  ;;  %v5762_v34 = vmax.f32 %v5759_v25, 0.0  ;;  %v10701_v25 = vld [vmem:[%s13093_s7 + $0x60] ss:$16 sps:$4 sm:$0xff]   ;;  %v10706_v14 = vld [vmem:[%s13093_s7 + $0x6c] ss:$16 sps:$4 sm:$0xff]  }
 0x34d   :  { %v9761_v31 = vpop.f32.mrb[159].mxu0  ;;  %v10704_v27 = vld [vmem:[%s13093_s7 + $0x68] ss:$16 sps:$4 sm:$0xff]  }
 0x34e   :  { %v5763_v29 = vmax.f32 %v5760_v41, 0.0  ;;  %v5554_v9 = vadd.f32 %v9759_v59, %v5371_v42 }
 0x350   :  { %v8891_v39 = vpack.c.bf16 %v5763_v29, %v5762_v34  ;;  %v5751_v15 = vadd.f32 %v9787_v10, %v5554_v9  ;;  %v10707_v34 = vld [vmem:[%s13093_s7 + $0x80] ss:$16 sps:$4 sm:$0xff]   ;;  %v10709_v29 = vld [vmem:[%s13093_s7 + $0x84] ss:$16 sps:$4 sm:$0xff]   ;;  %v10710_v9 = vld [vmem:[%s13093_s7 + $0x88] ss:$16 sps:$4 sm:$0xff]  }
 0x352   :  { %8894 = vst [vmem:[#allocation3 + $0x18] sm:$0xff] %v8891_v39   ;;  %v5761_v16 = vadd.f32 %v8599_v21, %v5751_v15  ;;  %v10700_v21 = vld [vmem:[%s13093_s7 + $0x4c] ss:$16 sps:$4 sm:$0xff]   ;;  %v10715_v15 = vld [vmem:[%s13093_s7 + $0xa4] ss:$16 sps:$4 sm:$0xff]  }
 0x353   :  { %v10712_v39 = vld [vmem:[%s13093_s7 + $0x8c] ss:$16 sps:$4 sm:$0xff]  }
 0x354   :  { %v5764_v26 = vmax.f32 %v5761_v16, 0.0  ;;  %v10718_v16 = vld [vmem:[%s13093_s7 + $0xac] ss:$16 sps:$4 sm:$0xff]  }
 0x356   :  { %v8877_v43 = vpack.c.bf16 %v5764_v26, %v5764_v26  ;;  %v10713_v26 = vld [vmem:[%s13093_s7 + $0xa0] ss:$16 sps:$4 sm:$0xff]  }
 0x357   :  { %v5986_v1 = vpop.f32.mrb[160].mxu1 }
 0x358   :  { %5780 = vst [vmem:[#allocation3 + $0x20] sm:$0xf] %v8877_v43  ;;  %v9954_v22 = vpop.f32.mrb[161].mxu1  ;;  %v10716_v43 = vld [vmem:[%s13093_s7 + $0xa8] ss:$16 sps:$4 sm:$0xff]  }
 0x359   :  { %v5989_v45 = vpop.f32.mrb[162].mxu1  ;;  %v6420_v47 = vld [vmem:[#allocation3 + $0x18] sm:$0xf]  ;;  %v6527_v48 = vld [vmem:[#allocation3 + $0x1c] sm:$0xf]  ;;  %v10776_v22 = vmov 0  }
 0x35a   :  { %v9955_v50 = vpop.f32.mrb[163].mxu1  ;;  %10053 = vmatmul.mubr.bf16.vlgmr.msra.gmra.mrb[172].mxu0 %v6420_v47  ;;  %10073 = vmatmul.mubr.bf16.vlgmr.msra.gmra.mrb[172].mxu1 %v6527_v48  ;;  %v10719_v45 = vld [vmem:[%s13093_s7 + $0xc0] ss:$16 sps:$4 sm:$0xff]   ;;  %v10722_v47 = vld [vmem:[%s13093_s7 + $0xc8] ss:$16 sps:$4 sm:$0xff]  }
 0x35b   :  { %10077 = vmatpush3.bf16.msra.mxu0 %v10675_v19  ;;  %10092 = vmatprep.mubr.msk.bf16.mxu0 %vm10775_vm1, %v10774_v57  ;;  %v10724_v19 = vld [vmem:[%s13093_s7 + $0xcc] ss:$16 sps:$4 sm:$0xff]   ;;  %v10727_v48 = vld [vmem:[%s13093_s7 + $0xe4] ss:$16 sps:$4 sm:$0xff]  }
 0x35c   :  { %10078 = vmatprep.subr.bf16.mxu0 %v10774_v57  ;;  %6999 = vmatprep.mubr.bf16.mxu1 %v10776_v22  ;;  %v10730_v50 = vld [vmem:[%s13093_s7 + $0xec] ss:$16 sps:$4 sm:$0xff]  }
 0x35f   :  { %10079 = vmatpush3.bf16.msra.mxu0 %v10676_v51  ;;  %v6634_v33 = vld [vmem:[#allocation3 + $0x20] sm:$0xf] }
 0x360   :  { %10080 = vmatprep.subr.bf16.mxu0 %v10774_v57  ;;  %v10725_v51 = vld [vmem:[%s13093_s7 + $0xe0] ss:$16 sps:$4 sm:$0xff]  }
 0x362   :  { %v5898_v37 = vpop.f32.mrb[160].mxu0 }
 0x363   :  { %v5987_v54 = vadd.f32 %v5986_v1, %v5898_v37  ;;  %10081 = vmatpush3.bf16.msra.mxu0 %v10677_v53  ;;  %v9934_v46 = vpop.f32.mrb[161].mxu0  ;;  %v10721_v1 = vld [vmem:[%s13093_s7 + $0xc4] ss:$16 sps:$4 sm:$0xff]   ;;  %v10728_v53 = vld [vmem:[%s13093_s7 + $0xe8] ss:$16 sps:$4 sm:$0xff]  }
 0x364   :  { %v5901_v35 = vpop.f32.mrb[162].mxu0  ;;  %10082 = vmatprep.subr.bf16.mxu0 %v10774_v57  ;;  %v10731_v37 = vld [vmem:[%s13094_s9 + $0x40] sm:$0xff]  }
 0x365   :  { %v9935_v44 = vpop.f32.mrb[163].mxu0 }
 0x367   :  { %10083 = vmatpush3.bf16.msra.mxu0 %v10678_v36 }
 0x368   :  { %10084 = vmatprep.subr.bf16.mxu0 %v10774_v57 }
 0x36b   :  { %10085 = vmatpush3.bf16.msra.mxu0 %v10679_v58 }
 0x36c   :  { %10086 = vmatprep.subr.bf16.mxu0 %v10774_v57 }
 0x36f   :  { %10087 = vmatpush3.bf16.msra.mxu0 %v10680_v49 }
 0x370   :  { %10088 = vmatprep.subr.bf16.mxu0 %v10774_v57 }
 0x373   :  { %10089 = vmatpush3.bf16.msra.mxu0 %v10681_v60 }
 0x374   :  { %10090 = vmatprep.subr.bf16.mxu0 %v10774_v57  ;;  %v10685_v57 = vld [vmem:[%s13093_s7 + $0x4] ss:$16 sps:$4 sm:$0xff]  }
 0x375   :  { %6967 = vmatprep.subr.bf16.mxu1 %v10685_v57  ;;  %v10734_v57 = vld [vmem:[%s13094_s9 + $0x80] sm:$0xff]  }
 0x376   :  { %6968 = vmatpush1.bf16.msra.mxu1 %v10683_v5  ;;  %v10733_v5 = vld [vmem:[%s13094_s9] sm:$0xff]  }
 0x377   :  { %10091 = vmatpush3.bf16.msra.mxu0 %v10682_v8  ;;  %6969 = vmatprep.subr.bf16.mxu1 %v10691_v12  ;;  %v10740_v12 = vld [vmem:[%s13094_s9 + $0xd0] sm:$0xff]  }
 0x378   :  { %7008 = vmatprep.subr.bf16.mxu0 %v10688_v38 }
 0x37a   :  { %10093 = vmatmul.mubr.bf16.vlgmr.msra.gmra.mrb[176].mxu0 %v6634_v33  ;;  %6970 = vmatpush1.bf16.msra.mxu1 %v10689_v11  ;;  %v10739_v11 = vld [vmem:[%s13094_s9 + $0x50] sm:$0xff]  }
 0x37b   :  { %7009 = vmatpush1.bf16.msra.mxu0 %v10686_v7  ;;  %6971 = vmatprep.subr.bf16.mxu1 %v10697_v32  ;;  %v10736_v7 = vld [vmem:[%s13094_s9 + $0xc8] sm:$0xff]   ;;  %v10745_v32 = vld [vmem:[%s13094_s9 + $0x18] sm:$0xff]  }
 0x37c   :  { %7010 = vmatprep.subr.bf16.mxu0 %v10694_v4  ;;  %7040 = vmatprep.mubr.bf16.mxu0 %v10776_v22  ;;  %v10744_v4 = vld [vmem:[%s13094_s9 + $0xd8] sm:$0xff]  }
 0x37e   :  { %6972 = vmatpush1.bf16.msra.mxu1 %v10695_v20  ;;  %v10746_v20 = vld [vmem:[%s13094_s9 + $0x98] sm:$0xff]  }
 0x37f   :  { %7011 = vmatpush1.bf16.msra.mxu0 %v10692_v13  ;;  %6973 = vmatprep.subr.bf16.mxu1 %v10703_v24  ;;  %v10742_v13 = vld [vmem:[%s13094_s9 + $0x90] sm:$0xff]   ;;  %v10749_v24 = vld [vmem:[%s13094_s9 + $0x20] sm:$0xff]  }
 0x380   :  { %7012 = vmatprep.subr.bf16.mxu0 %v10700_v21  ;;  %v10747_v21 = vld [vmem:[%s13094_s9 + $0x60] sm:$0xff]  }
 0x382   :  { %v6092_v61 = vpop.f32.mrb[164].mxu0  ;;  %6974 = vmatpush1.bf16.msra.mxu1 %v10701_v25  ;;  %v10750_v25 = vld [vmem:[%s13094_s9 + $0xa0] sm:$0xff]  }
 0x383   :  { %v6098_v55 = vadd.f32 %v6092_v61, %v5987_v54  ;;  %v9974_v63 = vpop.f32.mrb[165].mxu0  ;;  %7013 = vmatpush1.bf16.msra.mxu0 %v10698_v23  ;;  %6975 = vmatprep.subr.bf16.mxu1 %v10709_v29  ;;  %v10732_v54 = vld [vmem:[%s13094_s9 + $0xc0] sm:$0xff]   ;;  %v10759_v29 = vld [vmem:[%s13094_s9 + $0x78] sm:$0xff]  }
 0x384   :  { %v6095_v52 = vpop.f32.mrb[166].mxu0  ;;  %7014 = vmatprep.subr.bf16.mxu0 %v10706_v14  ;;  %v8803_v63 = vld [vmem:[%s13095_s6] ss:$0 sm:$0xff]  ;;  %v10751_v14 = vld [vmem:[%s13094_s9 + $0x68] sm:$0xff]  }
 0x385   :  { %v9975_v40 = vpop.f32.mrb[167].mxu0  ;;  %v10748_v23 = vld [vmem:[%s13094_s9 + $0xe0] sm:$0xff]  }
 0x386   :  { %6976 = vmatpush1.bf16.msra.mxu1 %v10707_v34  ;;  %v10758_v34 = vld [vmem:[%s13094_s9 + $0xb0] sm:$0xff]  }
 0x387   :  { %7015 = vmatpush1.bf16.msra.mxu0 %v10704_v27  ;;  %6977 = vmatprep.subr.bf16.mxu1 %v10715_v15  ;;  %v10752_v27 = vld [vmem:[%s13094_s9 + $0xe8] sm:$0xff]   ;;  %v10762_v15 = vld [vmem:[%s13094_s9 + $0xb8] sm:$0xff]  }
 0x388   :  { %7016 = vmatprep.subr.bf16.mxu0 %v10712_v39  ;;  %v10761_v39 = vld [vmem:[%s13094_s9 + $0x38] sm:$0xff]  }
 0x38a   :  { %6978 = vmatpush1.bf16.msra.mxu1 %v10713_v26 }
 0x38b   :  { %7017 = vmatpush1.bf16.msra.mxu0 %v10710_v9  ;;  %6979 = vmatprep.subr.bf16.mxu1 %v10721_v1  ;;  %v10760_v9 = vld [vmem:[%s13094_s9 + $0xf8] sm:$0xff]  }
 0x38c   :  { %7018 = vmatprep.subr.bf16.mxu0 %v10718_v16  ;;  %v6787_v16 = vlaneseq }
 0x38e   :  { %6980 = vmatpush1.bf16.msra.mxu1 %v10719_v45  ;;  %v6788_v26 = vshrl.u32 %v6787_v16, 7 }
 0x38f   :  { %7019 = vmatpush1.bf16.msra.mxu0 %v10716_v43  ;;  %6981 = vmatprep.subr.bf16.mxu1 %v10727_v48 }
 0x390   :  { %7020 = vmatprep.subr.bf16.mxu0 %v10724_v19  ;;  %v6789_v43 = vsub.s32 0, %v6788_v26  ;;  %v6797_v1 = vsub.s32 2, %v6788_v26  ;;  %v6785_v19 = vld [vmem:[%s13096_s8] sm:$0xf]  ;;  %v6793_v22 = vsub.s32 1, %v6788_v26  ;;  %v6801_v45 = vsub.s32 3, %v6788_v26 }
 0x392   :  { %6982 = vmatpush1.bf16.msra.mxu1 %v10725_v51  ;;  %v6798_v48 = vrot.slane %v6785_v19, %v6797_v1  ;;  %v6802_v51 = vrot.slane %v6785_v19, %v6801_v45 }
 0x393   :  { %7021 = vmatpush1.bf16.msra.mxu0 %v10722_v47  ;;  %9872 = vmatprep.subr.bf16.mxu1 %v10731_v37  ;;  %v6790_v47 = vrot.slane %v6785_v19, %v6789_v43 }
 0x394   :  { %7022 = vmatprep.subr.bf16.mxu0 %v10730_v50  ;;  %v6794_v50 = vrot.slane %v6785_v19, %v6793_v22 }
 0x397   :  { %7023 = vmatpush1.bf16.msra.mxu0 %v10728_v53 }
 0x398   :  { %9894 = vmatprep.subr.bf16.mxu0 %v10732_v54 }
 0x3ab   :  { %v6199_v42 = vpop.f32.mrb[164].mxu1 }
 0x3ac   :  { %v6205_v56 = vadd.f32 %v6199_v42, %v6098_v55  ;;  %v9994_v0 = vpop.f32.mrb[165].mxu1 }
 0x3ad   :  { %v6202_v2 = vpop.f32.mrb[166].mxu1 }
 0x3ae   :  { %v9995_v3 = vpop.f32.mrb[167].mxu1 }
 0x3b3   :  { %v6306_v6 = vpop.f32.mrb[168].mxu0 }
 0x3b4   :  { %v6312_v10 = vadd.f32 %v6306_v6, %v6205_v56  ;;  %v10014_v18 = vpop.f32.mrb[169].mxu0  ;;  %v10735_v6 = vld [vmem:[%s13094_s9 + $0x48] sm:$0xff]  }
 0x3b5   :  { %v6309_v62 = vpop.f32.mrb[170].mxu0  ;;  %v10738_v18 = vld [vmem:[%s13094_s9 + $0x88] sm:$0xff]  }
 0x3b6   :  { %v10015_v17 = vpop.f32.mrb[171].mxu0  ;;  %v10741_v62 = vld [vmem:[%s13094_s9 + $0x10] sm:$0xff]  }
 0x3b7   :  { %v10743_v17 = vld [vmem:[%s13094_s9 + $0x58] sm:$0xff]  }
 0x3cb   :  { %v6413_v28 = vpop.f32.mrb[168].mxu1 }
 0x3cc   :  { %v6419_v41 = vadd.f32 %v6413_v28, %v6312_v10  ;;  %v10034_v59 = vpop.f32.mrb[169].mxu1  ;;  %v10737_v10 = vld [vmem:[%s13094_s9 + $0x8] sm:$0xff]  }
 0x3cd   :  { %v6416_v30 = vpop.f32.mrb[170].mxu1  ;;  %v10753_v28 = vld [vmem:[%s13094_s9 + $0x28] sm:$0xff]   ;;  %v10755_v59 = vld [vmem:[%s13094_s9 + $0x70] sm:$0xff]  }
 0x3ce   :  { %v10035_v31 = vpop.f32.mrb[171].mxu1  ;;  %v10756_v30 = vld [vmem:[%s13094_s9 + $0xf0] sm:$0xff]  }
 0x3cf   :  { %v10757_v31 = vld [vmem:[%s13094_s9 + $0x30] sm:$0xff]  }
 0x42d   :  { %v6520_v46 = vpop.f32.mrb[172].mxu0  ;;  %v6627_v36 = vpop.f32.mrb[172].mxu1 }
 0x42e   :  { %v6526_v35 = vadd.f32 %v6520_v46, %v6419_v41  ;;  %v10054_v44 = vpop.f32.mrb[173].mxu0  ;;  %v10074_v58 = vpop.f32.mrb[173].mxu1  ;;  %v10754_v41 = vld [vmem:[%s13094_s9 + $0xa8] sm:$0xff]  }
 0x42f   :  { %v6523_v49 = vpop.f32.mrb[174].mxu0  ;;  %v6630_v60 = vpop.f32.mrb[174].mxu1 }
 0x430   :  { %v6633_v8 = vadd.f32 %v6627_v36, %v6526_v35  ;;  %v10055_v33 = vpop.f32.mrb[175].mxu0  ;;  %v10075_v61 = vpop.f32.mrb[175].mxu1 }
 0x44d   :  { %v6734_v55 = vpop.f32.mrb[176].mxu0 }
 0x44e   :  { %v6740_v52 = vadd.f32 %v6734_v55, %v6633_v8  ;;  %v10094_v40 = vpop.f32.mrb[177].mxu0 }
 0x44f   :  { %v6737_v42 = vpop.f32.mrb[178].mxu0 }
 0x450   :  { %v6748_v56 = vadd.f32 %v8803_v63, %v6740_v52  ;;  %v10095_v0 = vpop.f32.mrb[179].mxu0 }
 0x452   :  { %v6749_v2 = vmax.f32 %v6748_v56, 0.0 }
 0x454   :  { %v6750_v3 = vpack.c.bf16 %v6749_v2, %v6749_v2 }
 0x456   :  { %6751 = vst [vmem:[#allocation4] sm:$0xf] %v6750_v3 }
 0x45d   :  { %v6752_v38 = vld [vmem:[#allocation4] sm:$0xf] }
 0x45e   :  { %7000 = vmatmul.mubr.bf16.vlgmr.msra.gmra.mrb[176].mxu1 %v6752_v38  ;;  %7041 = vmatmul.mubr.bf16.vlgmr.msra.gmra.mrb[180].mxu0 %v6752_v38 }
 0x45f   :  { %9873 = vmatpush3.bf16.msra.mxu1 %v10733_v5  ;;  %9895 = vmatpush3.bf16.msra.mxu0 %v10734_v57  ;;  %v8836_v5 = vld [vmem:[%s13097_s10] ss:$0 sm:$0xff] }
 0x460   :  { %9874 = vmatprep.subr.bf16.mxu1 %v10735_v6  ;;  %9896 = vmatprep.subr.bf16.mxu0 %v10736_v7 }
 0x463   :  { %9875 = vmatpush3.bf16.msra.mxu1 %v10737_v10  ;;  %9897 = vmatpush3.bf16.msra.mxu0 %v10738_v18 }
 0x464   :  { %9876 = vmatprep.subr.bf16.mxu1 %v10739_v11  ;;  %9898 = vmatprep.subr.bf16.mxu0 %v10740_v12 }
 0x467   :  { %9877 = vmatpush3.bf16.msra.mxu1 %v10741_v62  ;;  %9899 = vmatpush3.bf16.msra.mxu0 %v10742_v13 }
 0x468   :  { %9878 = vmatprep.subr.bf16.mxu1 %v10743_v17  ;;  %9900 = vmatprep.subr.bf16.mxu0 %v10744_v4 }
 0x46b   :  { %9879 = vmatpush3.bf16.msra.mxu1 %v10745_v32  ;;  %9901 = vmatpush3.bf16.msra.mxu0 %v10746_v20 }
 0x46c   :  { %9880 = vmatprep.subr.bf16.mxu1 %v10747_v21  ;;  %9902 = vmatprep.subr.bf16.mxu0 %v10748_v23 }
 0x46f   :  { %9881 = vmatpush3.bf16.msra.mxu1 %v10749_v24  ;;  %9903 = vmatpush3.bf16.msra.mxu0 %v10750_v25 }
 0x470   :  { %9882 = vmatprep.subr.bf16.mxu1 %v10751_v14  ;;  %9904 = vmatprep.subr.bf16.mxu0 %v10752_v27 }
 0x473   :  { %9883 = vmatpush3.bf16.msra.mxu1 %v10753_v28  ;;  %9905 = vmatpush3.bf16.msra.mxu0 %v10754_v41 }
 0x474   :  { %9884 = vmatprep.subr.bf16.mxu1 %v10755_v59  ;;  %9906 = vmatprep.subr.bf16.mxu0 %v10756_v30 }
 0x477   :  { %9885 = vmatpush3.bf16.msra.mxu1 %v10757_v31  ;;  %9907 = vmatpush3.bf16.msra.mxu0 %v10758_v34 }
 0x478   :  { %9886 = vmatprep.subr.bf16.mxu1 %v10759_v29  ;;  %9908 = vmatprep.subr.bf16.mxu0 %v10760_v9 }
 0x47b   :  { %9887 = vmatpush3.bf16.msra.mxu1 %v10761_v39  ;;  %9909 = vmatpush3.bf16.msra.mxu0 %v10762_v15 }
 0x531   :  { %v7001_v53 = vpop.f32.mrb[176].mxu1  ;;  %v7042_v37 = vpop.f32.mrb[180].mxu0 }
 0x532   :  { %v7002_v54 = vadd.f32 %v7001_v53, %v6790_v47  ;;  %v7043_v46 = vadd.f32 %v7042_v37, %v6798_v48  ;;  %v7003_v36 = vpop.f32.mrb[177].mxu1  ;;  %v7044_v35 = vpop.f32.mrb[181].mxu0 }
 0x533   :  { %v7004_v44 = vadd.f32 %v7003_v36, %v6794_v50  ;;  %v7045_v58 = vadd.f32 %v7044_v35, %v6802_v51  ;;  %v7005_v49 = vpop.f32.mrb[178].mxu1  ;;  %v7046_v60 = vpop.f32.mrb[182].mxu0 }
 0x534   :  { %v7049_v8 = vmax.f32 %v7002_v54, 0.0  ;;  %v7051_v33 = vmax.f32 %v7043_v46, 0.0  ;;  %v7006_v61 = vpop.f32.mrb[179].mxu1  ;;  %v7047_v55 = vpop.f32.mrb[183].mxu0 }
 0x535   :  { %v7050_v63 = vmax.f32 %v7004_v44, 0.0  ;;  %v7052_v52 = vmax.f32 %v7045_v58, 0.0 }
 0x536   :  { %v7053_v56 = vpack.c.bf16 %v7049_v8, %v7049_v8  ;;  %v7055_v0 = vpack.c.bf16 %v7051_v33, %v7051_v33 }
 0x537   :  { %v7054_v40 = vpack.c.bf16 %v7050_v63, %v7050_v63  ;;  %v7056_v42 = vpack.c.bf16 %v7052_v52, %v7052_v52 }
 0x539   :  { %7352 = vmatprep.mubr.bf16.mxu1 %v7054_v40  ;;  %7392 = vmatprep.mubr.bf16.mxu0 %v7056_v42 }
 0x53a   :  { %7353 = vmatmul.mubr.bf16.vlgmr.msra.gmra.mrb[180].mxu1 %v7053_v56  ;;  %7393 = vmatmul.mubr.bf16.vlgmr.msra.gmra.mrb[184].mxu0 %v7055_v0 }
 0x60d   :  { %v9888_v2 = vpop.f32.mrb[180].mxu1  ;;  %v9910_v3 = vpop.f32.mrb[184].mxu0 }
 0x60e   :  { %v9889_v57 = vpop.f32.mrb[181].mxu1  ;;  %v9911_v6 = vpop.f32.mrb[185].mxu0 }
 0x60f   :  { %v9890_v7 = vadd.f32 %v9889_v57, %v9888_v2  ;;  %v9912_v38 = vadd.f32 %v9911_v6, %v9910_v3  ;;  %v9891_v10 = vpop.f32.mrb[182].mxu1  ;;  %v9913_v18 = vpop.f32.mrb[186].mxu0 }
 0x610   :  { %v9892_v11 = vpop.f32.mrb[183].mxu1  ;;  %v9914_v12 = vpop.f32.mrb[187].mxu0 }
 0x611   :  { %v7355_v62 = vadd.f32 %v9890_v7, %v8836_v5 }
 0x613   :  { %v7395_v13 = vadd.f32 %v9912_v38, %v7355_v62 }
 0x615   :  { %7400 = vst [vmem:[%s13098_s11] sm:$0xff] %v7395_v13 }

</bundles_post_ra>
